<compile_context>
chip_gen: v7x
topology: tpu7x:2x2x1
jax: 0.10.0
libtpu: 0.0.40
codegen_flags: <defaults>
</compile_context>

<pallas_src>
import functools
import math
from typing import NamedTuple

import jax
import jax.numpy as jnp
from jax.experimental import pallas as pl
from jax.experimental.pallas import tpu as pltpu

LANE = 128
TK_MAX = 2048                       # K tile for the tiled (huge-layer) path
TN_MAX = 1024                       # N tile: 2048x1024 bf16 tile = 4 MiB
FUSE_MAX_W_BYTES = 8 * 1024 * 1024  # fuse layer if padded bf16 weight <= this

# Scaled-down layer widths (real module: [100000, 4096, 1024, 256, 3]).
ENC_DIMS = [2048, 512, 256, 128, 3]
DEC_DIMS = ENC_DIMS[::-1]                       # [3, 128, 256, 512, 2048]
ENC_ACTS = ["relu", "relu", "relu", "none"]     # encoder ends with plain Linear
DEC_ACTS = ["relu", "relu", "relu", "sigmoid"]


def _round_up(x, m):
    return ((x + m - 1) // m) * m


def _apply_act(y, activation):
    if activation == "relu":
        return jnp.maximum(y, 0.0)
    if activation == "sigmoid":
        return jax.nn.sigmoid(y)
    return y


def _match_width(h, d):
    """Pad (with zeros) or slice (exact zero cols) the feature dim to width d."""
    cur = h.shape[1]
    if cur < d:
        return jnp.pad(h, ((0, 0), (0, d - cur)))
    if cur > d:
        return h[:, :d]
    return h


class LayerPlan(NamedTuple):
    route: str      # "fused" | "tiled"
    act: str
    d_out: int      # original (unpadded) output dim
    tk: int         # tile sizes, tiled route only
    tn: int


def _tile_plan(d_in, d_out):
    """Pick (TK, TN) and padded dims for a tiled layer.  Done once, offline."""
    n_lane = _round_up(d_out, LANE)
    tn = min(TN_MAX, n_lane)
    # Ensure >= 2 tiles along the parallel N axis when possible, so the second
    # TensorCore on v7x gets work (neutral on single-core v5e/v6e).
    if n_lane // tn < 2 and n_lane >= 2 * LANE:
        tn = _round_up((n_lane + 1) // 2, LANE)
    n_pad = _round_up(n_lane, tn)
    k_lane = _round_up(d_in, LANE)
    tk = min(TK_MAX, k_lane)
    k_pad = _round_up(k_lane, tk)
    return tk, tn, k_pad, n_pad


# -----------------------------------------------------------------------------
# Tiled linear kernel: grid = (N_tiles, K_tiles), f32 accumulate over K.
# Used for layers that are enormous at the module's real widths.
# -----------------------------------------------------------------------------
def _linear_tiled_kernel(x_ref, w_ref, b_ref, o_ref, acc_ref, *, activation):
    k = pl.program_id(1)

    @pl.when(k == 0)
    def _():
        # Initialize the accumulator with the broadcast bias (saves the
        # epilogue add; bias is stored in f32).
        acc_ref[...] = jnp.broadcast_to(b_ref[...], acc_ref.shape)

    acc_ref[...] += jnp.dot(
        x_ref[...], w_ref[...], preferred_element_type=jnp.float32
    )

    @pl.when(k == pl.num_programs(1) - 1)
    def _():
        o_ref[...] = _apply_act(acc_ref[...], activation).astype(o_ref.dtype)


def linear_tiled(x, w, b, activation, *, tk, tn, out_dtype=None):
    """activation(x @ w + b). w/b are pre-padded to exact (tk, tn) multiples."""
    if out_dtype is None:
        out_dtype = x.dtype
    M, K = x.shape
    K_pad, N_pad = w.shape
    assert K_pad % tk == 0 and N_pad % tn == 0, (K_pad, N_pad, tk, tn)
    assert K <= K_pad, (K, K_pad)

    M_pad = _round_up(max(M, 8), 8)
    if M_pad != M or K_pad != K:            # only the (tiny) activation pads
        x = jnp.pad(x, ((0, M_pad - M), (0, K_pad - K)))

    grid = (N_pad // tn, K_pad // tk)
    kernel = functools.partial(_linear_tiled_kernel, activation=activation)

    return pl.pallas_call(
        kernel,
        out_shape=jax.ShapeDtypeStruct((M_pad, N_pad), out_dtype),
        grid_spec=pltpu.PrefetchScalarGridSpec(
            num_scalar_prefetch=0,
            grid=grid,
            in_specs=[
                pl.BlockSpec((M_pad, tk), lambda n, k: (0, k)),   # x tile
                pl.BlockSpec((tk, tn), lambda n, k: (k, n)),      # w tile
                pl.BlockSpec((1, tn), lambda n, k: (0, n)),       # bias tile
            ],
            out_specs=pl.BlockSpec((M_pad, tn), lambda n, k: (0, n)),
            scratch_shapes=[pltpu.VMEM((M_pad, tn), jnp.float32)],
        ),
        compiler_params=pltpu.CompilerParams(
            dimension_semantics=("parallel", "arbitrary"),
            vmem_limit_bytes=48 * 1024 * 1024,   # safe on v7x's 64 MiB VMEM
        ),
    )(x, w, b)


# -----------------------------------------------------------------------------
# Fused small-MLP kernel: all weights resident in VMEM, one launch, no grid.
# -----------------------------------------------------------------------------
def _fused_mlp_kernel(*refs, acts, n_layers):
    x_ref = refs[0]
    w_refs = refs[1:1 + n_layers]
    b_refs = refs[1 + n_layers:1 + 2 * n_layers]
    o_ref = refs[1 + 2 * n_layers]

    h = x_ref[...]
    for i in range(n_layers):
        y = jnp.dot(h, w_refs[i][...], preferred_element_type=jnp.float32)
        y = _apply_act(y + b_refs[i][...], acts[i])
        # bf16 for the next MXU matmul; keep the final layer output in f32.
        h = y if i == n_layers - 1 else y.astype(x_ref.dtype)
    o_ref[...] = h.astype(o_ref.dtype)


def fused_mlp(x, ws, bs, acts, *, out_dtype=None):
    """Run a chain of small Linear(+act) layers in a single pallas_call."""
    if out_dtype is None:
        out_dtype = x.dtype
    M, _ = x.shape
    n_layers = len(ws)
    n_out = ws[-1].shape[1]

    resident = x.size * x.dtype.itemsize + M * n_out * jnp.dtype(out_dtype).itemsize
    resident += sum(w.size * w.dtype.itemsize for w in ws)
    resident += sum(b.size * b.dtype.itemsize for b in bs)
    vmem_limit = int(min(100 * 1024 * 1024,
                         max(32 * 1024 * 1024, resident + (16 << 20))))

    vspec = pl.BlockSpec(memory_space=pltpu.MemorySpace.VMEM)
    kernel = functools.partial(
        _fused_mlp_kernel, acts=tuple(acts), n_layers=n_layers
    )
    return pl.pallas_call(
        kernel,
        out_shape=jax.ShapeDtypeStruct((M, n_out), out_dtype),
        in_specs=[vspec] * (1 + 2 * n_layers),
        out_specs=vspec,
        compiler_params=pltpu.CompilerParams(vmem_limit_bytes=vmem_limit),
    )(x, *ws, *bs)


# -----------------------------------------------------------------------------
# Parameter init (PyTorch nn.Linear style) + one-time routing / pad / cast.
# -----------------------------------------------------------------------------
def init_params(key, dims):
    params = []
    for d_in, d_out in zip(dims[:-1], dims[1:]):
        key, kw, kb = jax.random.split(key, 3)
        bound = 1.0 / math.sqrt(d_in)
        w = jax.random.uniform(kw, (d_in, d_out), jnp.float32, -bound, bound)
        b = jax.random.uniform(kb, (1, d_out), jnp.float32, -bound, bound)
        params.append((w, b))
    return key, params


def prepare_model(raw_params, acts):
    """One-time (outside jit): choose route per layer, pad weights to that
    route's exact tile grid, cast weights -> bf16 (biases stay f32)."""
    plans, weights, biases = [], [], []
    for (w, b), act in zip(raw_params, acts):
        d_in, d_out = w.shape
        lane_bytes = 2 * _round_up(d_in, LANE) * _round_up(d_out, LANE)
        if lane_bytes <= FUSE_MAX_W_BYTES:
            route, tk, tn = "fused", 0, 0
            k_pad, n_pad = _round_up(d_in, LANE), _round_up(d_out, LANE)
        else:
            route = "tiled"
            tk, tn, k_pad, n_pad = _tile_plan(d_in, d_out)
        w_p = jnp.pad(w, ((0, k_pad - d_in), (0, n_pad - d_out))).astype(jnp.bfloat16)
        b_p = jnp.pad(b, ((0, 0), (0, n_pad - d_out))).astype(jnp.float32)
        plans.append(LayerPlan(route, act, d_out, tk, tn))
        weights.append(w_p)
        biases.append(b_p)
    return plans, weights, biases


# -----------------------------------------------------------------------------
# Forward pass (routing is static; consecutive "fused" layers share one call).
# -----------------------------------------------------------------------------
def make_forward(plans):
    n_layers = len(plans)
    groups = []
    i = 0
    while i < n_layers:
        if plans[i].route == "fused":
            j = i
            while j < n_layers and plans[j].route == "fused":
                j += 1
            groups.append(("fused", tuple(range(i, j))))
            i = j
        else:
            groups.append(("tiled", (i,)))
            i += 1

    @jax.jit
    def forward(x, weights, biases):
        batch = x.shape[0]
        m_pad = _round_up(max(batch, 8), 8)
        h = jnp.pad(x, ((0, m_pad - batch), (0, 0))).astype(jnp.bfloat16)

        for kind, idxs in groups:
            first = idxs[0]
            h = _match_width(h, weights[first].shape[0])
            is_final = idxs[-1] == n_layers - 1
            out_dt = jnp.float32 if is_final else jnp.bfloat16
            if kind == "fused":
                h = fused_mlp(h,
                              [weights[i] for i in idxs],
                              [biases[i] for i in idxs],
                              [plans[i].act for i in idxs],
                              out_dtype=out_dt)
            else:
                p = plans[first]
                h = linear_tiled(h, weights[first], biases[first], p.act,
                                 tk=p.tk, tn=p.tn, out_dtype=out_dt)
        return h[:batch, :plans[-1].d_out]

    return forward


def reference_forward(x, weights, biases, plans):
    """Plain-JAX f32 reference using the same padded bf16 weights (mirrors the
    kernel's initial bf16 cast of x, but keeps f32 between layers)."""
    h = x.astype(jnp.bfloat16).astype(jnp.float32)
    for w, b, p in zip(weights, biases, plans):
        h = _match_width(h, w.shape[0])
        h = _apply_act(h @ w.astype(jnp.float32) + b, p.act)
    return h[:, :plans[-1].d_out]


if __name__ == "__main__":
    key = jax.random.PRNGKey(0)
    key, enc_raw = init_params(key, ENC_DIMS)
    key, dec_raw = init_params(key, DEC_DIMS)
    plans, weights, biases = prepare_model(enc_raw + dec_raw,
                                           ENC_ACTS + DEC_ACTS)
    forward = make_forward(plans)

    key, kx = jax.random.split(key)
    batch = 2
    x = jax.random.uniform(kx, (batch, ENC_DIMS[0]), jnp.float32)

    out = jax.block_until_ready(forward(x, weights, biases))
    assert out.shape == (batch, DEC_DIMS[-1]), out.shape

    ref = reference_forward(x, weights, biases, plans)
    max_err = float(jnp.max(jnp.abs(out - ref)))
    assert max_err < 3e-2, f"forward max abs err {max_err}"

    # Standalone check of the tiled path (the route the two ~800 MB layers take
    # at the module's real widths).
    key, kt, kw2, kb2 = jax.random.split(key, 4)
    Kt, Nt = 2048, 512
    wt = jax.random.uniform(kw2, (Kt, Nt), jnp.float32, -0.03, 0.03)
    bt = jax.random.uniform(kb2, (1, Nt), jnp.float32, -0.03, 0.03)
    tk, tn, k_pad, n_pad = _tile_plan(Kt, Nt)
    wt_p = jnp.pad(wt, ((0, k_pad - Kt), (0, n_pad - Nt))).astype(jnp.bfloat16)
    bt_p = jnp.pad(bt, ((0, 0), (0, n_pad - Nt))).astype(jnp.float32)
    xt = jax.random.uniform(kt, (batch, Kt), jnp.float32)
    yt = linear_tiled(xt.astype(jnp.bfloat16), wt_p, bt_p, "relu",
                      tk=tk, tn=tn, out_dtype=jnp.float32)
    yt = jax.block_until_ready(yt)[:batch, :Nt]
    xt_r = xt.astype(jnp.bfloat16).astype(jnp.float32)
    yt_ref = jnp.maximum(xt_r @ wt_p[:Kt, :Nt].astype(jnp.float32)
                         + bt_p[:, :Nt], 0.0)
    tiled_err = float(jnp.max(jnp.abs(yt - yt_ref)))
    assert tiled_err < 3e-2, f"tiled path max abs err {tiled_err}"

    print("KERNEL_OK")
</pallas_src>

<mosaic_0001>
module attributes {stable_mosaic.version = 11 : i64} {
  func.func @_fused_mlp_kernel(%arg0: memref<8x2048xbf16, #tpu.memory_space<vmem>>, %arg1: memref<2048x512xbf16, #tpu.memory_space<vmem>>, %arg2: memref<512x256xbf16, #tpu.memory_space<vmem>>, %arg3: memref<256x128xbf16, #tpu.memory_space<vmem>>, %arg4: memref<128x128xbf16, #tpu.memory_space<vmem>>, %arg5: memref<128x128xbf16, #tpu.memory_space<vmem>>, %arg6: memref<128x256xbf16, #tpu.memory_space<vmem>>, %arg7: memref<256x512xbf16, #tpu.memory_space<vmem>>, %arg8: memref<512x2048xbf16, #tpu.memory_space<vmem>>, %arg9: memref<1x512xf32, #tpu.memory_space<vmem>>, %arg10: memref<1x256xf32, #tpu.memory_space<vmem>>, %arg11: memref<1x128xf32, #tpu.memory_space<vmem>>, %arg12: memref<1x128xf32, #tpu.memory_space<vmem>>, %arg13: memref<1x128xf32, #tpu.memory_space<vmem>>, %arg14: memref<1x256xf32, #tpu.memory_space<vmem>>, %arg15: memref<1x512xf32, #tpu.memory_space<vmem>>, %arg16: memref<1x2048xf32, #tpu.memory_space<vmem>>, %arg17: memref<8x2048xf32, #tpu.memory_space<vmem>>) attributes {dimension_semantics = [], scalar_prefetch = 0 : i64, scratch_operands = 0 : i64, tpu.core_type = #tpu.core_type<tc>} {
    %c0 = arith.constant 0 : index
    %c0_0 = arith.constant 0 : index
    %0 = vector.load %arg0[%c0, %c0_0] : memref<8x2048xbf16, #tpu.memory_space<vmem>>, vector<8x2048xbf16>
    %c0_1 = arith.constant 0 : index
    %c0_2 = arith.constant 0 : index
    %1 = vector.load %arg1[%c0_1, %c0_2] : memref<2048x512xbf16, #tpu.memory_space<vmem>>, vector<2048x512xbf16>
    %cst = arith.constant dense<0.000000e+00> : vector<8x512xf32>
    %2 = tpu.matmul %0, %1, %cst {dimension_numbers = #tpu.dot_dimension_numbers<[1], [0], [0], [1], [0, 0, 1, 1], [], []>} : vector<8x2048xbf16>, vector<2048x512xbf16>, vector<8x512xf32> -> vector<8x512xf32>
    %c0_3 = arith.constant 0 : index
    %c0_4 = arith.constant 0 : index
    %3 = vector.load %arg9[%c0_3, %c0_4] : memref<1x512xf32, #tpu.memory_space<vmem>>, vector<1x512xf32>
    %4 = vector.broadcast %3 : vector<1x512xf32> to vector<8x512xf32>
    %5 = arith.addf %2, %4 : vector<8x512xf32>
    %cst_5 = arith.constant 0.000000e+00 : f32
    %6 = vector.broadcast %cst_5 : f32 to vector<8x512xf32>
    %7 = arith.maximumf %5, %6 : vector<8x512xf32>
    %8 = arith.truncf %7 : vector<8x512xf32> to vector<8x512xbf16>
    %c0_6 = arith.constant 0 : index
    %c0_7 = arith.constant 0 : index
    %9 = vector.load %arg2[%c0_6, %c0_7] : memref<512x256xbf16, #tpu.memory_space<vmem>>, vector<512x256xbf16>
    %cst_8 = arith.constant dense<0.000000e+00> : vector<8x256xf32>
    %10 = tpu.matmul %8, %9, %cst_8 {dimension_numbers = #tpu.dot_dimension_numbers<[1], [0], [0], [1], [0, 0, 1, 1], [], []>} : vector<8x512xbf16>, vector<512x256xbf16>, vector<8x256xf32> -> vector<8x256xf32>
    %c0_9 = arith.constant 0 : index
    %c0_10 = arith.constant 0 : index
    %11 = vector.load %arg10[%c0_9, %c0_10] : memref<1x256xf32, #tpu.memory_space<vmem>>, vector<1x256xf32>
    %12 = vector.broadcast %11 : vector<1x256xf32> to vector<8x256xf32>
    %13 = arith.addf %10, %12 : vector<8x256xf32>
    %cst_11 = arith.constant 0.000000e+00 : f32
    %14 = vector.broadcast %cst_11 : f32 to vector<8x256xf32>
    %15 = arith.maximumf %13, %14 : vector<8x256xf32>
    %16 = arith.truncf %15 : vector<8x256xf32> to vector<8x256xbf16>
    %c0_12 = arith.constant 0 : index
    %c0_13 = arith.constant 0 : index
    %17 = vector.load %arg3[%c0_12, %c0_13] : memref<256x128xbf16, #tpu.memory_space<vmem>>, vector<256x128xbf16>
    %cst_14 = arith.constant dense<0.000000e+00> : vector<8x128xf32>
    %18 = tpu.matmul %16, %17, %cst_14 {dimension_numbers = #tpu.dot_dimension_numbers<[1], [0], [0], [1], [0, 0, 1, 1], [], []>} : vector<8x256xbf16>, vector<256x128xbf16>, vector<8x128xf32> -> vector<8x128xf32>
    %c0_15 = arith.constant 0 : index
    %c0_16 = arith.constant 0 : index
    %19 = vector.load %arg11[%c0_15, %c0_16] : memref<1x128xf32, #tpu.memory_space<vmem>>, vector<1x128xf32>
    %20 = vector.broadcast %19 : vector<1x128xf32> to vector<8x128xf32>
    %21 = arith.addf %18, %20 : vector<8x128xf32>
    %cst_17 = arith.constant 0.000000e+00 : f32
    %22 = vector.broadcast %cst_17 : f32 to vector<8x128xf32>
    %23 = arith.maximumf %21, %22 : vector<8x128xf32>
    %24 = arith.truncf %23 : vector<8x128xf32> to vector<8x128xbf16>
    %c0_18 = arith.constant 0 : index
    %c0_19 = arith.constant 0 : index
    %25 = vector.load %arg4[%c0_18, %c0_19] : memref<128x128xbf16, #tpu.memory_space<vmem>>, vector<128x128xbf16>
    %cst_20 = arith.constant dense<0.000000e+00> : vector<8x128xf32>
    %26 = tpu.matmul %24, %25, %cst_20 {dimension_numbers = #tpu.dot_dimension_numbers<[1], [0], [0], [1], [0, 0, 1, 1], [], []>} : vector<8x128xbf16>, vector<128x128xbf16>, vector<8x128xf32> -> vector<8x128xf32>
    %c0_21 = arith.constant 0 : index
    %c0_22 = arith.constant 0 : index
    %27 = vector.load %arg12[%c0_21, %c0_22] : memref<1x128xf32, #tpu.memory_space<vmem>>, vector<1x128xf32>
    %28 = vector.broadcast %27 : vector<1x128xf32> to vector<8x128xf32>
    %29 = arith.addf %26, %28 : vector<8x128xf32>
    %30 = arith.truncf %29 : vector<8x128xf32> to vector<8x128xbf16>
    %c0_23 = arith.constant 0 : index
    %c0_24 = arith.constant 0 : index
    %31 = vector.load %arg5[%c0_23, %c0_24] : memref<128x128xbf16, #tpu.memory_space<vmem>>, vector<128x128xbf16>
    %cst_25 = arith.constant dense<0.000000e+00> : vector<8x128xf32>
    %32 = tpu.matmul %30, %31, %cst_25 {dimension_numbers = #tpu.dot_dimension_numbers<[1], [0], [0], [1], [0, 0, 1, 1], [], []>} : vector<8x128xbf16>, vector<128x128xbf16>, vector<8x128xf32> -> vector<8x128xf32>
    %c0_26 = arith.constant 0 : index
    %c0_27 = arith.constant 0 : index
    %33 = vector.load %arg13[%c0_26, %c0_27] : memref<1x128xf32, #tpu.memory_space<vmem>>, vector<1x128xf32>
    %34 = vector.broadcast %33 : vector<1x128xf32> to vector<8x128xf32>
    %35 = arith.addf %32, %34 : vector<8x128xf32>
    %cst_28 = arith.constant 0.000000e+00 : f32
    %36 = vector.broadcast %cst_28 : f32 to vector<8x128xf32>
    %37 = arith.maximumf %35, %36 : vector<8x128xf32>
    %38 = arith.truncf %37 : vector<8x128xf32> to vector<8x128xbf16>
    %c0_29 = arith.constant 0 : index
    %c0_30 = arith.constant 0 : index
    %39 = vector.load %arg6[%c0_29, %c0_30] : memref<128x256xbf16, #tpu.memory_space<vmem>>, vector<128x256xbf16>
    %cst_31 = arith.constant dense<0.000000e+00> : vector<8x256xf32>
    %40 = tpu.matmul %38, %39, %cst_31 {dimension_numbers = #tpu.dot_dimension_numbers<[1], [0], [0], [1], [0, 0, 1, 1], [], []>} : vector<8x128xbf16>, vector<128x256xbf16>, vector<8x256xf32> -> vector<8x256xf32>
    %c0_32 = arith.constant 0 : index
    %c0_33 = arith.constant 0 : index
    %41 = vector.load %arg14[%c0_32, %c0_33] : memref<1x256xf32, #tpu.memory_space<vmem>>, vector<1x256xf32>
    %42 = vector.broadcast %41 : vector<1x256xf32> to vector<8x256xf32>
    %43 = arith.addf %40, %42 : vector<8x256xf32>
    %cst_34 = arith.constant 0.000000e+00 : f32
    %44 = vector.broadcast %cst_34 : f32 to vector<8x256xf32>
    %45 = arith.maximumf %43, %44 : vector<8x256xf32>
    %46 = arith.truncf %45 : vector<8x256xf32> to vector<8x256xbf16>
    %c0_35 = arith.constant 0 : index
    %c0_36 = arith.constant 0 : index
    %47 = vector.load %arg7[%c0_35, %c0_36] : memref<256x512xbf16, #tpu.memory_space<vmem>>, vector<256x512xbf16>
    %cst_37 = arith.constant dense<0.000000e+00> : vector<8x512xf32>
    %48 = tpu.matmul %46, %47, %cst_37 {dimension_numbers = #tpu.dot_dimension_numbers<[1], [0], [0], [1], [0, 0, 1, 1], [], []>} : vector<8x256xbf16>, vector<256x512xbf16>, vector<8x512xf32> -> vector<8x512xf32>
    %c0_38 = arith.constant 0 : index
    %c0_39 = arith.constant 0 : index
    %49 = vector.load %arg15[%c0_38, %c0_39] : memref<1x512xf32, #tpu.memory_space<vmem>>, vector<1x512xf32>
    %50 = vector.broadcast %49 : vector<1x512xf32> to vector<8x512xf32>
    %51 = arith.addf %48, %50 : vector<8x512xf32>
    %cst_40 = arith.constant 0.000000e+00 : f32
    %52 = vector.broadcast %cst_40 : f32 to vector<8x512xf32>
    %53 = arith.maximumf %51, %52 : vector<8x512xf32>
    %54 = arith.truncf %53 : vector<8x512xf32> to vector<8x512xbf16>
    %c0_41 = arith.constant 0 : index
    %c0_42 = arith.constant 0 : index
    %55 = vector.load %arg8[%c0_41, %c0_42] : memref<512x2048xbf16, #tpu.memory_space<vmem>>, vector<512x2048xbf16>
    %cst_43 = arith.constant dense<0.000000e+00> : vector<8x2048xf32>
    %56 = tpu.matmul %54, %55, %cst_43 {dimension_numbers = #tpu.dot_dimension_numbers<[1], [0], [0], [1], [0, 0, 1, 1], [], []>} : vector<8x512xbf16>, vector<512x2048xbf16>, vector<8x2048xf32> -> vector<8x2048xf32>
    %c0_44 = arith.constant 0 : index
    %c0_45 = arith.constant 0 : index
    %57 = vector.load %arg16[%c0_44, %c0_45] : memref<1x2048xf32, #tpu.memory_space<vmem>>, vector<1x2048xf32>
    %58 = vector.broadcast %57 : vector<1x2048xf32> to vector<8x2048xf32>
    %59 = arith.addf %56, %58 : vector<8x2048xf32>
    %60 = arith.negf %59 : vector<8x2048xf32>
    %61 = math.exp %60 : vector<8x2048xf32>
    %cst_46 = arith.constant 1.000000e+00 : f32
    %62 = vector.broadcast %cst_46 : f32 to vector<8x2048xf32>
    %63 = arith.addf %62, %61 : vector<8x2048xf32>
    %64 = arith.divf %62, %63 : vector<8x2048xf32>
    %c0_47 = arith.constant 0 : index
    %c0_48 = arith.constant 0 : index
    %65 = vector.load %arg17[%c0_47, %c0_48] : memref<8x2048xf32, #tpu.memory_space<vmem>>, vector<8x2048xf32>
    tpu.vector_store %arg17[%c0_47, %c0_48], %64 {strides = array<i32>} : memref<8x2048xf32, #tpu.memory_space<vmem>>, vector<8x2048xf32>,
    return
  }
}

</mosaic_0001>

<bundles_post_ra>
// kernel: forward.1
= control target key start
LH: loop header
LB: loop body
LE: loop exit
PB: predicated region body
PF: predicated region fallthrough
CT: control target
= control target key end

     0   :  { %s13055_s0 = inlined_call_operand.vmem [shape: bf16[8,2048], index: 0, kind: input, shape index: {}]   ;;  %s13056_s1 = inlined_call_operand.hbm [shape: bf16[2048,512], index: 1, kind: input, shape index: {}]   ;;  %s13057_s2 = inlined_call_operand.hbm [shape: bf16[512,256], index: 2, kind: input, shape index: {}]   ;;  %s13058_s3 = inlined_call_operand.hbm [shape: bf16[256,128], index: 3, kind: input, shape index: {}]   ;;  %s13059_s4 = inlined_call_operand.hbm [shape: bf16[128,128], index: 4, kind: input, shape index: {}]   ;;  %s13060_s5 = inlined_call_operand.hbm [shape: bf16[128,128], index: 5, kind: input, shape index: {}]   ;;  %s13061_s6 = inlined_call_operand.hbm [shape: bf16[128,256], index: 6, kind: input, shape index: {}]   ;;  %s13062_s7 = inlined_call_operand.hbm [shape: bf16[256,512], index: 7, kind: input, shape index: {}]   ;;  %s13063_s8 = inlined_call_operand.hbm [shape: bf16[512,2048], index: 8, kind: input, shape index: {}]   ;;  %s13064_s9 = inlined_call_operand.hbm [shape: f32[1,512], index: 9, kind: input, shape index: {}]   ;;  %s13065_s10 = inlined_call_operand.hbm [shape: f32[1,256], index: 10, kind: input, shape index: {}]   ;;  %s13066_s11 = inlined_call_operand.hbm [shape: f32[1,128], index: 11, kind: input, shape index: {}]   ;;  %s13067_s12 = inlined_call_operand.hbm [shape: f32[1,128], index: 12, kind: input, shape index: {}]   ;;  %s13068_s13 = inlined_call_operand.hbm [shape: f32[1,128], index: 13, kind: input, shape index: {}]   ;;  %s13069_s14 = inlined_call_operand.hbm [shape: f32[1,256], index: 14, kind: input, shape index: {}]   ;;  %s13070_s15 = inlined_call_operand.hbm [shape: f32[1,512], index: 15, kind: input, shape index: {}]   ;;  %s13071_s16 = inlined_call_operand.hbm [shape: f32[1,2048], index: 16, kind: input, shape index: {}]   ;;  %s13072_s17 = inlined_call_operand.vmem [shape: f32[8,2048], index: 17, kind: output, shape index: {}]  }
   0x1   :  { %13076 = sst [smem:[#allocation36_spill]] %s13055_s0 }
   0x2   :  { %13077 = sst [smem:[#allocation37_spill]] %s13056_s1 }
   0x3   :  { %13078 = sst [smem:[#allocation38_spill]] %s13072_s17 }
   0x4   :  { %22 = vsyncpa [#allocation3], 0 }
   0x5   :  { %23 = vsyncpa [#allocation5], 0 }
   0x6   :  { %24 = vsyncpa [#allocation8], 0 }
   0x7   :  { %25 = vsyncpa [#allocation11], 0 }
   0x8   :  { %26 = vsyncpa [#allocation14], 0 }
   0x9   :  { %27 = vsyncpa [#allocation17], 0 }
   0xa   :  { %28 = vsyncpa [#allocation20], 0 }
   0xb   :  { %29 = vsyncpa [#allocation23], 0 }
   0xc   :  { %30 = vsyncpa [#allocation26], 0  ;;  %s12471_s24 = smov [#allocation4]   ;;  %s12101_s28 = scalar_lea.hbm %s13057_s2, 8192 }
   0xd   :  { %s50_s25 = sshll.u32 %s12471_s24, 4  ;;  %p12102_p0 = scmp.ne.s32.totalorder %s13057_s2, %s12101_s28  ;;  %s51_s25 = int_to_ptr.vmem [resolvable:$true] %s50_s25 }
   0xe   :  { %p12105_p1 = scmp.lt.u32.totalorder %s12101_s28, %s13057_s2 }
  0x10   :  { %p12107_p2 = pnand %p12105_p1, %p12102_p0 }
  0x12   :  { %12110 = shalt.err (!%p12107_p2)
}
  0x13   :  { %s12111_s19 = scalar_lea.vmem %s51_s25, 8192  ;;  %p12116_p4 = scmp.lt.s32.totalorder %s51_s25, %s51_s25 }
  0x14   :  { %p12112_p3 = scmp.ne.s32.totalorder %s51_s25, %s12111_s19  ;;  %p12117_p5 = scmp.lt.s32.totalorder %s12111_s19, %s12111_s19 }
  0x16   :  { %p12118_p6 = por %p12117_p5, %p12116_p4 }
  0x18   :  { %p12119_p7 = pnand %p12118_p6, %p12112_p3 }
  0x1a   :  { %12122 = shalt.err (!%p12119_p7)
}
  0x1b   :  { %s12472_s1 = smov 128   ;;  %s12473_s20 = smov 8  }
  0x1c   :  { %56 = dma.hbm_to_vmem [thread:$0]  %s13057_s2, 8192, %s51_s25, [#allocation5], %s12472_s1, %s12472_s1, %s12473_s20  }
  0x1d   :  { %s12474_s23 = smov [#allocation7]   ;;  %s12475_s26 = smov [#allocation10]  }
  0x1e   :  { %s74_s24 = sshll.u32 %s12474_s23, 4  ;;  %s98_s27 = sshll.u32 %s12475_s26, 4  ;;  %s75_s24 = int_to_ptr.vmem [resolvable:$true] %s74_s24  ;;  %s99_s27 = int_to_ptr.vmem [resolvable:$true] %s98_s27 }
  0x1f   :  { %s12123_s0 = scalar_lea.hbm %s13059_s4, 1024 }
  0x20   :  { %p12124_p8 = scmp.ne.s32.totalorder %s13059_s4, %s12123_s0  ;;  %p12127_p9 = scmp.lt.u32.totalorder %s12123_s0, %s13059_s4 }
  0x22   :  { %p12129_p10 = pnand %p12127_p9, %p12124_p8 }
  0x24   :  { %12132 = shalt.err (!%p12129_p10)
}
  0x25   :  { %s12133_s2 = scalar_lea.vmem %s75_s24, 1024  ;;  %p12138_p12 = scmp.lt.s32.totalorder %s75_s24, %s75_s24 }
  0x26   :  { %p12134_p11 = scmp.ne.s32.totalorder %s75_s24, %s12133_s2  ;;  %p12139_p13 = scmp.lt.s32.totalorder %s12133_s2, %s12133_s2 }
  0x28   :  { %p12140_p0 = por %p12139_p13, %p12138_p12 }
  0x2a   :  { %p12141_p1 = pnand %p12140_p0, %p12134_p11 }
  0x2c   :  { %12144 = shalt.err (!%p12141_p1)
}
  0x2d   :  { %s12476_s25 = smov 64   ;;  %s12477_s21 = smov 4  }
  0x2e   :  { %80 = dma.hbm_to_vmem [thread:$0]  %s13059_s4, 1024, %s75_s24, [#allocation8], %s12476_s25, %s12476_s25, %s12477_s21  }
  0x2f   :  { %s12145_s28 = scalar_lea.hbm %s13061_s6, 2048 }
  0x30   :  { %p12146_p2 = scmp.ne.s32.totalorder %s13061_s6, %s12145_s28  ;;  %p12149_p3 = scmp.lt.u32.totalorder %s12145_s28, %s13061_s6 }
  0x32   :  { %p12151_p4 = pnand %p12149_p3, %p12146_p2 }
  0x34   :  { %12154 = shalt.err (!%p12151_p4)
}
  0x35   :  { %s12155_s19 = scalar_lea.vmem %s99_s27, 2048  ;;  %p12160_p6 = scmp.lt.s32.totalorder %s99_s27, %s99_s27 }
  0x36   :  { %p12156_p5 = scmp.ne.s32.totalorder %s99_s27, %s12155_s19  ;;  %p12161_p7 = scmp.lt.s32.totalorder %s12155_s19, %s12155_s19 }
  0x38   :  { %p12162_p8 = por %p12161_p7, %p12160_p6 }
  0x3a   :  { %p12163_p9 = pnand %p12162_p8, %p12156_p5 }
  0x3c   :  { %12166 = shalt.err (!%p12163_p9)
}
  0x3d   :  { %104 = dma.hbm_to_vmem [thread:$0]  %s13061_s6, 2048, %s99_s27, [#allocation11], %s12472_s1, %s12472_s1, %s12473_s20  }
  0x3e   :  { %s12478_s2 = smov [#allocation13]   ;;  %s12167_s26 = scalar_lea.hbm %s13063_s8, 65536 }
  0x3f   :  { %s122_s22 = sshll.u32 %s12478_s2, 4  ;;  %p12168_p10 = scmp.ne.s32.totalorder %s13063_s8, %s12167_s26  ;;  %s123_s22 = int_to_ptr.vmem [resolvable:$true] %s122_s22 }
  0x40   :  { %p12171_p11 = scmp.lt.u32.totalorder %s12167_s26, %s13063_s8 }
  0x42   :  { %p12173_p12 = pnand %p12171_p11, %p12168_p10 }
  0x44   :  { %12176 = shalt.err (!%p12173_p12)
}
  0x45   :  { %s12177_s18 = scalar_lea.vmem %s123_s22, 65536  ;;  %p12182_p0 = scmp.lt.s32.totalorder %s123_s22, %s123_s22 }
  0x46   :  { %p12178_p13 = scmp.ne.s32.totalorder %s123_s22, %s12177_s18  ;;  %p12183_p1 = scmp.lt.s32.totalorder %s12177_s18, %s12177_s18 }
  0x48   :  { %p12184_p2 = por %p12183_p1, %p12182_p0 }
  0x4a   :  { %p12185_p3 = pnand %p12184_p2, %p12178_p13 }
  0x4c   :  { %12188 = shalt.err (!%p12185_p3)
}
  0x4d   :  { %s12479_s6 = smov 1024   ;;  %s12480_s27 = smov [#allocation16]  }
  0x4e   :  { %128 = dma.hbm_to_vmem [thread:$0]  %s13063_s8, 65536, %s123_s22, [#allocation14], %s12479_s6, %s12479_s6, %s12476_s25  }
  0x4f   :  { %s145_s19 = sshll.u32 %s12480_s27, 4  ;;  %s12481_s4 = smov [#allocation19]   ;;  %s146_s19 = int_to_ptr.vmem [resolvable:$true] %s145_s19 }
  0x50   :  { %s165_s24 = sshll.u32 %s12481_s4, 4  ;;  %s12189_s17 = scalar_lea.hbm %s13065_s10, 32  ;;  %s166_s24 = int_to_ptr.vmem [resolvable:$true] %s165_s24 }
  0x51   :  { %p12190_p4 = scmp.ne.s32.totalorder %s13065_s10, %s12189_s17  ;;  %p12193_p5 = scmp.lt.u32.totalorder %s12189_s17, %s13065_s10 }
  0x53   :  { %p12195_p6 = pnand %p12193_p5, %p12190_p4 }
  0x55   :  { %12198 = shalt.err (!%p12195_p6)
}
  0x56   :  { %s12199_s8 = scalar_lea.vmem %s146_s19, 32  ;;  %p12204_p8 = scmp.lt.s32.totalorder %s146_s19, %s146_s19 }
  0x57   :  { %p12200_p7 = scmp.ne.s32.totalorder %s146_s19, %s12199_s8  ;;  %p12205_p9 = scmp.lt.s32.totalorder %s12199_s8, %s12199_s8 }
  0x59   :  { %p12206_p10 = por %p12205_p9, %p12204_p8 }
  0x5b   :  { %p12207_p11 = pnand %p12206_p10, %p12200_p7 }
  0x5d   :  { %12210 = shalt.err (!%p12207_p11)
}
  0x5e   :  { %148 = dma.hbm_to_vmem [thread:$0]  %s13065_s10, 32, %s146_s19, [#allocation17]  }
  0x5f   :  { %s12211_s1 = scalar_lea.hbm %s13067_s12, 16 }
  0x60   :  { %p12212_p12 = scmp.ne.s32.totalorder %s13067_s12, %s12211_s1  ;;  %p12215_p13 = scmp.lt.u32.totalorder %s12211_s1, %s13067_s12 }
  0x62   :  { %p12217_p0 = pnand %p12215_p13, %p12212_p12 }
  0x64   :  { %12220 = shalt.err (!%p12217_p0)
}
  0x65   :  { %s12221_s23 = scalar_lea.vmem %s166_s24, 16  ;;  %s12225_s17 = scalar_lea.vmem %s166_s24, 32 }
  0x66   :  { %p12222_p1 = scmp.ne.s32.totalorder %s166_s24, %s12221_s23  ;;  %p12226_p2 = scmp.lt.s32.totalorder %s166_s24, %s166_s24 }
  0x67   :  { %p12227_p3 = scmp.lt.s32.totalorder %s12225_s17, %s12221_s23 }
  0x69   :  { %p12228_p4 = por %p12227_p3, %p12226_p2 }
  0x6b   :  { %p12229_p5 = pnand %p12228_p4, %p12222_p1 }
  0x6d   :  { %12232 = shalt.err (!%p12229_p5)
}
  0x6e   :  { %168 = dma.hbm_to_vmem [thread:$0]  %s13067_s12, 16, %s166_s24, [#allocation20]  }
  0x6f   :  { %s12482_s26 = smov [#allocation22]   ;;  %s12483_s29 = smov [#allocation2]  }
  0x70   :  { %s185_s28 = sshll.u32 %s12482_s26, 4  ;;  %s38_s0 = sshll.u32 %s12483_s29, 4  ;;  %s186_s28 = int_to_ptr.vmem [resolvable:$true] %s185_s28  ;;  %s39_s0 = int_to_ptr.vmem [resolvable:$true] %s38_s0 }
  0x71   :  { %s12233_s30 = scalar_lea.hbm %s13069_s14, 32 }
  0x72   :  { %p12234_p6 = scmp.ne.s32.totalorder %s13069_s14, %s12233_s30  ;;  %p12237_p7 = scmp.lt.u32.totalorder %s12233_s30, %s13069_s14 }
  0x74   :  { %p12239_p8 = pnand %p12237_p7, %p12234_p6 }
  0x76   :  { %12242 = shalt.err (!%p12239_p8)
}
  0x77   :  { %s12243_s12 = scalar_lea.vmem %s186_s28, 32  ;;  %p12248_p10 = scmp.lt.s32.totalorder %s186_s28, %s186_s28 }
  0x78   :  { %p12244_p9 = scmp.ne.s32.totalorder %s186_s28, %s12243_s12  ;;  %p12249_p11 = scmp.lt.s32.totalorder %s12243_s12, %s12243_s12 }
  0x7a   :  { %p12250_p12 = por %p12249_p11, %p12248_p10 }
  0x7c   :  { %p12251_p13 = pnand %p12250_p12, %p12244_p9 }
  0x7e   :  { %12254 = shalt.err (!%p12251_p13)
}
  0x7f   :  { %188 = dma.hbm_to_vmem [thread:$0]  %s13069_s14, 32, %s186_s28, [#allocation23]  }
  0x80   :  { %s13079_s23 = sld [smem:[#allocation37_spill]] }
  0x86   :  { %s12255_s17 = scalar_lea.hbm %s13079_s23, 65536 }
  0x87   :  { %p12256_p0 = scmp.ne.s32.totalorder %s13079_s23, %s12255_s17  ;;  %p12259_p1 = scmp.lt.u32.totalorder %s12255_s17, %s13079_s23 }
  0x89   :  { %p12261_p2 = pnand %p12259_p1, %p12256_p0 }
  0x8b   :  { %12264 = shalt.err (!%p12261_p2)
}
  0x8c   :  { %s12265_s8 = scalar_lea.vmem %s39_s0, 65536  ;;  %p12270_p4 = scmp.lt.s32.totalorder %s39_s0, %s39_s0 }
  0x8d   :  { %p12266_p3 = scmp.ne.s32.totalorder %s39_s0, %s12265_s8  ;;  %p12271_p5 = scmp.lt.s32.totalorder %s12265_s8, %s12265_s8 }
  0x8f   :  { %p12272_p6 = por %p12271_p5, %p12270_p4 }
  0x91   :  { %p12273_p7 = pnand %p12272_p6, %p12266_p3 }
  0x93   :  { %12276 = shalt.err (!%p12273_p7)
}
  0x94   :  { %s12484_s14 = smov 256   ;;  %s12485_s28 = smov 16  }
  0x95   :  { %44 = dma.hbm_to_vmem [thread:$0]  %s13079_s23, 65536, %s39_s0, [#allocation3], %s12484_s14, %s12484_s14, %s12485_s28  }
  0x96   :  { %s12486_s18 = smov [#allocation6]   ;;  %s12487_s1 = smov [#allocation9]  }
  0x97   :  { %s62_s6 = sshll.u32 %s12486_s18, 4  ;;  %s86_s20 = sshll.u32 %s12487_s1, 4  ;;  %s63_s6 = int_to_ptr.vmem [resolvable:$true] %s62_s6  ;;  %s87_s20 = int_to_ptr.vmem [resolvable:$true] %s86_s20 }
  0x98   :  { %s12277_s27 = scalar_lea.hbm %s13058_s3, 2048 }
  0x99   :  { %p12278_p8 = scmp.ne.s32.totalorder %s13058_s3, %s12277_s27  ;;  %p12281_p9 = scmp.lt.u32.totalorder %s12277_s27, %s13058_s3 }
  0x9b   :  { %p12283_p10 = pnand %p12281_p9, %p12278_p8 }
  0x9d   :  { %12286 = shalt.err (!%p12283_p10)
}
  0x9e   :  { %s12287_s0 = scalar_lea.vmem %s63_s6, 2048  ;;  %p12292_p12 = scmp.lt.s32.totalorder %s63_s6, %s63_s6 }
  0x9f   :  { %p12288_p11 = scmp.ne.s32.totalorder %s63_s6, %s12287_s0  ;;  %p12293_p13 = scmp.lt.s32.totalorder %s12287_s0, %s12287_s0 }
  0xa1   :  { %p12294_p0 = por %p12293_p13, %p12292_p12 }
  0xa3   :  { %p12295_p1 = pnand %p12294_p0, %p12288_p11 }
  0xa5   :  { %12298 = shalt.err (!%p12295_p1)
}
  0xa6   :  { %68 = dma.hbm_to_vmem [thread:$0]  %s13058_s3, 2048, %s63_s6, [#allocation5], %s12476_s25, %s12476_s25, %s12477_s21  }
  0xa7   :  { %s12299_s8 = scalar_lea.hbm %s13060_s5, 1024 }
  0xa8   :  { %p12300_p2 = scmp.ne.s32.totalorder %s13060_s5, %s12299_s8  ;;  %p12303_p3 = scmp.lt.u32.totalorder %s12299_s8, %s13060_s5 }
  0xaa   :  { %p12305_p4 = pnand %p12303_p3, %p12300_p2 }
  0xac   :  { %12308 = shalt.err (!%p12305_p4)
}
  0xad   :  { %s12309_s12 = scalar_lea.vmem %s87_s20, 1024  ;;  %p12314_p6 = scmp.lt.s32.totalorder %s87_s20, %s87_s20 }
  0xae   :  { %p12310_p5 = scmp.ne.s32.totalorder %s87_s20, %s12309_s12  ;;  %p12315_p7 = scmp.lt.s32.totalorder %s12309_s12, %s12309_s12 }
  0xb0   :  { %p12316_p8 = por %p12315_p7, %p12314_p6 }
  0xb2   :  { %p12317_p9 = pnand %p12316_p8, %p12310_p5 }
  0xb4   :  { %12320 = shalt.err (!%p12317_p9)
}
  0xb5   :  { %92 = dma.hbm_to_vmem [thread:$0]  %s13060_s5, 1024, %s87_s20, [#allocation8], %s12476_s25, %s12476_s25, %s12477_s21  }
  0xb6   :  { %s12488_s24 = smov [#allocation12]   ;;  %s12489_s4 = smov [#allocation15]  }
  0xb7   :  { %s110_s27 = sshll.u32 %s12488_s24, 4  ;;  %s135_s2 = sshll.u32 %s12489_s4, 4  ;;  %s111_s27 = int_to_ptr.vmem [resolvable:$true] %s110_s27  ;;  %s136_s2 = int_to_ptr.vmem [resolvable:$true] %s135_s2 }
  0xb8   :  { %s12321_s0 = scalar_lea.hbm %s13062_s7, 8192 }
  0xb9   :  { %p12322_p10 = scmp.ne.s32.totalorder %s13062_s7, %s12321_s0  ;;  %p12325_p11 = scmp.lt.u32.totalorder %s12321_s0, %s13062_s7 }
  0xbb   :  { %p12327_p12 = pnand %p12325_p11, %p12322_p10 }
  0xbd   :  { %12330 = shalt.err (!%p12327_p12)
}
  0xbe   :  { %s12331_s5 = scalar_lea.vmem %s111_s27, 8192  ;;  %p12336_p0 = scmp.lt.s32.totalorder %s111_s27, %s111_s27 }
  0xbf   :  { %p12332_p13 = scmp.ne.s32.totalorder %s111_s27, %s12331_s5  ;;  %p12337_p1 = scmp.lt.s32.totalorder %s12331_s5, %s12331_s5 }
  0xc1   :  { %p12338_p2 = por %p12337_p1, %p12336_p0 }
  0xc3   :  { %p12339_p3 = pnand %p12338_p2, %p12332_p13 }
  0xc5   :  { %12342 = shalt.err (!%p12339_p3)
}
  0xc6   :  { %116 = dma.hbm_to_vmem [thread:$0]  %s13062_s7, 8192, %s111_s27, [#allocation11], %s12484_s14, %s12484_s14, %s12485_s28  }
  0xc7   :  { %s12343_s22 = scalar_lea.hbm %s13064_s9, 64 }
  0xc8   :  { %p12344_p4 = scmp.ne.s32.totalorder %s13064_s9, %s12343_s22  ;;  %p12347_p5 = scmp.lt.u32.totalorder %s12343_s22, %s13064_s9 }
  0xca   :  { %p12349_p6 = pnand %p12347_p5, %p12344_p4 }
  0xcc   :  { %12352 = shalt.err (!%p12349_p6)
}
  0xcd   :  { %s12353_s3 = scalar_lea.vmem %s136_s2, 64  ;;  %p12358_p8 = scmp.lt.s32.totalorder %s136_s2, %s136_s2 }
  0xce   :  { %p12354_p7 = scmp.ne.s32.totalorder %s136_s2, %s12353_s3  ;;  %p12359_p9 = scmp.lt.s32.totalorder %s12353_s3, %s12353_s3 }
  0xd0   :  { %p12360_p10 = por %p12359_p9, %p12358_p8 }
  0xd2   :  { %p12361_p11 = pnand %p12360_p10, %p12354_p7 }
  0xd4   :  { %12364 = shalt.err (!%p12361_p11)
}
  0xd5   :  { %138 = dma.hbm_to_vmem [thread:$0]  %s13064_s9, 64, %s136_s2, [#allocation14]  }
  0xd6   :  { %s12490_s28 = smov [#allocation18]   ;;  %s12491_s24 = smov [#allocation21]  }
  0xd7   :  { %s155_s6 = sshll.u32 %s12490_s28, 4  ;;  %s175_s27 = sshll.u32 %s12491_s24, 4  ;;  %s156_s6 = int_to_ptr.vmem [resolvable:$true] %s155_s6  ;;  %s176_s27 = int_to_ptr.vmem [resolvable:$true] %s175_s27 }
  0xd8   :  { %s12365_s10 = scalar_lea.hbm %s13066_s11, 16 }
  0xd9   :  { %p12366_p12 = scmp.ne.s32.totalorder %s13066_s11, %s12365_s10  ;;  %p12369_p13 = scmp.lt.u32.totalorder %s12365_s10, %s13066_s11 }
  0xdb   :  { %p12371_p0 = pnand %p12369_p13, %p12366_p12 }
  0xdd   :  { %12374 = shalt.err (!%p12371_p0)
}
  0xde   :  { %s12375_s9 = scalar_lea.vmem %s156_s6, 16  ;;  %s12379_s2 = scalar_lea.vmem %s156_s6, 32 }
  0xdf   :  { %p12376_p1 = scmp.ne.s32.totalorder %s156_s6, %s12375_s9  ;;  %p12380_p2 = scmp.lt.s32.totalorder %s156_s6, %s156_s6 }
  0xe0   :  { %p12381_p3 = scmp.lt.s32.totalorder %s12379_s2, %s12375_s9 }
  0xe2   :  { %p12382_p4 = por %p12381_p3, %p12380_p2 }
  0xe4   :  { %p12383_p5 = pnand %p12382_p4, %p12376_p1 }
  0xe6   :  { %12386 = shalt.err (!%p12383_p5)
}
  0xe7   :  { %158 = dma.hbm_to_vmem [thread:$0]  %s13066_s11, 16, %s156_s6, [#allocation17]  }
  0xe8   :  { %s12387_s20 = scalar_lea.hbm %s13068_s13, 16 }
  0xe9   :  { %p12388_p6 = scmp.ne.s32.totalorder %s13068_s13, %s12387_s20  ;;  %p12391_p7 = scmp.lt.u32.totalorder %s12387_s20, %s13068_s13 }
  0xeb   :  { %p12393_p8 = pnand %p12391_p7, %p12388_p6 }
  0xed   :  { %12396 = shalt.err (!%p12393_p8)
}
  0xee   :  { %s12397_s1 = scalar_lea.vmem %s176_s27, 16  ;;  %s12401_s12 = scalar_lea.vmem %s176_s27, 32 }
  0xef   :  { %p12398_p9 = scmp.ne.s32.totalorder %s176_s27, %s12397_s1  ;;  %p12402_p10 = scmp.lt.s32.totalorder %s176_s27, %s176_s27 }
  0xf0   :  { %p12403_p11 = scmp.lt.s32.totalorder %s12401_s12, %s12397_s1 }
  0xf2   :  { %p12404_p12 = por %p12403_p11, %p12402_p10 }
  0xf4   :  { %p12405_p13 = pnand %p12404_p12, %p12398_p9 }
  0xf6   :  { %12408 = shalt.err (!%p12405_p13)
}
  0xf7   :  { %178 = dma.hbm_to_vmem [thread:$0]  %s13068_s13, 16, %s176_s27, [#allocation20]  }
  0xf8   :  { %s12492_s7 = smov [#allocation24]   ;;  %s12493_s28 = smov [#allocation25]  }
  0xf9   :  { %s195_s14 = sshll.u32 %s12492_s7, 4  ;;  %s205_s6 = sshll.u32 %s12493_s28, 4  ;;  %s196_s14 = int_to_ptr.vmem [resolvable:$true] %s195_s14  ;;  %s206_s6 = int_to_ptr.vmem [resolvable:$true] %s205_s6 }
  0xfa   :  { %s12409_s17 = scalar_lea.hbm %s13070_s15, 64 }
  0xfb   :  { %p12410_p0 = scmp.ne.s32.totalorder %s13070_s15, %s12409_s17  ;;  %p12413_p1 = scmp.lt.u32.totalorder %s12409_s17, %s13070_s15 }
  0xfd   :  { %p12415_p2 = pnand %p12413_p1, %p12410_p0 }
  0xff   :  { %12418 = shalt.err (!%p12415_p2)
}
 0x100   :  { %s12419_s13 = scalar_lea.vmem %s196_s14, 64  ;;  %p12424_p4 = scmp.lt.s32.totalorder %s196_s14, %s196_s14 }
 0x101   :  { %p12420_p3 = scmp.ne.s32.totalorder %s196_s14, %s12419_s13  ;;  %p12425_p5 = scmp.lt.s32.totalorder %s12419_s13, %s12419_s13 }
 0x103   :  { %p12426_p6 = por %p12425_p5, %p12424_p4 }
 0x105   :  { %p12427_p7 = pnand %p12426_p6, %p12420_p3 }
 0x107   :  { %12430 = shalt.err (!%p12427_p7)
}
 0x108   :  { %198 = dma.hbm_to_vmem [thread:$0]  %s13070_s15, 64, %s196_s14, [#allocation23]  }
 0x109   :  { %s12431_s29 = scalar_lea.hbm %s13071_s16, 256 }
 0x10a   :  { %p12432_p8 = scmp.ne.s32.totalorder %s13071_s16, %s12431_s29  ;;  %p12435_p9 = scmp.lt.u32.totalorder %s12431_s29, %s13071_s16 }
 0x10c   :  { %p12437_p10 = pnand %p12435_p9, %p12432_p8 }
 0x10e   :  { %12440 = shalt.err (!%p12437_p10)
}
 0x10f   :  { %s12441_s8 = scalar_lea.vmem %s206_s6, 256  ;;  %p12446_p12 = scmp.lt.s32.totalorder %s206_s6, %s206_s6 }
 0x110   :  { %p12442_p11 = scmp.ne.s32.totalorder %s206_s6, %s12441_s8  ;;  %p12447_p13 = scmp.lt.s32.totalorder %s12441_s8, %s12441_s8 }
 0x112   :  { %p12448_p0 = por %p12447_p13, %p12446_p12 }
 0x114   :  { %p12449_p1 = pnand %p12448_p0, %p12442_p11 }
 0x116   :  { %12452 = shalt.err (!%p12449_p1)
}
 0x117   :  { %208 = dma.hbm_to_vmem [thread:$0]  %s13071_s16, 256, %s206_s6, [#allocation26]  }
 0x118   :  { %12453 = dma.done.wait [#allocation3], 65536  }
 0x119   :  { %12454 = vsyncadd [#allocation3], 4294901760 }
 0x11a   :  { %12455 = dma.done.wait [#allocation5], 10240  }
 0x11b   :  { %12456 = vsyncadd [#allocation5], 4294957056 }
 0x11c   :  { %12457 = dma.done.wait [#allocation8], 2048  }
 0x11d   :  { %12458 = vsyncadd [#allocation8], 4294965248 }
 0x11e   :  { %12459 = dma.done.wait [#allocation11], 10240  }
 0x11f   :  { %12460 = vsyncadd [#allocation11], 4294957056 }
 0x120   :  { %12461 = dma.done.wait [#allocation14], 65600  }
 0x121   :  { %12462 = vsyncadd [#allocation14], 4294901696 }
 0x122   :  { %12463 = dma.done.wait [#allocation17], 48  }
 0x123   :  { %12464 = vsyncadd [#allocation17], 4294967248 }
 0x124   :  { %12465 = dma.done.wait [#allocation20], 32  }
 0x125   :  { %12466 = vsyncadd [#allocation20], 4294967264 }
 0x126   :  { %12467 = dma.done.wait [#allocation23], 96  }
 0x127   :  { %12468 = vsyncadd [#allocation23], 4294967200 }
 0x128   :  { %12469 = dma.done.wait [#allocation26], 256  }
 0x129   :  { %12470 = vsyncadd [#allocation26], 4294967040  ;;  %v11005_v0 = vld [vmem:[#allocation2 + $0x4] ss:$16 sps:$4 sm:$0xff]   ;;  %v11007_v1 = vld [vmem:[#allocation2 + $0xc] ss:$16 sps:$4 sm:$0xff]  }
 0x12a   :  { %3416 = vmatprep.subr.bf16.mxu0 %v11005_v0  ;;  %v11009_v2 = vld [vmem:[#allocation2] ss:$16 sps:$4 sm:$0xff]   ;;  %v11010_v3 = vld [vmem:[#allocation2 + $0x8] ss:$16 sps:$4 sm:$0xff]   ;;  %3744 = vmatprep.subr.bf16.mxu1 %v11007_v1  ;;  %v11011_v4 = vld [vmem:[#allocation2 + $0x24] ss:$16 sps:$4 sm:$0xff]  }
 0x12b   :  { %3417 = vmatpush1.bf16.msra.mxu0 %v11009_v2  ;;  %3745 = vmatpush1.bf16.msra.mxu1 %v11010_v3  ;;  %v11013_v5 = vld [vmem:[#allocation2 + $0x2c] ss:$16 sps:$4 sm:$0xff]   ;;  %v11015_v6 = vld [vmem:[#allocation2 + $0x20] ss:$16 sps:$4 sm:$0xff]   ;;  %v11016_v7 = vld [vmem:[#allocation2 + $0x28] ss:$16 sps:$4 sm:$0xff]  }
 0x12c   :  { %3418 = vmatprep.subr.bf16.mxu0 %v11011_v4  ;;  %3746 = vmatprep.subr.bf16.mxu1 %v11013_v5  ;;  %v11017_v8 = vld [vmem:[#allocation2 + $0x44] ss:$16 sps:$4 sm:$0xff]   ;;  %v11019_v9 = vld [vmem:[#allocation2 + $0x4c] ss:$16 sps:$4 sm:$0xff]   ;;  %v11021_v10 = vld [vmem:[#allocation2 + $0x40] ss:$16 sps:$4 sm:$0xff]  }
 0x12d   :  { %v11022_v11 = vld [vmem:[#allocation2 + $0x48] ss:$16 sps:$4 sm:$0xff]   ;;  %v11023_v12 = vld [vmem:[#allocation2 + $0x64] ss:$16 sps:$4 sm:$0xff]   ;;  %v11025_v13 = vld [vmem:[#allocation2 + $0x6c] ss:$16 sps:$4 sm:$0xff]  }
 0x12e   :  { %v11027_v14 = vld [vmem:[#allocation2 + $0x60] ss:$16 sps:$4 sm:$0xff]   ;;  %v11028_v15 = vld [vmem:[#allocation2 + $0x68] ss:$16 sps:$4 sm:$0xff]   ;;  %v11029_v16 = vld [vmem:[#allocation2 + $0x84] ss:$16 sps:$4 sm:$0xff]  }
 0x12f   :  { %3419 = vmatpush1.bf16.msra.mxu0 %v11015_v6  ;;  %3747 = vmatpush1.bf16.msra.mxu1 %v11016_v7  ;;  %v11031_v17 = vld [vmem:[#allocation2 + $0x8c] ss:$16 sps:$4 sm:$0xff]   ;;  %v11033_v18 = vld [vmem:[#allocation2 + $0x80] ss:$16 sps:$4 sm:$0xff]   ;;  %v11034_v19 = vld [vmem:[#allocation2 + $0x88] ss:$16 sps:$4 sm:$0xff]  }
 0x130   :  { %3420 = vmatprep.subr.bf16.mxu0 %v11017_v8  ;;  %3748 = vmatprep.subr.bf16.mxu1 %v11019_v9  ;;  %v11035_v20 = vld [vmem:[#allocation2 + $0xa4] ss:$16 sps:$4 sm:$0xff]   ;;  %v11037_v21 = vld [vmem:[#allocation2 + $0xac] ss:$16 sps:$4 sm:$0xff]   ;;  %v11039_v22 = vld [vmem:[#allocation2 + $0xa0] ss:$16 sps:$4 sm:$0xff]  }
 0x131   :  { %v11040_v23 = vld [vmem:[#allocation2 + $0xa8] ss:$16 sps:$4 sm:$0xff]   ;;  %v11041_v24 = vld [vmem:[#allocation2 + $0xc4] ss:$16 sps:$4 sm:$0xff]   ;;  %v11043_v25 = vld [vmem:[#allocation2 + $0xcc] ss:$16 sps:$4 sm:$0xff]  }
 0x132   :  { %v11045_v26 = vld [vmem:[#allocation2 + $0xc0] ss:$16 sps:$4 sm:$0xff]   ;;  %v11046_v27 = vld [vmem:[#allocation2 + $0xc8] ss:$16 sps:$4 sm:$0xff]   ;;  %v11047_v28 = vld [vmem:[#allocation2 + $0xe4] ss:$16 sps:$4 sm:$0xff]  }
 0x133   :  { %3421 = vmatpush1.bf16.msra.mxu0 %v11021_v10  ;;  %3749 = vmatpush1.bf16.msra.mxu1 %v11022_v11  ;;  %v11049_v29 = vld [vmem:[#allocation2 + $0xec] ss:$16 sps:$4 sm:$0xff]   ;;  %v11051_v30 = vld [vmem:[#allocation2 + $0xe0] ss:$16 sps:$4 sm:$0xff]   ;;  %v11052_v31 = vld [vmem:[#allocation2 + $0xe8] ss:$16 sps:$4 sm:$0xff]  }
 0x134   :  { %3422 = vmatprep.subr.bf16.mxu0 %v11023_v12  ;;  %3750 = vmatprep.subr.bf16.mxu1 %v11025_v13  ;;  %v11053_v32 = vld [vmem:[#allocation2 + $0x104] ss:$16 sps:$4 sm:$0xff]   ;;  %v11055_v33 = vld [vmem:[#allocation2 + $0x10c] ss:$16 sps:$4 sm:$0xff]   ;;  %v11057_v34 = vld [vmem:[#allocation2 + $0x100] ss:$16 sps:$4 sm:$0xff]  }
 0x135   :  { %v11058_v35 = vld [vmem:[#allocation2 + $0x108] ss:$16 sps:$4 sm:$0xff]   ;;  %v11059_v36 = vld [vmem:[#allocation2 + $0x124] ss:$16 sps:$4 sm:$0xff]   ;;  %v11061_v37 = vld [vmem:[#allocation2 + $0x12c] ss:$16 sps:$4 sm:$0xff]  }
 0x136   :  { %v11063_v38 = vld [vmem:[#allocation2 + $0x120] ss:$16 sps:$4 sm:$0xff]   ;;  %v11064_v39 = vld [vmem:[#allocation2 + $0x128] ss:$16 sps:$4 sm:$0xff]   ;;  %v11065_v40 = vld [vmem:[#allocation2 + $0x144] ss:$16 sps:$4 sm:$0xff]  }
 0x137   :  { %3423 = vmatpush1.bf16.msra.mxu0 %v11027_v14  ;;  %3751 = vmatpush1.bf16.msra.mxu1 %v11028_v15  ;;  %v11067_v41 = vld [vmem:[#allocation2 + $0x14c] ss:$16 sps:$4 sm:$0xff]   ;;  %v11069_v42 = vld [vmem:[#allocation2 + $0x140] ss:$16 sps:$4 sm:$0xff]   ;;  %v11070_v43 = vld [vmem:[#allocation2 + $0x148] ss:$16 sps:$4 sm:$0xff]  }
 0x138   :  { %3424 = vmatprep.subr.bf16.mxu0 %v11029_v16  ;;  %3752 = vmatprep.subr.bf16.mxu1 %v11031_v17  ;;  %v11071_v44 = vld [vmem:[#allocation2 + $0x164] ss:$16 sps:$4 sm:$0xff]   ;;  %v11073_v45 = vld [vmem:[#allocation2 + $0x16c] ss:$16 sps:$4 sm:$0xff]   ;;  %s13080_s18 = sld [smem:[#allocation36_spill]]  ;;  %vm12495_vm0 = vmmov 0  }
 0x139   :  { %v11075_v47 = vld [vmem:[#allocation2 + $0x160] ss:$16 sps:$4 sm:$0xff]   ;;  %v11076_v49 = vld [vmem:[#allocation2 + $0x168] ss:$16 sps:$4 sm:$0xff]   ;;  %v11077_v50 = vld [vmem:[#allocation2 + $0x184] ss:$16 sps:$4 sm:$0xff]  }
 0x13a   :  { %v11079_v51 = vld [vmem:[#allocation2 + $0x18c] ss:$16 sps:$4 sm:$0xff]   ;;  %v11081_v52 = vld [vmem:[#allocation2 + $0x180] ss:$16 sps:$4 sm:$0xff]   ;;  %v11082_v53 = vld [vmem:[#allocation2 + $0x188] ss:$16 sps:$4 sm:$0xff]  }
 0x13b   :  { %3425 = vmatpush1.bf16.msra.mxu0 %v11033_v18  ;;  %3753 = vmatpush1.bf16.msra.mxu1 %v11034_v19  ;;  %v11083_v54 = vld [vmem:[#allocation2 + $0x1a4] ss:$16 sps:$4 sm:$0xff]   ;;  %v11085_v55 = vld [vmem:[#allocation2 + $0x1ac] ss:$16 sps:$4 sm:$0xff]   ;;  %v11087_v56 = vld [vmem:[#allocation2 + $0x1a0] ss:$16 sps:$4 sm:$0xff]  }
 0x13c   :  { %3426 = vmatprep.subr.bf16.mxu0 %v11035_v20  ;;  %3754 = vmatprep.subr.bf16.mxu1 %v11037_v21  ;;  %v11088_v57 = vld [vmem:[#allocation2 + $0x1a8] ss:$16 sps:$4 sm:$0xff]   ;;  %v11089_v58 = vld [vmem:[#allocation2 + $0x1c4] ss:$16 sps:$4 sm:$0xff]   ;;  %v11091_v59 = vld [vmem:[#allocation2 + $0x1cc] ss:$16 sps:$4 sm:$0xff]  }
 0x13d   :  { %v11093_v60 = vld [vmem:[#allocation2 + $0x1c0] ss:$16 sps:$4 sm:$0xff]   ;;  %v11094_v61 = vld [vmem:[#allocation2 + $0x1c8] ss:$16 sps:$4 sm:$0xff]   ;;  %v11095_v62 = vld [vmem:[#allocation2 + $0x1e4] ss:$16 sps:$4 sm:$0xff]  }
 0x13e   :  { %v258_v46 = vld [vmem:[%s13080_s18] sm:$0xff]  ;;  %v11097_v63 = vld [vmem:[#allocation2 + $0x1ec] ss:$16 sps:$4 sm:$0xff]   ;;  %v11100_v1 = vld [vmem:[#allocation2 + $0x1e8] ss:$16 sps:$4 sm:$0xff]   ;;  %s13081_s27 = sld [smem:[#allocation38_spill]] }
 0x13f   :  { %3427 = vmatpush1.bf16.msra.mxu0 %v11039_v22  ;;  %3755 = vmatpush1.bf16.msra.mxu1 %v11040_v23  ;;  %v9551_v48 = vcombine.high %v258_v46, %v258_v46  ;;  %v11099_v0 = vld [vmem:[#allocation2 + $0x1e0] ss:$16 sps:$4 sm:$0xff]   ;;  %v11105_v2 = vld [vmem:[#allocation2 + $0x204] ss:$16 sps:$4 sm:$0xff]   ;;  %v11108_v3 = vld [vmem:[#allocation2 + $0x20c] ss:$16 sps:$4 sm:$0xff]   ;;  %v9550_v4 = vcombine.low %v258_v46, %v258_v46 }
 0x140   :  { %3428 = vmatprep.subr.bf16.mxu0 %v11041_v24  ;;  %3756 = vmatprep.subr.bf16.mxu1 %v11043_v25  ;;  %v11103_v5 = vld [vmem:[#allocation2 + $0x200] ss:$16 sps:$4 sm:$0xff]   ;;  %v11106_v6 = vld [vmem:[#allocation2 + $0x208] ss:$16 sps:$4 sm:$0xff]   ;;  %v11111_v7 = vld [vmem:[#allocation2 + $0x224] ss:$16 sps:$4 sm:$0xff]  }
 0x141   :  { %3448 = vmatprep.mubr.bf16.mxu0 %v9551_v48  ;;  %3776 = vmatprep.mubr.bf16.mxu1 %v9551_v48  ;;  %v11114_v8 = vld [vmem:[#allocation2 + $0x22c] ss:$16 sps:$4 sm:$0xff]   ;;  %v11109_v9 = vld [vmem:[#allocation2 + $0x220] ss:$16 sps:$4 sm:$0xff]   ;;  %v11112_v10 = vld [vmem:[#allocation2 + $0x228] ss:$16 sps:$4 sm:$0xff]  }
 0x142   :  { %v11117_v11 = vld [vmem:[#allocation2 + $0x244] ss:$16 sps:$4 sm:$0xff]   ;;  %v11120_v12 = vld [vmem:[#allocation2 + $0x24c] ss:$16 sps:$4 sm:$0xff]   ;;  %v11115_v13 = vld [vmem:[#allocation2 + $0x240] ss:$16 sps:$4 sm:$0xff]  }
 0x143   :  { %3429 = vmatpush1.bf16.msra.mxu0 %v11045_v26  ;;  %3757 = vmatpush1.bf16.msra.mxu1 %v11046_v27  ;;  %v11118_v14 = vld [vmem:[#allocation2 + $0x248] ss:$16 sps:$4 sm:$0xff]   ;;  %v11123_v15 = vld [vmem:[#allocation2 + $0x264] ss:$16 sps:$4 sm:$0xff]   ;;  %v11126_v16 = vld [vmem:[#allocation2 + $0x26c] ss:$16 sps:$4 sm:$0xff]  }
 0x144   :  { %3430 = vmatprep.subr.bf16.mxu0 %v11047_v28  ;;  %3758 = vmatprep.subr.bf16.mxu1 %v11049_v29  ;;  %v11121_v17 = vld [vmem:[#allocation2 + $0x260] ss:$16 sps:$4 sm:$0xff]   ;;  %v11124_v18 = vld [vmem:[#allocation2 + $0x268] ss:$16 sps:$4 sm:$0xff]   ;;  %v11129_v19 = vld [vmem:[#allocation2 + $0x284] ss:$16 sps:$4 sm:$0xff]  }
 0x145   :  { %v11132_v20 = vld [vmem:[#allocation2 + $0x28c] ss:$16 sps:$4 sm:$0xff]   ;;  %v11127_v21 = vld [vmem:[#allocation2 + $0x280] ss:$16 sps:$4 sm:$0xff]   ;;  %v11130_v22 = vld [vmem:[#allocation2 + $0x288] ss:$16 sps:$4 sm:$0xff]  }
 0x146   :  { %v11135_v23 = vld [vmem:[#allocation2 + $0x2a4] ss:$16 sps:$4 sm:$0xff]   ;;  %v11138_v24 = vld [vmem:[#allocation2 + $0x2ac] ss:$16 sps:$4 sm:$0xff]   ;;  %v11133_v25 = vld [vmem:[#allocation2 + $0x2a0] ss:$16 sps:$4 sm:$0xff]  }
 0x147   :  { %3431 = vmatpush1.bf16.msra.mxu0 %v11051_v30  ;;  %3759 = vmatpush1.bf16.msra.mxu1 %v11052_v31  ;;  %v11136_v26 = vld [vmem:[#allocation2 + $0x2a8] ss:$16 sps:$4 sm:$0xff]   ;;  %v11141_v27 = vld [vmem:[#allocation2 + $0x2c4] ss:$16 sps:$4 sm:$0xff]   ;;  %v11144_v28 = vld [vmem:[#allocation2 + $0x2cc] ss:$16 sps:$4 sm:$0xff]  }
 0x148   :  { %3432 = vmatprep.subr.bf16.mxu0 %v11053_v32  ;;  %3760 = vmatprep.subr.bf16.mxu1 %v11055_v33  ;;  %v12807_v29 = vld [vmem:[%s13080_s18 + $0x8] sm:$0xff]  ;;  %v11139_v31 = vld [vmem:[#allocation2 + $0x2c0] ss:$16 sps:$4 sm:$0xff]   ;;  %v11147_v33 = vld [vmem:[#allocation2 + $0x2e4] ss:$16 sps:$4 sm:$0xff]  }
 0x149   :  { %v9553_v30 = vcombine.high %v12807_v29, %v12807_v29  ;;  %v11142_v32 = vld [vmem:[#allocation2 + $0x2c8] ss:$16 sps:$4 sm:$0xff]   ;;  %v11168_v46 = vld [vmem:[#allocation2 + $0x34c] ss:$16 sps:$4 sm:$0xff]  }
 0x14a   :  { %v11166_v48 = vld [vmem:[#allocation2 + $0x348] ss:$16 sps:$4 sm:$0xff]  }
 0x14b   :  { %3433 = vmatpush1.bf16.msra.mxu0 %v11057_v34  ;;  %3761 = vmatpush1.bf16.msra.mxu1 %v11058_v35  ;;  %v11150_v34 = vld [vmem:[#allocation2 + $0x2ec] ss:$16 sps:$4 sm:$0xff]   ;;  %v11145_v35 = vld [vmem:[#allocation2 + $0x2e0] ss:$16 sps:$4 sm:$0xff]  }
 0x14c   :  { %3434 = vmatprep.subr.bf16.mxu0 %v11059_v36  ;;  %3762 = vmatprep.subr.bf16.mxu1 %v11061_v37  ;;  %v11148_v36 = vld [vmem:[#allocation2 + $0x2e8] ss:$16 sps:$4 sm:$0xff]   ;;  %v11153_v37 = vld [vmem:[#allocation2 + $0x304] ss:$16 sps:$4 sm:$0xff]  }
 0x14f   :  { %3435 = vmatpush1.bf16.msra.mxu0 %v11063_v38  ;;  %3763 = vmatpush1.bf16.msra.mxu1 %v11064_v39  ;;  %v11156_v38 = vld [vmem:[#allocation2 + $0x30c] ss:$16 sps:$4 sm:$0xff]   ;;  %v11151_v39 = vld [vmem:[#allocation2 + $0x300] ss:$16 sps:$4 sm:$0xff]  }
 0x150   :  { %3436 = vmatprep.subr.bf16.mxu0 %v11065_v40  ;;  %3764 = vmatprep.subr.bf16.mxu1 %v11067_v41  ;;  %v11154_v40 = vld [vmem:[#allocation2 + $0x308] ss:$16 sps:$4 sm:$0xff]   ;;  %v11159_v41 = vld [vmem:[#allocation2 + $0x324] ss:$16 sps:$4 sm:$0xff]  }
 0x153   :  { %3437 = vmatpush1.bf16.msra.mxu0 %v11069_v42  ;;  %3765 = vmatpush1.bf16.msra.mxu1 %v11070_v43  ;;  %v11162_v42 = vld [vmem:[#allocation2 + $0x32c] ss:$16 sps:$4 sm:$0xff]   ;;  %v11157_v43 = vld [vmem:[#allocation2 + $0x320] ss:$16 sps:$4 sm:$0xff]  }
 0x154   :  { %3438 = vmatprep.subr.bf16.mxu0 %v11071_v44  ;;  %3766 = vmatprep.subr.bf16.mxu1 %v11073_v45  ;;  %v11160_v44 = vld [vmem:[#allocation2 + $0x328] ss:$16 sps:$4 sm:$0xff]   ;;  %v11165_v45 = vld [vmem:[#allocation2 + $0x344] ss:$16 sps:$4 sm:$0xff]  }
 0x157   :  { %3439 = vmatpush1.bf16.msra.mxu0 %v11075_v47  ;;  %3767 = vmatpush1.bf16.msra.mxu1 %v11076_v49  ;;  %v11163_v47 = vld [vmem:[#allocation2 + $0x340] ss:$16 sps:$4 sm:$0xff]   ;;  %v11171_v49 = vld [vmem:[#allocation2 + $0x364] ss:$16 sps:$4 sm:$0xff]  }
 0x158   :  { %3440 = vmatprep.subr.bf16.mxu0 %v11077_v50  ;;  %3768 = vmatprep.subr.bf16.mxu1 %v11079_v51  ;;  %v11174_v50 = vld [vmem:[#allocation2 + $0x36c] ss:$16 sps:$4 sm:$0xff]   ;;  %v11169_v51 = vld [vmem:[#allocation2 + $0x360] ss:$16 sps:$4 sm:$0xff]  }
 0x15b   :  { %3441 = vmatpush1.bf16.msra.mxu0 %v11081_v52  ;;  %3769 = vmatpush1.bf16.msra.mxu1 %v11082_v53  ;;  %v11172_v52 = vld [vmem:[#allocation2 + $0x368] ss:$16 sps:$4 sm:$0xff]   ;;  %v11177_v53 = vld [vmem:[#allocation2 + $0x384] ss:$16 sps:$4 sm:$0xff]  }
 0x15c   :  { %3442 = vmatprep.subr.bf16.mxu0 %v11083_v54  ;;  %3770 = vmatprep.subr.bf16.mxu1 %v11085_v55  ;;  %v11180_v54 = vld [vmem:[#allocation2 + $0x38c] ss:$16 sps:$4 sm:$0xff]   ;;  %v11175_v55 = vld [vmem:[#allocation2 + $0x380] ss:$16 sps:$4 sm:$0xff]  }
 0x15f   :  { %3443 = vmatpush1.bf16.msra.mxu0 %v11087_v56  ;;  %3771 = vmatpush1.bf16.msra.mxu1 %v11088_v57  ;;  %v11178_v56 = vld [vmem:[#allocation2 + $0x388] ss:$16 sps:$4 sm:$0xff]   ;;  %v11183_v57 = vld [vmem:[#allocation2 + $0x3a4] ss:$16 sps:$4 sm:$0xff]  }
 0x160   :  { %3444 = vmatprep.subr.bf16.mxu0 %v11089_v58  ;;  %3772 = vmatprep.subr.bf16.mxu1 %v11091_v59  ;;  %v11186_v58 = vld [vmem:[#allocation2 + $0x3ac] ss:$16 sps:$4 sm:$0xff]   ;;  %v11181_v59 = vld [vmem:[#allocation2 + $0x3a0] ss:$16 sps:$4 sm:$0xff]  }
 0x163   :  { %3445 = vmatpush1.bf16.msra.mxu0 %v11093_v60  ;;  %3773 = vmatpush1.bf16.msra.mxu1 %v11094_v61  ;;  %v11184_v60 = vld [vmem:[#allocation2 + $0x3a8] ss:$16 sps:$4 sm:$0xff]   ;;  %v11189_v61 = vld [vmem:[#allocation2 + $0x3c4] ss:$16 sps:$4 sm:$0xff]  }
 0x164   :  { %3446 = vmatprep.subr.bf16.mxu0 %v11095_v62  ;;  %3774 = vmatprep.subr.bf16.mxu1 %v11097_v63  ;;  %v11192_v62 = vld [vmem:[#allocation2 + $0x3cc] ss:$16 sps:$4 sm:$0xff]   ;;  %v11187_v63 = vld [vmem:[#allocation2 + $0x3c0] ss:$16 sps:$4 sm:$0xff]  }
 0x167   :  { %3447 = vmatpush1.bf16.msra.mxu0 %v11099_v0  ;;  %3775 = vmatpush1.bf16.msra.mxu1 %v11100_v1  ;;  %v11190_v0 = vld [vmem:[#allocation2 + $0x3c8] ss:$16 sps:$4 sm:$0xff]   ;;  %v11195_v1 = vld [vmem:[#allocation2 + $0x3e4] ss:$16 sps:$4 sm:$0xff]  }
 0x168   :  { %3457 = vmatprep.subr.bf16.mxu0 %v11105_v2  ;;  %3785 = vmatprep.subr.bf16.mxu1 %v11108_v3  ;;  %v11198_v2 = vld [vmem:[#allocation2 + $0x3ec] ss:$16 sps:$4 sm:$0xff]   ;;  %v11193_v3 = vld [vmem:[#allocation2 + $0x3e0] ss:$16 sps:$4 sm:$0xff]  }
 0x16a   :  { %3449 = vmatmul.mubr.bf16.vlgmr.msra.gmra.mrb[0].mxu0 %v9550_v4  ;;  %3777 = vmatmul.mubr.bf16.vlgmr.msra.gmra.mrb[0].mxu1 %v9550_v4  ;;  %v11196_v4 = vld [vmem:[#allocation2 + $0x3e8] ss:$16 sps:$4 sm:$0xff]  }
 0x16b   :  { %3458 = vmatpush1.bf16.msra.mxu0 %v11103_v5  ;;  %3786 = vmatpush1.bf16.msra.mxu1 %v11106_v6  ;;  %v11203_v5 = vld [vmem:[#allocation2 + $0x404] ss:$16 sps:$4 sm:$0xff]   ;;  %v11206_v6 = vld [vmem:[#allocation2 + $0x40c] ss:$16 sps:$4 sm:$0xff]  }
 0x16c   :  { %3459 = vmatprep.subr.bf16.mxu0 %v11111_v7  ;;  %3787 = vmatprep.subr.bf16.mxu1 %v11114_v8  ;;  %v9552_v7 = vcombine.low %v12807_v29, %v12807_v29  ;;  %v11201_v8 = vld [vmem:[#allocation2 + $0x400] ss:$16 sps:$4 sm:$0xff]   ;;  %v11236_v29 = vld [vmem:[#allocation2 + $0x4ac] ss:$16 sps:$4 sm:$0xff]  }
 0x16d   :  { %3489 = vmatprep.mubr.bf16.mxu0 %v9553_v30  ;;  %3817 = vmatprep.mubr.bf16.mxu1 %v9553_v30  ;;  %v11231_v30 = vld [vmem:[#allocation2 + $0x4a0] ss:$16 sps:$4 sm:$0xff]  }
 0x16f   :  { %3460 = vmatpush1.bf16.msra.mxu0 %v11109_v9  ;;  %3788 = vmatpush1.bf16.msra.mxu1 %v11112_v10  ;;  %v11204_v9 = vld [vmem:[#allocation2 + $0x408] ss:$16 sps:$4 sm:$0xff]   ;;  %v11209_v10 = vld [vmem:[#allocation2 + $0x424] ss:$16 sps:$4 sm:$0xff]  }
 0x170   :  { %3461 = vmatprep.subr.bf16.mxu0 %v11117_v11  ;;  %3789 = vmatprep.subr.bf16.mxu1 %v11120_v12  ;;  %v12816_v11 = vld [vmem:[%s13080_s18 + $0x10] sm:$0xff]  ;;  %v11212_v12 = vld [vmem:[#allocation2 + $0x42c] ss:$16 sps:$4 sm:$0xff]  }
 0x173   :  { %3462 = vmatpush1.bf16.msra.mxu0 %v11115_v13  ;;  %3790 = vmatpush1.bf16.msra.mxu1 %v11118_v14  ;;  %v9555_v13 = vcombine.high %v12816_v11, %v12816_v11  ;;  %v11207_v14 = vld [vmem:[#allocation2 + $0x420] ss:$16 sps:$4 sm:$0xff]  }
 0x174   :  { %3463 = vmatprep.subr.bf16.mxu0 %v11123_v15  ;;  %3791 = vmatprep.subr.bf16.mxu1 %v11126_v16  ;;  %v11210_v15 = vld [vmem:[#allocation2 + $0x428] ss:$16 sps:$4 sm:$0xff]   ;;  %v11215_v16 = vld [vmem:[#allocation2 + $0x444] ss:$16 sps:$4 sm:$0xff]  }
 0x177   :  { %3464 = vmatpush1.bf16.msra.mxu0 %v11121_v17  ;;  %3792 = vmatpush1.bf16.msra.mxu1 %v11124_v18  ;;  %v11218_v17 = vld [vmem:[#allocation2 + $0x44c] ss:$16 sps:$4 sm:$0xff]   ;;  %v11213_v18 = vld [vmem:[#allocation2 + $0x440] ss:$16 sps:$4 sm:$0xff]  }
 0x178   :  { %3465 = vmatprep.subr.bf16.mxu0 %v11129_v19  ;;  %3793 = vmatprep.subr.bf16.mxu1 %v11132_v20  ;;  %v11216_v19 = vld [vmem:[#allocation2 + $0x448] ss:$16 sps:$4 sm:$0xff]   ;;  %v11221_v20 = vld [vmem:[#allocation2 + $0x464] ss:$16 sps:$4 sm:$0xff]  }
 0x17b   :  { %3466 = vmatpush1.bf16.msra.mxu0 %v11127_v21  ;;  %3794 = vmatpush1.bf16.msra.mxu1 %v11130_v22  ;;  %v11224_v21 = vld [vmem:[#allocation2 + $0x46c] ss:$16 sps:$4 sm:$0xff]   ;;  %v11219_v22 = vld [vmem:[#allocation2 + $0x460] ss:$16 sps:$4 sm:$0xff]  }
 0x17c   :  { %3467 = vmatprep.subr.bf16.mxu0 %v11135_v23  ;;  %3795 = vmatprep.subr.bf16.mxu1 %v11138_v24  ;;  %v11222_v23 = vld [vmem:[#allocation2 + $0x468] ss:$16 sps:$4 sm:$0xff]   ;;  %v11227_v24 = vld [vmem:[#allocation2 + $0x484] ss:$16 sps:$4 sm:$0xff]  }
 0x17f   :  { %3468 = vmatpush1.bf16.msra.mxu0 %v11133_v25  ;;  %3796 = vmatpush1.bf16.msra.mxu1 %v11136_v26  ;;  %v11230_v25 = vld [vmem:[#allocation2 + $0x48c] ss:$16 sps:$4 sm:$0xff]   ;;  %v11225_v26 = vld [vmem:[#allocation2 + $0x480] ss:$16 sps:$4 sm:$0xff]  }
 0x180   :  { %3469 = vmatprep.subr.bf16.mxu0 %v11141_v27  ;;  %3797 = vmatprep.subr.bf16.mxu1 %v11144_v28  ;;  %v11228_v27 = vld [vmem:[#allocation2 + $0x488] ss:$16 sps:$4 sm:$0xff]   ;;  %v11233_v28 = vld [vmem:[#allocation2 + $0x4a4] ss:$16 sps:$4 sm:$0xff]  }
 0x183   :  { %3470 = vmatpush1.bf16.msra.mxu0 %v11139_v31  ;;  %3798 = vmatpush1.bf16.msra.mxu1 %v11142_v32  ;;  %v11234_v31 = vld [vmem:[#allocation2 + $0x4a8] ss:$16 sps:$4 sm:$0xff]   ;;  %v11239_v32 = vld [vmem:[#allocation2 + $0x4c4] ss:$16 sps:$4 sm:$0xff]  }
 0x184   :  { %3471 = vmatprep.subr.bf16.mxu0 %v11147_v33  ;;  %3799 = vmatprep.subr.bf16.mxu1 %v11150_v34  ;;  %v11242_v33 = vld [vmem:[#allocation2 + $0x4cc] ss:$16 sps:$4 sm:$0xff]   ;;  %v11237_v34 = vld [vmem:[#allocation2 + $0x4c0] ss:$16 sps:$4 sm:$0xff]  }
 0x187   :  { %3472 = vmatpush1.bf16.msra.mxu0 %v11145_v35  ;;  %3800 = vmatpush1.bf16.msra.mxu1 %v11148_v36  ;;  %v11240_v35 = vld [vmem:[#allocation2 + $0x4c8] ss:$16 sps:$4 sm:$0xff]   ;;  %v11245_v36 = vld [vmem:[#allocation2 + $0x4e4] ss:$16 sps:$4 sm:$0xff]  }
 0x188   :  { %3473 = vmatprep.subr.bf16.mxu0 %v11153_v37  ;;  %3801 = vmatprep.subr.bf16.mxu1 %v11156_v38  ;;  %v11248_v37 = vld [vmem:[#allocation2 + $0x4ec] ss:$16 sps:$4 sm:$0xff]   ;;  %v11243_v38 = vld [vmem:[#allocation2 + $0x4e0] ss:$16 sps:$4 sm:$0xff]  }
 0x18b   :  { %3474 = vmatpush1.bf16.msra.mxu0 %v11151_v39  ;;  %3802 = vmatpush1.bf16.msra.mxu1 %v11154_v40  ;;  %v11246_v39 = vld [vmem:[#allocation2 + $0x4e8] ss:$16 sps:$4 sm:$0xff]   ;;  %v11251_v40 = vld [vmem:[#allocation2 + $0x504] ss:$16 sps:$4 sm:$0xff]  }
 0x18c   :  { %3475 = vmatprep.subr.bf16.mxu0 %v11159_v41  ;;  %3803 = vmatprep.subr.bf16.mxu1 %v11162_v42  ;;  %v11254_v41 = vld [vmem:[#allocation2 + $0x50c] ss:$16 sps:$4 sm:$0xff]   ;;  %v11249_v42 = vld [vmem:[#allocation2 + $0x500] ss:$16 sps:$4 sm:$0xff]  }
 0x18f   :  { %3476 = vmatpush1.bf16.msra.mxu0 %v11157_v43  ;;  %3804 = vmatpush1.bf16.msra.mxu1 %v11160_v44  ;;  %v11252_v43 = vld [vmem:[#allocation2 + $0x508] ss:$16 sps:$4 sm:$0xff]   ;;  %v11257_v44 = vld [vmem:[#allocation2 + $0x524] ss:$16 sps:$4 sm:$0xff]  }
 0x190   :  { %3477 = vmatprep.subr.bf16.mxu0 %v11165_v45  ;;  %3805 = vmatprep.subr.bf16.mxu1 %v11168_v46  ;;  %v11260_v45 = vld [vmem:[#allocation2 + $0x52c] ss:$16 sps:$4 sm:$0xff]   ;;  %v11255_v46 = vld [vmem:[#allocation2 + $0x520] ss:$16 sps:$4 sm:$0xff]  }
 0x193   :  { %3478 = vmatpush1.bf16.msra.mxu0 %v11163_v47  ;;  %3806 = vmatpush1.bf16.msra.mxu1 %v11166_v48  ;;  %v11258_v47 = vld [vmem:[#allocation2 + $0x528] ss:$16 sps:$4 sm:$0xff]   ;;  %v11263_v48 = vld [vmem:[#allocation2 + $0x544] ss:$16 sps:$4 sm:$0xff]  }
 0x194   :  { %3479 = vmatprep.subr.bf16.mxu0 %v11171_v49  ;;  %3807 = vmatprep.subr.bf16.mxu1 %v11174_v50  ;;  %v11266_v49 = vld [vmem:[#allocation2 + $0x54c] ss:$16 sps:$4 sm:$0xff]   ;;  %v11261_v50 = vld [vmem:[#allocation2 + $0x540] ss:$16 sps:$4 sm:$0xff]  }
 0x197   :  { %3480 = vmatpush1.bf16.msra.mxu0 %v11169_v51  ;;  %3808 = vmatpush1.bf16.msra.mxu1 %v11172_v52  ;;  %v11264_v51 = vld [vmem:[#allocation2 + $0x548] ss:$16 sps:$4 sm:$0xff]   ;;  %v11269_v52 = vld [vmem:[#allocation2 + $0x564] ss:$16 sps:$4 sm:$0xff]  }
 0x198   :  { %3481 = vmatprep.subr.bf16.mxu0 %v11177_v53  ;;  %3809 = vmatprep.subr.bf16.mxu1 %v11180_v54  ;;  %v11272_v53 = vld [vmem:[#allocation2 + $0x56c] ss:$16 sps:$4 sm:$0xff]   ;;  %v11267_v54 = vld [vmem:[#allocation2 + $0x560] ss:$16 sps:$4 sm:$0xff]  }
 0x19b   :  { %3482 = vmatpush1.bf16.msra.mxu0 %v11175_v55  ;;  %3810 = vmatpush1.bf16.msra.mxu1 %v11178_v56  ;;  %v11270_v55 = vld [vmem:[#allocation2 + $0x568] ss:$16 sps:$4 sm:$0xff]   ;;  %v11275_v56 = vld [vmem:[#allocation2 + $0x584] ss:$16 sps:$4 sm:$0xff]  }
 0x19c   :  { %3483 = vmatprep.subr.bf16.mxu0 %v11183_v57  ;;  %3811 = vmatprep.subr.bf16.mxu1 %v11186_v58  ;;  %v11278_v57 = vld [vmem:[#allocation2 + $0x58c] ss:$16 sps:$4 sm:$0xff]   ;;  %v11273_v58 = vld [vmem:[#allocation2 + $0x580] ss:$16 sps:$4 sm:$0xff]  }
 0x19f   :  { %3484 = vmatpush1.bf16.msra.mxu0 %v11181_v59  ;;  %3812 = vmatpush1.bf16.msra.mxu1 %v11184_v60  ;;  %v11276_v59 = vld [vmem:[#allocation2 + $0x588] ss:$16 sps:$4 sm:$0xff]   ;;  %v11281_v60 = vld [vmem:[#allocation2 + $0x5a4] ss:$16 sps:$4 sm:$0xff]  }
 0x1a0   :  { %3485 = vmatprep.subr.bf16.mxu0 %v11189_v61  ;;  %3813 = vmatprep.subr.bf16.mxu1 %v11192_v62  ;;  %v11284_v61 = vld [vmem:[#allocation2 + $0x5ac] ss:$16 sps:$4 sm:$0xff]   ;;  %v11279_v62 = vld [vmem:[#allocation2 + $0x5a0] ss:$16 sps:$4 sm:$0xff]  }
 0x1a3   :  { %3486 = vmatpush1.bf16.msra.mxu0 %v11187_v63  ;;  %3814 = vmatpush1.bf16.msra.mxu1 %v11190_v0  ;;  %v11282_v63 = vld [vmem:[#allocation2 + $0x5a8] ss:$16 sps:$4 sm:$0xff]   ;;  %v11287_v0 = vld [vmem:[#allocation2 + $0x5c4] ss:$16 sps:$4 sm:$0xff]  }
 0x1a4   :  { %3487 = vmatprep.subr.bf16.mxu0 %v11195_v1  ;;  %3815 = vmatprep.subr.bf16.mxu1 %v11198_v2  ;;  %v11290_v1 = vld [vmem:[#allocation2 + $0x5cc] ss:$16 sps:$4 sm:$0xff]   ;;  %v11285_v2 = vld [vmem:[#allocation2 + $0x5c0] ss:$16 sps:$4 sm:$0xff]  }
 0x1a7   :  { %3488 = vmatpush1.bf16.msra.mxu0 %v11193_v3  ;;  %3816 = vmatpush1.bf16.msra.mxu1 %v11196_v4  ;;  %v11288_v3 = vld [vmem:[#allocation2 + $0x5c8] ss:$16 sps:$4 sm:$0xff]   ;;  %v11293_v4 = vld [vmem:[#allocation2 + $0x5e4] ss:$16 sps:$4 sm:$0xff]  }
 0x1a8   :  { %3498 = vmatprep.subr.bf16.mxu0 %v11203_v5  ;;  %3826 = vmatprep.subr.bf16.mxu1 %v11206_v6  ;;  %v11296_v5 = vld [vmem:[#allocation2 + $0x5ec] ss:$16 sps:$4 sm:$0xff]   ;;  %v11291_v6 = vld [vmem:[#allocation2 + $0x5e0] ss:$16 sps:$4 sm:$0xff]  }
 0x1aa   :  { %3490 = vmatmul.mubr.bf16.vlgmr.msra.gmra.mrb[0].mxu0 %v9552_v7  ;;  %3818 = vmatmul.mubr.bf16.vlgmr.msra.gmra.mrb[0].mxu1 %v9552_v7  ;;  %v11294_v7 = vld [vmem:[#allocation2 + $0x5e8] ss:$16 sps:$4 sm:$0xff]  }
 0x1ab   :  { %3499 = vmatpush1.bf16.msra.mxu0 %v11201_v8  ;;  %3827 = vmatpush1.bf16.msra.mxu1 %v11204_v9  ;;  %v11301_v8 = vld [vmem:[#allocation2 + $0x604] ss:$16 sps:$4 sm:$0xff]   ;;  %v11304_v9 = vld [vmem:[#allocation2 + $0x60c] ss:$16 sps:$4 sm:$0xff]  }
 0x1ac   :  { %3500 = vmatprep.subr.bf16.mxu0 %v11209_v10  ;;  %3828 = vmatprep.subr.bf16.mxu1 %v11212_v12  ;;  %v11299_v10 = vld [vmem:[#allocation2 + $0x600] ss:$16 sps:$4 sm:$0xff]   ;;  %v9554_v12 = vcombine.low %v12816_v11, %v12816_v11  ;;  %v11313_v11 = vld [vmem:[#allocation2 + $0x644] ss:$16 sps:$4 sm:$0xff]  }
 0x1ad   :  { %3530 = vmatprep.mubr.bf16.mxu0 %v9555_v13  ;;  %3858 = vmatprep.mubr.bf16.mxu1 %v9555_v13  ;;  %v11302_v13 = vld [vmem:[#allocation2 + $0x608] ss:$16 sps:$4 sm:$0xff]  }
 0x1af   :  { %3501 = vmatpush1.bf16.msra.mxu0 %v11207_v14  ;;  %3829 = vmatpush1.bf16.msra.mxu1 %v11210_v15  ;;  %v12825_v14 = vld [vmem:[%s13080_s18 + $0x18] sm:$0xff]  ;;  %v11307_v15 = vld [vmem:[#allocation2 + $0x624] ss:$16 sps:$4 sm:$0xff]  }
 0x1b0   :  { %3502 = vmatprep.subr.bf16.mxu0 %v11215_v16  ;;  %3830 = vmatprep.subr.bf16.mxu1 %v11218_v17  ;;  %v11310_v16 = vld [vmem:[#allocation2 + $0x62c] ss:$16 sps:$4 sm:$0xff]   ;;  %v9557_v17 = vcombine.high %v12825_v14, %v12825_v14 }
 0x1b3   :  { %3503 = vmatpush1.bf16.msra.mxu0 %v11213_v18  ;;  %3831 = vmatpush1.bf16.msra.mxu1 %v11216_v19  ;;  %v11305_v18 = vld [vmem:[#allocation2 + $0x620] ss:$16 sps:$4 sm:$0xff]   ;;  %v11308_v19 = vld [vmem:[#allocation2 + $0x628] ss:$16 sps:$4 sm:$0xff]  }
 0x1b4   :  { %3504 = vmatprep.subr.bf16.mxu0 %v11221_v20  ;;  %3832 = vmatprep.subr.bf16.mxu1 %v11224_v21  ;;  %v11316_v20 = vld [vmem:[#allocation2 + $0x64c] ss:$16 sps:$4 sm:$0xff]   ;;  %v11311_v21 = vld [vmem:[#allocation2 + $0x640] ss:$16 sps:$4 sm:$0xff]  }
 0x1b7   :  { %3505 = vmatpush1.bf16.msra.mxu0 %v11219_v22  ;;  %3833 = vmatpush1.bf16.msra.mxu1 %v11222_v23  ;;  %v11314_v22 = vld [vmem:[#allocation2 + $0x648] ss:$16 sps:$4 sm:$0xff]   ;;  %v11319_v23 = vld [vmem:[#allocation2 + $0x664] ss:$16 sps:$4 sm:$0xff]  }
 0x1b8   :  { %3506 = vmatprep.subr.bf16.mxu0 %v11227_v24  ;;  %3834 = vmatprep.subr.bf16.mxu1 %v11230_v25  ;;  %v11322_v24 = vld [vmem:[#allocation2 + $0x66c] ss:$16 sps:$4 sm:$0xff]   ;;  %v11317_v25 = vld [vmem:[#allocation2 + $0x660] ss:$16 sps:$4 sm:$0xff]  }
 0x1bb   :  { %3507 = vmatpush1.bf16.msra.mxu0 %v11225_v26  ;;  %3835 = vmatpush1.bf16.msra.mxu1 %v11228_v27  ;;  %v11320_v26 = vld [vmem:[#allocation2 + $0x668] ss:$16 sps:$4 sm:$0xff]   ;;  %v11325_v27 = vld [vmem:[#allocation2 + $0x684] ss:$16 sps:$4 sm:$0xff]  }
 0x1bc   :  { %3508 = vmatprep.subr.bf16.mxu0 %v11233_v28  ;;  %3836 = vmatprep.subr.bf16.mxu1 %v11236_v29  ;;  %v11328_v28 = vld [vmem:[#allocation2 + $0x68c] ss:$16 sps:$4 sm:$0xff]   ;;  %v11323_v29 = vld [vmem:[#allocation2 + $0x680] ss:$16 sps:$4 sm:$0xff]  }
 0x1bf   :  { %3509 = vmatpush1.bf16.msra.mxu0 %v11231_v30  ;;  %3837 = vmatpush1.bf16.msra.mxu1 %v11234_v31  ;;  %v11326_v30 = vld [vmem:[#allocation2 + $0x688] ss:$16 sps:$4 sm:$0xff]   ;;  %v11331_v31 = vld [vmem:[#allocation2 + $0x6a4] ss:$16 sps:$4 sm:$0xff]  }
 0x1c0   :  { %3510 = vmatprep.subr.bf16.mxu0 %v11239_v32  ;;  %3838 = vmatprep.subr.bf16.mxu1 %v11242_v33  ;;  %v11334_v32 = vld [vmem:[#allocation2 + $0x6ac] ss:$16 sps:$4 sm:$0xff]   ;;  %v11329_v33 = vld [vmem:[#allocation2 + $0x6a0] ss:$16 sps:$4 sm:$0xff]  }
 0x1c3   :  { %3511 = vmatpush1.bf16.msra.mxu0 %v11237_v34  ;;  %3839 = vmatpush1.bf16.msra.mxu1 %v11240_v35  ;;  %v11332_v34 = vld [vmem:[#allocation2 + $0x6a8] ss:$16 sps:$4 sm:$0xff]   ;;  %v11337_v35 = vld [vmem:[#allocation2 + $0x6c4] ss:$16 sps:$4 sm:$0xff]  }
 0x1c4   :  { %3512 = vmatprep.subr.bf16.mxu0 %v11245_v36  ;;  %3840 = vmatprep.subr.bf16.mxu1 %v11248_v37  ;;  %v11340_v36 = vld [vmem:[#allocation2 + $0x6cc] ss:$16 sps:$4 sm:$0xff]   ;;  %v11335_v37 = vld [vmem:[#allocation2 + $0x6c0] ss:$16 sps:$4 sm:$0xff]  }
 0x1c7   :  { %3513 = vmatpush1.bf16.msra.mxu0 %v11243_v38  ;;  %3841 = vmatpush1.bf16.msra.mxu1 %v11246_v39  ;;  %v11338_v38 = vld [vmem:[#allocation2 + $0x6c8] ss:$16 sps:$4 sm:$0xff]   ;;  %v11343_v39 = vld [vmem:[#allocation2 + $0x6e4] ss:$16 sps:$4 sm:$0xff]  }
 0x1c8   :  { %3514 = vmatprep.subr.bf16.mxu0 %v11251_v40  ;;  %3842 = vmatprep.subr.bf16.mxu1 %v11254_v41  ;;  %v11346_v40 = vld [vmem:[#allocation2 + $0x6ec] ss:$16 sps:$4 sm:$0xff]   ;;  %v11341_v41 = vld [vmem:[#allocation2 + $0x6e0] ss:$16 sps:$4 sm:$0xff]  }
 0x1cb   :  { %3515 = vmatpush1.bf16.msra.mxu0 %v11249_v42  ;;  %3843 = vmatpush1.bf16.msra.mxu1 %v11252_v43  ;;  %v11344_v42 = vld [vmem:[#allocation2 + $0x6e8] ss:$16 sps:$4 sm:$0xff]   ;;  %v11349_v43 = vld [vmem:[#allocation2 + $0x704] ss:$16 sps:$4 sm:$0xff]  }
 0x1cc   :  { %3516 = vmatprep.subr.bf16.mxu0 %v11257_v44  ;;  %3844 = vmatprep.subr.bf16.mxu1 %v11260_v45  ;;  %v11352_v44 = vld [vmem:[#allocation2 + $0x70c] ss:$16 sps:$4 sm:$0xff]   ;;  %v11347_v45 = vld [vmem:[#allocation2 + $0x700] ss:$16 sps:$4 sm:$0xff]  }
 0x1cf   :  { %3517 = vmatpush1.bf16.msra.mxu0 %v11255_v46  ;;  %3845 = vmatpush1.bf16.msra.mxu1 %v11258_v47  ;;  %v11350_v46 = vld [vmem:[#allocation2 + $0x708] ss:$16 sps:$4 sm:$0xff]   ;;  %v11355_v47 = vld [vmem:[#allocation2 + $0x724] ss:$16 sps:$4 sm:$0xff]  }
 0x1d0   :  { %3518 = vmatprep.subr.bf16.mxu0 %v11263_v48  ;;  %3846 = vmatprep.subr.bf16.mxu1 %v11266_v49  ;;  %v11358_v48 = vld [vmem:[#allocation2 + $0x72c] ss:$16 sps:$4 sm:$0xff]   ;;  %v11353_v49 = vld [vmem:[#allocation2 + $0x720] ss:$16 sps:$4 sm:$0xff]  }
 0x1d3   :  { %3519 = vmatpush1.bf16.msra.mxu0 %v11261_v50  ;;  %3847 = vmatpush1.bf16.msra.mxu1 %v11264_v51  ;;  %v11356_v50 = vld [vmem:[#allocation2 + $0x728] ss:$16 sps:$4 sm:$0xff]   ;;  %v11361_v51 = vld [vmem:[#allocation2 + $0x744] ss:$16 sps:$4 sm:$0xff]  }
 0x1d4   :  { %3520 = vmatprep.subr.bf16.mxu0 %v11269_v52  ;;  %3848 = vmatprep.subr.bf16.mxu1 %v11272_v53  ;;  %v11364_v52 = vld [vmem:[#allocation2 + $0x74c] ss:$16 sps:$4 sm:$0xff]   ;;  %v11359_v53 = vld [vmem:[#allocation2 + $0x740] ss:$16 sps:$4 sm:$0xff]  }
 0x1d7   :  { %3521 = vmatpush1.bf16.msra.mxu0 %v11267_v54  ;;  %3849 = vmatpush1.bf16.msra.mxu1 %v11270_v55  ;;  %v11362_v54 = vld [vmem:[#allocation2 + $0x748] ss:$16 sps:$4 sm:$0xff]   ;;  %v11367_v55 = vld [vmem:[#allocation2 + $0x764] ss:$16 sps:$4 sm:$0xff]  }
 0x1d8   :  { %3522 = vmatprep.subr.bf16.mxu0 %v11275_v56  ;;  %3850 = vmatprep.subr.bf16.mxu1 %v11278_v57  ;;  %v11370_v56 = vld [vmem:[#allocation2 + $0x76c] ss:$16 sps:$4 sm:$0xff]   ;;  %v11365_v57 = vld [vmem:[#allocation2 + $0x760] ss:$16 sps:$4 sm:$0xff]  }
 0x1db   :  { %3523 = vmatpush1.bf16.msra.mxu0 %v11273_v58  ;;  %3851 = vmatpush1.bf16.msra.mxu1 %v11276_v59  ;;  %v11368_v58 = vld [vmem:[#allocation2 + $0x768] ss:$16 sps:$4 sm:$0xff]   ;;  %v11373_v59 = vld [vmem:[#allocation2 + $0x784] ss:$16 sps:$4 sm:$0xff]  }
 0x1dc   :  { %3524 = vmatprep.subr.bf16.mxu0 %v11281_v60  ;;  %3852 = vmatprep.subr.bf16.mxu1 %v11284_v61  ;;  %v11376_v60 = vld [vmem:[#allocation2 + $0x78c] ss:$16 sps:$4 sm:$0xff]   ;;  %v11371_v61 = vld [vmem:[#allocation2 + $0x780] ss:$16 sps:$4 sm:$0xff]  }
 0x1df   :  { %3525 = vmatpush1.bf16.msra.mxu0 %v11279_v62  ;;  %3853 = vmatpush1.bf16.msra.mxu1 %v11282_v63  ;;  %v11374_v62 = vld [vmem:[#allocation2 + $0x788] ss:$16 sps:$4 sm:$0xff]   ;;  %v11379_v63 = vld [vmem:[#allocation2 + $0x7a4] ss:$16 sps:$4 sm:$0xff]  }
 0x1e0   :  { %3526 = vmatprep.subr.bf16.mxu0 %v11287_v0  ;;  %3854 = vmatprep.subr.bf16.mxu1 %v11290_v1  ;;  %v11382_v0 = vld [vmem:[#allocation2 + $0x7ac] ss:$16 sps:$4 sm:$0xff]   ;;  %v11377_v1 = vld [vmem:[#allocation2 + $0x7a0] ss:$16 sps:$4 sm:$0xff]  }
 0x1e3   :  { %3527 = vmatpush1.bf16.msra.mxu0 %v11285_v2  ;;  %3855 = vmatpush1.bf16.msra.mxu1 %v11288_v3  ;;  %v11380_v2 = vld [vmem:[#allocation2 + $0x7a8] ss:$16 sps:$4 sm:$0xff]   ;;  %v11385_v3 = vld [vmem:[#allocation2 + $0x7c4] ss:$16 sps:$4 sm:$0xff]  }
 0x1e4   :  { %3528 = vmatprep.subr.bf16.mxu0 %v11293_v4  ;;  %3856 = vmatprep.subr.bf16.mxu1 %v11296_v5  ;;  %v11388_v4 = vld [vmem:[#allocation2 + $0x7cc] ss:$16 sps:$4 sm:$0xff]   ;;  %v11383_v5 = vld [vmem:[#allocation2 + $0x7c0] ss:$16 sps:$4 sm:$0xff]  }
 0x1e7   :  { %3529 = vmatpush1.bf16.msra.mxu0 %v11291_v6  ;;  %3857 = vmatpush1.bf16.msra.mxu1 %v11294_v7  ;;  %v11386_v6 = vld [vmem:[#allocation2 + $0x7c8] ss:$16 sps:$4 sm:$0xff]   ;;  %v11391_v7 = vld [vmem:[#allocation2 + $0x7e4] ss:$16 sps:$4 sm:$0xff]  }
 0x1e8   :  { %3539 = vmatprep.subr.bf16.mxu0 %v11301_v8  ;;  %3867 = vmatprep.subr.bf16.mxu1 %v11304_v9  ;;  %v11394_v8 = vld [vmem:[#allocation2 + $0x7ec] ss:$16 sps:$4 sm:$0xff]   ;;  %v11389_v9 = vld [vmem:[#allocation2 + $0x7e0] ss:$16 sps:$4 sm:$0xff]  }
 0x1ea   :  { %3531 = vmatmul.mubr.bf16.vlgmr.msra.gmra.mrb[0].mxu0 %v9554_v12  ;;  %3859 = vmatmul.mubr.bf16.vlgmr.msra.gmra.mrb[0].mxu1 %v9554_v12  ;;  %v11399_v12 = vld [vmem:[#allocation2 + $0x804] ss:$16 sps:$4 sm:$0xff]  }
 0x1eb   :  { %3540 = vmatpush1.bf16.msra.mxu0 %v11299_v10  ;;  %3868 = vmatpush1.bf16.msra.mxu1 %v11302_v13  ;;  %v11392_v10 = vld [vmem:[#allocation2 + $0x7e8] ss:$16 sps:$4 sm:$0xff]   ;;  %v11402_v13 = vld [vmem:[#allocation2 + $0x80c] ss:$16 sps:$4 sm:$0xff]  }
 0x1ec   :  { %3541 = vmatprep.subr.bf16.mxu0 %v11307_v15  ;;  %3869 = vmatprep.subr.bf16.mxu1 %v11310_v16  ;;  %v11397_v15 = vld [vmem:[#allocation2 + $0x800] ss:$16 sps:$4 sm:$0xff]   ;;  %v9556_v16 = vcombine.low %v12825_v14, %v12825_v14 }
 0x1ed   :  { %3571 = vmatprep.mubr.bf16.mxu0 %v9557_v17  ;;  %3899 = vmatprep.mubr.bf16.mxu1 %v9557_v17  ;;  %v12834_v17 = vld [vmem:[%s13080_s18 + $0x20] sm:$0xff] }
 0x1ee   :  { %v11403_v14 = vld [vmem:[#allocation2 + $0x820] ss:$16 sps:$4 sm:$0xff]  }
 0x1ef   :  { %3542 = vmatpush1.bf16.msra.mxu0 %v11305_v18  ;;  %3870 = vmatpush1.bf16.msra.mxu1 %v11308_v19  ;;  %v11400_v18 = vld [vmem:[#allocation2 + $0x808] ss:$16 sps:$4 sm:$0xff]   ;;  %v11405_v19 = vld [vmem:[#allocation2 + $0x824] ss:$16 sps:$4 sm:$0xff]  }
 0x1f0   :  { %3543 = vmatprep.subr.bf16.mxu0 %v11313_v11  ;;  %3871 = vmatprep.subr.bf16.mxu1 %v11316_v20  ;;  %v11408_v11 = vld [vmem:[#allocation2 + $0x82c] ss:$16 sps:$4 sm:$0xff]   ;;  %v9559_v20 = vcombine.high %v12834_v17, %v12834_v17 }
 0x1f3   :  { %3544 = vmatpush1.bf16.msra.mxu0 %v11311_v21  ;;  %3872 = vmatpush1.bf16.msra.mxu1 %v11314_v22  ;;  %v11406_v21 = vld [vmem:[#allocation2 + $0x828] ss:$16 sps:$4 sm:$0xff]   ;;  %v11411_v22 = vld [vmem:[#allocation2 + $0x844] ss:$16 sps:$4 sm:$0xff]  }
 0x1f4   :  { %3545 = vmatprep.subr.bf16.mxu0 %v11319_v23  ;;  %3873 = vmatprep.subr.bf16.mxu1 %v11322_v24  ;;  %v11414_v23 = vld [vmem:[#allocation2 + $0x84c] ss:$16 sps:$4 sm:$0xff]   ;;  %v11409_v24 = vld [vmem:[#allocation2 + $0x840] ss:$16 sps:$4 sm:$0xff]  }
 0x1f7   :  { %3546 = vmatpush1.bf16.msra.mxu0 %v11317_v25  ;;  %3874 = vmatpush1.bf16.msra.mxu1 %v11320_v26  ;;  %v11412_v25 = vld [vmem:[#allocation2 + $0x848] ss:$16 sps:$4 sm:$0xff]   ;;  %v11417_v26 = vld [vmem:[#allocation2 + $0x864] ss:$16 sps:$4 sm:$0xff]  }
 0x1f8   :  { %3547 = vmatprep.subr.bf16.mxu0 %v11325_v27  ;;  %3875 = vmatprep.subr.bf16.mxu1 %v11328_v28  ;;  %v11420_v27 = vld [vmem:[#allocation2 + $0x86c] ss:$16 sps:$4 sm:$0xff]   ;;  %v11415_v28 = vld [vmem:[#allocation2 + $0x860] ss:$16 sps:$4 sm:$0xff]  }
 0x1fb   :  { %3548 = vmatpush1.bf16.msra.mxu0 %v11323_v29  ;;  %3876 = vmatpush1.bf16.msra.mxu1 %v11326_v30  ;;  %v11418_v29 = vld [vmem:[#allocation2 + $0x868] ss:$16 sps:$4 sm:$0xff]   ;;  %v11423_v30 = vld [vmem:[#allocation2 + $0x884] ss:$16 sps:$4 sm:$0xff]  }
 0x1fc   :  { %3549 = vmatprep.subr.bf16.mxu0 %v11331_v31  ;;  %3877 = vmatprep.subr.bf16.mxu1 %v11334_v32  ;;  %v11426_v31 = vld [vmem:[#allocation2 + $0x88c] ss:$16 sps:$4 sm:$0xff]   ;;  %v11421_v32 = vld [vmem:[#allocation2 + $0x880] ss:$16 sps:$4 sm:$0xff]  }
 0x1ff   :  { %3550 = vmatpush1.bf16.msra.mxu0 %v11329_v33  ;;  %3878 = vmatpush1.bf16.msra.mxu1 %v11332_v34  ;;  %v11424_v33 = vld [vmem:[#allocation2 + $0x888] ss:$16 sps:$4 sm:$0xff]   ;;  %v11429_v34 = vld [vmem:[#allocation2 + $0x8a4] ss:$16 sps:$4 sm:$0xff]  }
 0x200   :  { %3551 = vmatprep.subr.bf16.mxu0 %v11337_v35  ;;  %3879 = vmatprep.subr.bf16.mxu1 %v11340_v36  ;;  %v11432_v35 = vld [vmem:[#allocation2 + $0x8ac] ss:$16 sps:$4 sm:$0xff]   ;;  %v11427_v36 = vld [vmem:[#allocation2 + $0x8a0] ss:$16 sps:$4 sm:$0xff]  }
 0x203   :  { %3552 = vmatpush1.bf16.msra.mxu0 %v11335_v37  ;;  %3880 = vmatpush1.bf16.msra.mxu1 %v11338_v38  ;;  %v11430_v37 = vld [vmem:[#allocation2 + $0x8a8] ss:$16 sps:$4 sm:$0xff]   ;;  %v11435_v38 = vld [vmem:[#allocation2 + $0x8c4] ss:$16 sps:$4 sm:$0xff]  }
 0x204   :  { %3553 = vmatprep.subr.bf16.mxu0 %v11343_v39  ;;  %3881 = vmatprep.subr.bf16.mxu1 %v11346_v40  ;;  %v11438_v39 = vld [vmem:[#allocation2 + $0x8cc] ss:$16 sps:$4 sm:$0xff]   ;;  %v11433_v40 = vld [vmem:[#allocation2 + $0x8c0] ss:$16 sps:$4 sm:$0xff]  }
 0x207   :  { %3554 = vmatpush1.bf16.msra.mxu0 %v11341_v41  ;;  %3882 = vmatpush1.bf16.msra.mxu1 %v11344_v42  ;;  %v11436_v41 = vld [vmem:[#allocation2 + $0x8c8] ss:$16 sps:$4 sm:$0xff]   ;;  %v11441_v42 = vld [vmem:[#allocation2 + $0x8e4] ss:$16 sps:$4 sm:$0xff]  }
 0x208   :  { %3555 = vmatprep.subr.bf16.mxu0 %v11349_v43  ;;  %3883 = vmatprep.subr.bf16.mxu1 %v11352_v44  ;;  %v11444_v43 = vld [vmem:[#allocation2 + $0x8ec] ss:$16 sps:$4 sm:$0xff]   ;;  %v11439_v44 = vld [vmem:[#allocation2 + $0x8e0] ss:$16 sps:$4 sm:$0xff]  }
 0x20b   :  { %3556 = vmatpush1.bf16.msra.mxu0 %v11347_v45  ;;  %3884 = vmatpush1.bf16.msra.mxu1 %v11350_v46  ;;  %v11442_v45 = vld [vmem:[#allocation2 + $0x8e8] ss:$16 sps:$4 sm:$0xff]   ;;  %v11447_v46 = vld [vmem:[#allocation2 + $0x904] ss:$16 sps:$4 sm:$0xff]  }
 0x20c   :  { %3557 = vmatprep.subr.bf16.mxu0 %v11355_v47  ;;  %3885 = vmatprep.subr.bf16.mxu1 %v11358_v48  ;;  %v11450_v47 = vld [vmem:[#allocation2 + $0x90c] ss:$16 sps:$4 sm:$0xff]   ;;  %v11445_v48 = vld [vmem:[#allocation2 + $0x900] ss:$16 sps:$4 sm:$0xff]  }
 0x20f   :  { %3558 = vmatpush1.bf16.msra.mxu0 %v11353_v49  ;;  %3886 = vmatpush1.bf16.msra.mxu1 %v11356_v50  ;;  %v11448_v49 = vld [vmem:[#allocation2 + $0x908] ss:$16 sps:$4 sm:$0xff]   ;;  %v11453_v50 = vld [vmem:[#allocation2 + $0x924] ss:$16 sps:$4 sm:$0xff]  }
 0x210   :  { %3559 = vmatprep.subr.bf16.mxu0 %v11361_v51  ;;  %3887 = vmatprep.subr.bf16.mxu1 %v11364_v52  ;;  %v11456_v51 = vld [vmem:[#allocation2 + $0x92c] ss:$16 sps:$4 sm:$0xff]   ;;  %v11451_v52 = vld [vmem:[#allocation2 + $0x920] ss:$16 sps:$4 sm:$0xff]  }
 0x213   :  { %3560 = vmatpush1.bf16.msra.mxu0 %v11359_v53  ;;  %3888 = vmatpush1.bf16.msra.mxu1 %v11362_v54  ;;  %v11454_v53 = vld [vmem:[#allocation2 + $0x928] ss:$16 sps:$4 sm:$0xff]   ;;  %v11459_v54 = vld [vmem:[#allocation2 + $0x944] ss:$16 sps:$4 sm:$0xff]  }
 0x214   :  { %3561 = vmatprep.subr.bf16.mxu0 %v11367_v55  ;;  %3889 = vmatprep.subr.bf16.mxu1 %v11370_v56  ;;  %v11462_v55 = vld [vmem:[#allocation2 + $0x94c] ss:$16 sps:$4 sm:$0xff]   ;;  %v11457_v56 = vld [vmem:[#allocation2 + $0x940] ss:$16 sps:$4 sm:$0xff]  }
 0x217   :  { %3562 = vmatpush1.bf16.msra.mxu0 %v11365_v57  ;;  %3890 = vmatpush1.bf16.msra.mxu1 %v11368_v58  ;;  %v11460_v57 = vld [vmem:[#allocation2 + $0x948] ss:$16 sps:$4 sm:$0xff]   ;;  %v11465_v58 = vld [vmem:[#allocation2 + $0x964] ss:$16 sps:$4 sm:$0xff]  }
 0x218   :  { %3563 = vmatprep.subr.bf16.mxu0 %v11373_v59  ;;  %3891 = vmatprep.subr.bf16.mxu1 %v11376_v60  ;;  %v11468_v59 = vld [vmem:[#allocation2 + $0x96c] ss:$16 sps:$4 sm:$0xff]   ;;  %v11463_v60 = vld [vmem:[#allocation2 + $0x960] ss:$16 sps:$4 sm:$0xff]  }
 0x21b   :  { %3564 = vmatpush1.bf16.msra.mxu0 %v11371_v61  ;;  %3892 = vmatpush1.bf16.msra.mxu1 %v11374_v62  ;;  %v11466_v61 = vld [vmem:[#allocation2 + $0x968] ss:$16 sps:$4 sm:$0xff]   ;;  %v11471_v62 = vld [vmem:[#allocation2 + $0x984] ss:$16 sps:$4 sm:$0xff]  }
 0x21c   :  { %3565 = vmatprep.subr.bf16.mxu0 %v11379_v63  ;;  %3893 = vmatprep.subr.bf16.mxu1 %v11382_v0  ;;  %v11474_v63 = vld [vmem:[#allocation2 + $0x98c] ss:$16 sps:$4 sm:$0xff]   ;;  %v11469_v0 = vld [vmem:[#allocation2 + $0x980] ss:$16 sps:$4 sm:$0xff]  }
 0x21f   :  { %3566 = vmatpush1.bf16.msra.mxu0 %v11377_v1  ;;  %3894 = vmatpush1.bf16.msra.mxu1 %v11380_v2  ;;  %v11472_v1 = vld [vmem:[#allocation2 + $0x988] ss:$16 sps:$4 sm:$0xff]   ;;  %v11477_v2 = vld [vmem:[#allocation2 + $0x9a4] ss:$16 sps:$4 sm:$0xff]  }
 0x220   :  { %3567 = vmatprep.subr.bf16.mxu0 %v11385_v3  ;;  %3895 = vmatprep.subr.bf16.mxu1 %v11388_v4  ;;  %v11480_v3 = vld [vmem:[#allocation2 + $0x9ac] ss:$16 sps:$4 sm:$0xff]   ;;  %v11475_v4 = vld [vmem:[#allocation2 + $0x9a0] ss:$16 sps:$4 sm:$0xff]  }
 0x223   :  { %3568 = vmatpush1.bf16.msra.mxu0 %v11383_v5  ;;  %3896 = vmatpush1.bf16.msra.mxu1 %v11386_v6  ;;  %v11478_v5 = vld [vmem:[#allocation2 + $0x9a8] ss:$16 sps:$4 sm:$0xff]   ;;  %v11483_v6 = vld [vmem:[#allocation2 + $0x9c4] ss:$16 sps:$4 sm:$0xff]  }
 0x224   :  { %3569 = vmatprep.subr.bf16.mxu0 %v11391_v7  ;;  %3897 = vmatprep.subr.bf16.mxu1 %v11394_v8  ;;  %v11486_v7 = vld [vmem:[#allocation2 + $0x9cc] ss:$16 sps:$4 sm:$0xff]   ;;  %v11481_v8 = vld [vmem:[#allocation2 + $0x9c0] ss:$16 sps:$4 sm:$0xff]  }
 0x227   :  { %3570 = vmatpush1.bf16.msra.mxu0 %v11389_v9  ;;  %3898 = vmatpush1.bf16.msra.mxu1 %v11392_v10  ;;  %v11484_v9 = vld [vmem:[#allocation2 + $0x9c8] ss:$16 sps:$4 sm:$0xff]   ;;  %v11489_v10 = vld [vmem:[#allocation2 + $0x9e4] ss:$16 sps:$4 sm:$0xff]  }
 0x228   :  { %3580 = vmatprep.subr.bf16.mxu0 %v11399_v12  ;;  %3908 = vmatprep.subr.bf16.mxu1 %v11402_v13  ;;  %v11492_v12 = vld [vmem:[#allocation2 + $0x9ec] ss:$16 sps:$4 sm:$0xff]   ;;  %v11487_v13 = vld [vmem:[#allocation2 + $0x9e0] ss:$16 sps:$4 sm:$0xff]  }
 0x22a   :  { %3572 = vmatmul.mubr.bf16.vlgmr.msra.gmra.mrb[0].mxu0 %v9556_v16  ;;  %3900 = vmatmul.mubr.bf16.vlgmr.msra.gmra.mrb[0].mxu1 %v9556_v16  ;;  %v11497_v16 = vld [vmem:[#allocation2 + $0xa04] ss:$16 sps:$4 sm:$0xff]  }
 0x22b   :  { %3581 = vmatpush1.bf16.msra.mxu0 %v11397_v15  ;;  %3909 = vmatpush1.bf16.msra.mxu1 %v11400_v18  ;;  %v11490_v15 = vld [vmem:[#allocation2 + $0x9e8] ss:$16 sps:$4 sm:$0xff]   ;;  %v11500_v18 = vld [vmem:[#allocation2 + $0xa0c] ss:$16 sps:$4 sm:$0xff]  }
 0x22c   :  { %3582 = vmatprep.subr.bf16.mxu0 %v11405_v19  ;;  %3910 = vmatprep.subr.bf16.mxu1 %v11408_v11  ;;  %v12841_v19 = vld [vmem:[%s13080_s18 + $0x28] sm:$0xff]  ;;  %v9558_v11 = vcombine.low %v12834_v17, %v12834_v17  ;;  %v11509_v17 = vld [vmem:[#allocation2 + $0xa44] ss:$16 sps:$4 sm:$0xff]  }
 0x22d   :  { %3612 = vmatprep.mubr.bf16.mxu0 %v9559_v20  ;;  %3940 = vmatprep.mubr.bf16.mxu1 %v9559_v20  ;;  %v11495_v20 = vld [vmem:[#allocation2 + $0xa00] ss:$16 sps:$4 sm:$0xff]  }
 0x22f   :  { %3583 = vmatpush1.bf16.msra.mxu0 %v11403_v14  ;;  %3911 = vmatpush1.bf16.msra.mxu1 %v11406_v21  ;;  %v11498_v14 = vld [vmem:[#allocation2 + $0xa08] ss:$16 sps:$4 sm:$0xff]   ;;  %v11503_v21 = vld [vmem:[#allocation2 + $0xa24] ss:$16 sps:$4 sm:$0xff]  }
 0x230   :  { %3584 = vmatprep.subr.bf16.mxu0 %v11411_v22  ;;  %3912 = vmatprep.subr.bf16.mxu1 %v11414_v23  ;;  %v11506_v22 = vld [vmem:[#allocation2 + $0xa2c] ss:$16 sps:$4 sm:$0xff]   ;;  %v9561_v23 = vcombine.high %v12841_v19, %v12841_v19 }
 0x233   :  { %3585 = vmatpush1.bf16.msra.mxu0 %v11409_v24  ;;  %3913 = vmatpush1.bf16.msra.mxu1 %v11412_v25  ;;  %v11501_v24 = vld [vmem:[#allocation2 + $0xa20] ss:$16 sps:$4 sm:$0xff]   ;;  %v11504_v25 = vld [vmem:[#allocation2 + $0xa28] ss:$16 sps:$4 sm:$0xff]  }
 0x234   :  { %3586 = vmatprep.subr.bf16.mxu0 %v11417_v26  ;;  %3914 = vmatprep.subr.bf16.mxu1 %v11420_v27  ;;  %v11512_v26 = vld [vmem:[#allocation2 + $0xa4c] ss:$16 sps:$4 sm:$0xff]   ;;  %v11507_v27 = vld [vmem:[#allocation2 + $0xa40] ss:$16 sps:$4 sm:$0xff]  }
 0x237   :  { %3587 = vmatpush1.bf16.msra.mxu0 %v11415_v28  ;;  %3915 = vmatpush1.bf16.msra.mxu1 %v11418_v29  ;;  %v11510_v28 = vld [vmem:[#allocation2 + $0xa48] ss:$16 sps:$4 sm:$0xff]   ;;  %v11515_v29 = vld [vmem:[#allocation2 + $0xa64] ss:$16 sps:$4 sm:$0xff]  }
 0x238   :  { %3588 = vmatprep.subr.bf16.mxu0 %v11423_v30  ;;  %3916 = vmatprep.subr.bf16.mxu1 %v11426_v31  ;;  %v11518_v30 = vld [vmem:[#allocation2 + $0xa6c] ss:$16 sps:$4 sm:$0xff]   ;;  %v11513_v31 = vld [vmem:[#allocation2 + $0xa60] ss:$16 sps:$4 sm:$0xff]  }
 0x23b   :  { %3589 = vmatpush1.bf16.msra.mxu0 %v11421_v32  ;;  %3917 = vmatpush1.bf16.msra.mxu1 %v11424_v33  ;;  %v11516_v32 = vld [vmem:[#allocation2 + $0xa68] ss:$16 sps:$4 sm:$0xff]   ;;  %v11521_v33 = vld [vmem:[#allocation2 + $0xa84] ss:$16 sps:$4 sm:$0xff]  }
 0x23c   :  { %3590 = vmatprep.subr.bf16.mxu0 %v11429_v34  ;;  %3918 = vmatprep.subr.bf16.mxu1 %v11432_v35  ;;  %v11524_v34 = vld [vmem:[#allocation2 + $0xa8c] ss:$16 sps:$4 sm:$0xff]   ;;  %v11519_v35 = vld [vmem:[#allocation2 + $0xa80] ss:$16 sps:$4 sm:$0xff]  }
 0x23f   :  { %3591 = vmatpush1.bf16.msra.mxu0 %v11427_v36  ;;  %3919 = vmatpush1.bf16.msra.mxu1 %v11430_v37  ;;  %v11522_v36 = vld [vmem:[#allocation2 + $0xa88] ss:$16 sps:$4 sm:$0xff]   ;;  %v11527_v37 = vld [vmem:[#allocation2 + $0xaa4] ss:$16 sps:$4 sm:$0xff]  }
 0x240   :  { %3592 = vmatprep.subr.bf16.mxu0 %v11435_v38  ;;  %3920 = vmatprep.subr.bf16.mxu1 %v11438_v39  ;;  %v11530_v38 = vld [vmem:[#allocation2 + $0xaac] ss:$16 sps:$4 sm:$0xff]   ;;  %v11525_v39 = vld [vmem:[#allocation2 + $0xaa0] ss:$16 sps:$4 sm:$0xff]  }
 0x243   :  { %3593 = vmatpush1.bf16.msra.mxu0 %v11433_v40  ;;  %3921 = vmatpush1.bf16.msra.mxu1 %v11436_v41  ;;  %v11528_v40 = vld [vmem:[#allocation2 + $0xaa8] ss:$16 sps:$4 sm:$0xff]   ;;  %v11533_v41 = vld [vmem:[#allocation2 + $0xac4] ss:$16 sps:$4 sm:$0xff]  }
 0x244   :  { %3594 = vmatprep.subr.bf16.mxu0 %v11441_v42  ;;  %3922 = vmatprep.subr.bf16.mxu1 %v11444_v43  ;;  %v11536_v42 = vld [vmem:[#allocation2 + $0xacc] ss:$16 sps:$4 sm:$0xff]   ;;  %v11531_v43 = vld [vmem:[#allocation2 + $0xac0] ss:$16 sps:$4 sm:$0xff]  }
 0x247   :  { %3595 = vmatpush1.bf16.msra.mxu0 %v11439_v44  ;;  %3923 = vmatpush1.bf16.msra.mxu1 %v11442_v45  ;;  %v11534_v44 = vld [vmem:[#allocation2 + $0xac8] ss:$16 sps:$4 sm:$0xff]   ;;  %v11539_v45 = vld [vmem:[#allocation2 + $0xae4] ss:$16 sps:$4 sm:$0xff]  }
 0x248   :  { %3596 = vmatprep.subr.bf16.mxu0 %v11447_v46  ;;  %3924 = vmatprep.subr.bf16.mxu1 %v11450_v47  ;;  %v11542_v46 = vld [vmem:[#allocation2 + $0xaec] ss:$16 sps:$4 sm:$0xff]   ;;  %v11537_v47 = vld [vmem:[#allocation2 + $0xae0] ss:$16 sps:$4 sm:$0xff]  }
 0x24b   :  { %3597 = vmatpush1.bf16.msra.mxu0 %v11445_v48  ;;  %3925 = vmatpush1.bf16.msra.mxu1 %v11448_v49  ;;  %v11540_v48 = vld [vmem:[#allocation2 + $0xae8] ss:$16 sps:$4 sm:$0xff]   ;;  %v11545_v49 = vld [vmem:[#allocation2 + $0xb04] ss:$16 sps:$4 sm:$0xff]  }
 0x24c   :  { %3598 = vmatprep.subr.bf16.mxu0 %v11453_v50  ;;  %3926 = vmatprep.subr.bf16.mxu1 %v11456_v51  ;;  %v11548_v50 = vld [vmem:[#allocation2 + $0xb0c] ss:$16 sps:$4 sm:$0xff]   ;;  %v11543_v51 = vld [vmem:[#allocation2 + $0xb00] ss:$16 sps:$4 sm:$0xff]  }
 0x24f   :  { %3599 = vmatpush1.bf16.msra.mxu0 %v11451_v52  ;;  %3927 = vmatpush1.bf16.msra.mxu1 %v11454_v53  ;;  %v11546_v52 = vld [vmem:[#allocation2 + $0xb08] ss:$16 sps:$4 sm:$0xff]   ;;  %v11551_v53 = vld [vmem:[#allocation2 + $0xb24] ss:$16 sps:$4 sm:$0xff]  }
 0x250   :  { %3600 = vmatprep.subr.bf16.mxu0 %v11459_v54  ;;  %3928 = vmatprep.subr.bf16.mxu1 %v11462_v55  ;;  %v11554_v54 = vld [vmem:[#allocation2 + $0xb2c] ss:$16 sps:$4 sm:$0xff]   ;;  %v11549_v55 = vld [vmem:[#allocation2 + $0xb20] ss:$16 sps:$4 sm:$0xff]  }
 0x253   :  { %3601 = vmatpush1.bf16.msra.mxu0 %v11457_v56  ;;  %3929 = vmatpush1.bf16.msra.mxu1 %v11460_v57  ;;  %v11552_v56 = vld [vmem:[#allocation2 + $0xb28] ss:$16 sps:$4 sm:$0xff]   ;;  %v11557_v57 = vld [vmem:[#allocation2 + $0xb44] ss:$16 sps:$4 sm:$0xff]  }
 0x254   :  { %3602 = vmatprep.subr.bf16.mxu0 %v11465_v58  ;;  %3930 = vmatprep.subr.bf16.mxu1 %v11468_v59  ;;  %v11560_v58 = vld [vmem:[#allocation2 + $0xb4c] ss:$16 sps:$4 sm:$0xff]   ;;  %v11555_v59 = vld [vmem:[#allocation2 + $0xb40] ss:$16 sps:$4 sm:$0xff]  }
 0x257   :  { %3603 = vmatpush1.bf16.msra.mxu0 %v11463_v60  ;;  %3931 = vmatpush1.bf16.msra.mxu1 %v11466_v61  ;;  %v11558_v60 = vld [vmem:[#allocation2 + $0xb48] ss:$16 sps:$4 sm:$0xff]   ;;  %v11563_v61 = vld [vmem:[#allocation2 + $0xb64] ss:$16 sps:$4 sm:$0xff]  }
 0x258   :  { %3604 = vmatprep.subr.bf16.mxu0 %v11471_v62  ;;  %3932 = vmatprep.subr.bf16.mxu1 %v11474_v63  ;;  %v11566_v62 = vld [vmem:[#allocation2 + $0xb6c] ss:$16 sps:$4 sm:$0xff]   ;;  %v11561_v63 = vld [vmem:[#allocation2 + $0xb60] ss:$16 sps:$4 sm:$0xff]  }
 0x25b   :  { %3605 = vmatpush1.bf16.msra.mxu0 %v11469_v0  ;;  %3933 = vmatpush1.bf16.msra.mxu1 %v11472_v1  ;;  %v11564_v0 = vld [vmem:[#allocation2 + $0xb68] ss:$16 sps:$4 sm:$0xff]   ;;  %v11569_v1 = vld [vmem:[#allocation2 + $0xb84] ss:$16 sps:$4 sm:$0xff]  }
 0x25c   :  { %3606 = vmatprep.subr.bf16.mxu0 %v11477_v2  ;;  %3934 = vmatprep.subr.bf16.mxu1 %v11480_v3  ;;  %v11572_v2 = vld [vmem:[#allocation2 + $0xb8c] ss:$16 sps:$4 sm:$0xff]   ;;  %v11567_v3 = vld [vmem:[#allocation2 + $0xb80] ss:$16 sps:$4 sm:$0xff]  }
 0x25f   :  { %3607 = vmatpush1.bf16.msra.mxu0 %v11475_v4  ;;  %3935 = vmatpush1.bf16.msra.mxu1 %v11478_v5  ;;  %v11570_v4 = vld [vmem:[#allocation2 + $0xb88] ss:$16 sps:$4 sm:$0xff]   ;;  %v11575_v5 = vld [vmem:[#allocation2 + $0xba4] ss:$16 sps:$4 sm:$0xff]  }
 0x260   :  { %3608 = vmatprep.subr.bf16.mxu0 %v11483_v6  ;;  %3936 = vmatprep.subr.bf16.mxu1 %v11486_v7  ;;  %v11578_v6 = vld [vmem:[#allocation2 + $0xbac] ss:$16 sps:$4 sm:$0xff]   ;;  %v11573_v7 = vld [vmem:[#allocation2 + $0xba0] ss:$16 sps:$4 sm:$0xff]  }
 0x263   :  { %3609 = vmatpush1.bf16.msra.mxu0 %v11481_v8  ;;  %3937 = vmatpush1.bf16.msra.mxu1 %v11484_v9  ;;  %v11576_v8 = vld [vmem:[#allocation2 + $0xba8] ss:$16 sps:$4 sm:$0xff]   ;;  %v11581_v9 = vld [vmem:[#allocation2 + $0xbc4] ss:$16 sps:$4 sm:$0xff]  }
 0x264   :  { %3610 = vmatprep.subr.bf16.mxu0 %v11489_v10  ;;  %3938 = vmatprep.subr.bf16.mxu1 %v11492_v12  ;;  %v11584_v10 = vld [vmem:[#allocation2 + $0xbcc] ss:$16 sps:$4 sm:$0xff]   ;;  %v11579_v12 = vld [vmem:[#allocation2 + $0xbc0] ss:$16 sps:$4 sm:$0xff]  }
 0x267   :  { %3611 = vmatpush1.bf16.msra.mxu0 %v11487_v13  ;;  %3939 = vmatpush1.bf16.msra.mxu1 %v11490_v15  ;;  %v11582_v13 = vld [vmem:[#allocation2 + $0xbc8] ss:$16 sps:$4 sm:$0xff]   ;;  %v11587_v15 = vld [vmem:[#allocation2 + $0xbe4] ss:$16 sps:$4 sm:$0xff]  }
 0x268   :  { %3621 = vmatprep.subr.bf16.mxu0 %v11497_v16  ;;  %3949 = vmatprep.subr.bf16.mxu1 %v11500_v18  ;;  %v11590_v16 = vld [vmem:[#allocation2 + $0xbec] ss:$16 sps:$4 sm:$0xff]   ;;  %v11585_v18 = vld [vmem:[#allocation2 + $0xbe0] ss:$16 sps:$4 sm:$0xff]  }
 0x26a   :  { %3613 = vmatmul.mubr.bf16.vlgmr.msra.gmra.mrb[0].mxu0 %v9558_v11  ;;  %3941 = vmatmul.mubr.bf16.vlgmr.msra.gmra.mrb[0].mxu1 %v9558_v11  ;;  %v11588_v11 = vld [vmem:[#allocation2 + $0xbe8] ss:$16 sps:$4 sm:$0xff]  }
 0x26b   :  { %3622 = vmatpush1.bf16.msra.mxu0 %v11495_v20  ;;  %3950 = vmatpush1.bf16.msra.mxu1 %v11498_v14  ;;  %v11595_v20 = vld [vmem:[#allocation2 + $0xc04] ss:$16 sps:$4 sm:$0xff]   ;;  %v11598_v14 = vld [vmem:[#allocation2 + $0xc0c] ss:$16 sps:$4 sm:$0xff]  }
 0x26c   :  { %3623 = vmatprep.subr.bf16.mxu0 %v11503_v21  ;;  %3951 = vmatprep.subr.bf16.mxu1 %v11506_v22  ;;  %v11593_v21 = vld [vmem:[#allocation2 + $0xc00] ss:$16 sps:$4 sm:$0xff]   ;;  %v11596_v22 = vld [vmem:[#allocation2 + $0xc08] ss:$16 sps:$4 sm:$0xff]  }
 0x26d   :  { %3653 = vmatprep.mubr.bf16.mxu0 %v9561_v23  ;;  %3981 = vmatprep.mubr.bf16.mxu1 %v9561_v23  ;;  %v9560_v23 = vcombine.low %v12841_v19, %v12841_v19  ;;  %v11607_v19 = vld [vmem:[#allocation2 + $0xc44] ss:$16 sps:$4 sm:$0xff]  }
 0x26f   :  { %3624 = vmatpush1.bf16.msra.mxu0 %v11501_v24  ;;  %3952 = vmatpush1.bf16.msra.mxu1 %v11504_v25  ;;  %v11601_v24 = vld [vmem:[#allocation2 + $0xc24] ss:$16 sps:$4 sm:$0xff]   ;;  %v11604_v25 = vld [vmem:[#allocation2 + $0xc2c] ss:$16 sps:$4 sm:$0xff]  }
 0x270   :  { %3625 = vmatprep.subr.bf16.mxu0 %v11509_v17  ;;  %3953 = vmatprep.subr.bf16.mxu1 %v11512_v26  ;;  %v12852_v17 = vld [vmem:[%s13080_s18 + $0x30] sm:$0xff] }
 0x271   :  { %v9563_v26 = vcombine.high %v12852_v17, %v12852_v17 }
 0x273   :  { %3626 = vmatpush1.bf16.msra.mxu0 %v11507_v27  ;;  %3954 = vmatpush1.bf16.msra.mxu1 %v11510_v28  ;;  %v11599_v27 = vld [vmem:[#allocation2 + $0xc20] ss:$16 sps:$4 sm:$0xff]   ;;  %v11602_v28 = vld [vmem:[#allocation2 + $0xc28] ss:$16 sps:$4 sm:$0xff]  }
 0x274   :  { %3627 = vmatprep.subr.bf16.mxu0 %v11515_v29  ;;  %3955 = vmatprep.subr.bf16.mxu1 %v11518_v30  ;;  %v11610_v29 = vld [vmem:[#allocation2 + $0xc4c] ss:$16 sps:$4 sm:$0xff]   ;;  %v11605_v30 = vld [vmem:[#allocation2 + $0xc40] ss:$16 sps:$4 sm:$0xff]  }
 0x277   :  { %3628 = vmatpush1.bf16.msra.mxu0 %v11513_v31  ;;  %3956 = vmatpush1.bf16.msra.mxu1 %v11516_v32  ;;  %v11608_v31 = vld [vmem:[#allocation2 + $0xc48] ss:$16 sps:$4 sm:$0xff]   ;;  %v11613_v32 = vld [vmem:[#allocation2 + $0xc64] ss:$16 sps:$4 sm:$0xff]  }
 0x278   :  { %3629 = vmatprep.subr.bf16.mxu0 %v11521_v33  ;;  %3957 = vmatprep.subr.bf16.mxu1 %v11524_v34  ;;  %v11616_v33 = vld [vmem:[#allocation2 + $0xc6c] ss:$16 sps:$4 sm:$0xff]   ;;  %v11611_v34 = vld [vmem:[#allocation2 + $0xc60] ss:$16 sps:$4 sm:$0xff]  }
 0x27b   :  { %3630 = vmatpush1.bf16.msra.mxu0 %v11519_v35  ;;  %3958 = vmatpush1.bf16.msra.mxu1 %v11522_v36  ;;  %v11614_v35 = vld [vmem:[#allocation2 + $0xc68] ss:$16 sps:$4 sm:$0xff]   ;;  %v11619_v36 = vld [vmem:[#allocation2 + $0xc84] ss:$16 sps:$4 sm:$0xff]  }
 0x27c   :  { %3631 = vmatprep.subr.bf16.mxu0 %v11527_v37  ;;  %3959 = vmatprep.subr.bf16.mxu1 %v11530_v38  ;;  %v11622_v37 = vld [vmem:[#allocation2 + $0xc8c] ss:$16 sps:$4 sm:$0xff]   ;;  %v11617_v38 = vld [vmem:[#allocation2 + $0xc80] ss:$16 sps:$4 sm:$0xff]  }
 0x27f   :  { %3632 = vmatpush1.bf16.msra.mxu0 %v11525_v39  ;;  %3960 = vmatpush1.bf16.msra.mxu1 %v11528_v40  ;;  %v11620_v39 = vld [vmem:[#allocation2 + $0xc88] ss:$16 sps:$4 sm:$0xff]   ;;  %v11625_v40 = vld [vmem:[#allocation2 + $0xca4] ss:$16 sps:$4 sm:$0xff]  }
 0x280   :  { %3633 = vmatprep.subr.bf16.mxu0 %v11533_v41  ;;  %3961 = vmatprep.subr.bf16.mxu1 %v11536_v42  ;;  %v11628_v41 = vld [vmem:[#allocation2 + $0xcac] ss:$16 sps:$4 sm:$0xff]   ;;  %v11623_v42 = vld [vmem:[#allocation2 + $0xca0] ss:$16 sps:$4 sm:$0xff]  }
 0x283   :  { %3634 = vmatpush1.bf16.msra.mxu0 %v11531_v43  ;;  %3962 = vmatpush1.bf16.msra.mxu1 %v11534_v44  ;;  %v11626_v43 = vld [vmem:[#allocation2 + $0xca8] ss:$16 sps:$4 sm:$0xff]   ;;  %v11631_v44 = vld [vmem:[#allocation2 + $0xcc4] ss:$16 sps:$4 sm:$0xff]  }
 0x284   :  { %3635 = vmatprep.subr.bf16.mxu0 %v11539_v45  ;;  %3963 = vmatprep.subr.bf16.mxu1 %v11542_v46  ;;  %v11634_v45 = vld [vmem:[#allocation2 + $0xccc] ss:$16 sps:$4 sm:$0xff]   ;;  %v11629_v46 = vld [vmem:[#allocation2 + $0xcc0] ss:$16 sps:$4 sm:$0xff]  }
 0x287   :  { %3636 = vmatpush1.bf16.msra.mxu0 %v11537_v47  ;;  %3964 = vmatpush1.bf16.msra.mxu1 %v11540_v48  ;;  %v11632_v47 = vld [vmem:[#allocation2 + $0xcc8] ss:$16 sps:$4 sm:$0xff]   ;;  %v11637_v48 = vld [vmem:[#allocation2 + $0xce4] ss:$16 sps:$4 sm:$0xff]  }
 0x288   :  { %3637 = vmatprep.subr.bf16.mxu0 %v11545_v49  ;;  %3965 = vmatprep.subr.bf16.mxu1 %v11548_v50  ;;  %v11640_v49 = vld [vmem:[#allocation2 + $0xcec] ss:$16 sps:$4 sm:$0xff]   ;;  %v11635_v50 = vld [vmem:[#allocation2 + $0xce0] ss:$16 sps:$4 sm:$0xff]  }
 0x28b   :  { %3638 = vmatpush1.bf16.msra.mxu0 %v11543_v51  ;;  %3966 = vmatpush1.bf16.msra.mxu1 %v11546_v52  ;;  %v11638_v51 = vld [vmem:[#allocation2 + $0xce8] ss:$16 sps:$4 sm:$0xff]   ;;  %v11643_v52 = vld [vmem:[#allocation2 + $0xd04] ss:$16 sps:$4 sm:$0xff]  }
 0x28c   :  { %3639 = vmatprep.subr.bf16.mxu0 %v11551_v53  ;;  %3967 = vmatprep.subr.bf16.mxu1 %v11554_v54  ;;  %v11646_v53 = vld [vmem:[#allocation2 + $0xd0c] ss:$16 sps:$4 sm:$0xff]   ;;  %v11641_v54 = vld [vmem:[#allocation2 + $0xd00] ss:$16 sps:$4 sm:$0xff]  }
 0x28f   :  { %3640 = vmatpush1.bf16.msra.mxu0 %v11549_v55  ;;  %3968 = vmatpush1.bf16.msra.mxu1 %v11552_v56  ;;  %v11644_v55 = vld [vmem:[#allocation2 + $0xd08] ss:$16 sps:$4 sm:$0xff]   ;;  %v11649_v56 = vld [vmem:[#allocation2 + $0xd24] ss:$16 sps:$4 sm:$0xff]  }
 0x290   :  { %3641 = vmatprep.subr.bf16.mxu0 %v11557_v57  ;;  %3969 = vmatprep.subr.bf16.mxu1 %v11560_v58  ;;  %v11652_v57 = vld [vmem:[#allocation2 + $0xd2c] ss:$16 sps:$4 sm:$0xff]   ;;  %v11647_v58 = vld [vmem:[#allocation2 + $0xd20] ss:$16 sps:$4 sm:$0xff]  }
 0x293   :  { %3642 = vmatpush1.bf16.msra.mxu0 %v11555_v59  ;;  %3970 = vmatpush1.bf16.msra.mxu1 %v11558_v60  ;;  %v11650_v59 = vld [vmem:[#allocation2 + $0xd28] ss:$16 sps:$4 sm:$0xff]   ;;  %v11655_v60 = vld [vmem:[#allocation2 + $0xd44] ss:$16 sps:$4 sm:$0xff]  }
 0x294   :  { %3643 = vmatprep.subr.bf16.mxu0 %v11563_v61  ;;  %3971 = vmatprep.subr.bf16.mxu1 %v11566_v62  ;;  %v11658_v61 = vld [vmem:[#allocation2 + $0xd4c] ss:$16 sps:$4 sm:$0xff]   ;;  %v11653_v62 = vld [vmem:[#allocation2 + $0xd40] ss:$16 sps:$4 sm:$0xff]  }
 0x297   :  { %3644 = vmatpush1.bf16.msra.mxu0 %v11561_v63  ;;  %3972 = vmatpush1.bf16.msra.mxu1 %v11564_v0  ;;  %v11656_v63 = vld [vmem:[#allocation2 + $0xd48] ss:$16 sps:$4 sm:$0xff]   ;;  %v11661_v0 = vld [vmem:[#allocation2 + $0xd64] ss:$16 sps:$4 sm:$0xff]  }
 0x298   :  { %3645 = vmatprep.subr.bf16.mxu0 %v11569_v1  ;;  %3973 = vmatprep.subr.bf16.mxu1 %v11572_v2  ;;  %v11664_v1 = vld [vmem:[#allocation2 + $0xd6c] ss:$16 sps:$4 sm:$0xff]   ;;  %v11659_v2 = vld [vmem:[#allocation2 + $0xd60] ss:$16 sps:$4 sm:$0xff]  }
 0x29b   :  { %3646 = vmatpush1.bf16.msra.mxu0 %v11567_v3  ;;  %3974 = vmatpush1.bf16.msra.mxu1 %v11570_v4  ;;  %v11662_v3 = vld [vmem:[#allocation2 + $0xd68] ss:$16 sps:$4 sm:$0xff]   ;;  %v11667_v4 = vld [vmem:[#allocation2 + $0xd84] ss:$16 sps:$4 sm:$0xff]  }
 0x29c   :  { %3647 = vmatprep.subr.bf16.mxu0 %v11575_v5  ;;  %3975 = vmatprep.subr.bf16.mxu1 %v11578_v6  ;;  %v11670_v5 = vld [vmem:[#allocation2 + $0xd8c] ss:$16 sps:$4 sm:$0xff]   ;;  %v11665_v6 = vld [vmem:[#allocation2 + $0xd80] ss:$16 sps:$4 sm:$0xff]  }
 0x29f   :  { %3648 = vmatpush1.bf16.msra.mxu0 %v11573_v7  ;;  %3976 = vmatpush1.bf16.msra.mxu1 %v11576_v8  ;;  %v11668_v7 = vld [vmem:[#allocation2 + $0xd88] ss:$16 sps:$4 sm:$0xff]   ;;  %v11673_v8 = vld [vmem:[#allocation2 + $0xda4] ss:$16 sps:$4 sm:$0xff]  }
 0x2a0   :  { %3649 = vmatprep.subr.bf16.mxu0 %v11581_v9  ;;  %3977 = vmatprep.subr.bf16.mxu1 %v11584_v10  ;;  %v11676_v9 = vld [vmem:[#allocation2 + $0xdac] ss:$16 sps:$4 sm:$0xff]   ;;  %v11671_v10 = vld [vmem:[#allocation2 + $0xda0] ss:$16 sps:$4 sm:$0xff]  }
 0x2a3   :  { %3650 = vmatpush1.bf16.msra.mxu0 %v11579_v12  ;;  %3978 = vmatpush1.bf16.msra.mxu1 %v11582_v13  ;;  %v11674_v12 = vld [vmem:[#allocation2 + $0xda8] ss:$16 sps:$4 sm:$0xff]   ;;  %v11679_v13 = vld [vmem:[#allocation2 + $0xdc4] ss:$16 sps:$4 sm:$0xff]  }
 0x2a4   :  { %3651 = vmatprep.subr.bf16.mxu0 %v11587_v15  ;;  %3979 = vmatprep.subr.bf16.mxu1 %v11590_v16  ;;  %v11682_v15 = vld [vmem:[#allocation2 + $0xdcc] ss:$16 sps:$4 sm:$0xff]   ;;  %v11677_v16 = vld [vmem:[#allocation2 + $0xdc0] ss:$16 sps:$4 sm:$0xff]  }
 0x2a7   :  { %3652 = vmatpush1.bf16.msra.mxu0 %v11585_v18  ;;  %3980 = vmatpush1.bf16.msra.mxu1 %v11588_v11  ;;  %v11680_v18 = vld [vmem:[#allocation2 + $0xdc8] ss:$16 sps:$4 sm:$0xff]   ;;  %v11685_v11 = vld [vmem:[#allocation2 + $0xde4] ss:$16 sps:$4 sm:$0xff]  }
 0x2a8   :  { %3662 = vmatprep.subr.bf16.mxu0 %v11595_v20  ;;  %3990 = vmatprep.subr.bf16.mxu1 %v11598_v14  ;;  %v11688_v20 = vld [vmem:[#allocation2 + $0xdec] ss:$16 sps:$4 sm:$0xff]   ;;  %v11683_v14 = vld [vmem:[#allocation2 + $0xde0] ss:$16 sps:$4 sm:$0xff]  }
 0x2aa   :  { %3654 = vmatmul.mubr.bf16.vlgmr.msra.gmra.mrb[0].mxu0 %v9560_v23  ;;  %3982 = vmatmul.mubr.bf16.vlgmr.msra.gmra.mrb[0].mxu1 %v9560_v23  ;;  %v11696_v23 = vld [vmem:[#allocation2 + $0xe0c] ss:$16 sps:$4 sm:$0xff]  }
 0x2ab   :  { %3663 = vmatpush1.bf16.msra.mxu0 %v11593_v21  ;;  %3991 = vmatpush1.bf16.msra.mxu1 %v11596_v22  ;;  %v11686_v21 = vld [vmem:[#allocation2 + $0xde8] ss:$16 sps:$4 sm:$0xff]   ;;  %v11693_v22 = vld [vmem:[#allocation2 + $0xe04] ss:$16 sps:$4 sm:$0xff]  }
 0x2ac   :  { %3664 = vmatprep.subr.bf16.mxu0 %v11601_v24  ;;  %3992 = vmatprep.subr.bf16.mxu1 %v11604_v25  ;;  %v9562_v24 = vcombine.low %v12852_v17, %v12852_v17  ;;  %v12861_v25 = vld [vmem:[%s13080_s18 + $0x38] sm:$0xff]  ;;  %v11697_v17 = vld [vmem:[#allocation2 + $0xe20] ss:$16 sps:$4 sm:$0xff]  }
 0x2ad   :  { %3694 = vmatprep.mubr.bf16.mxu0 %v9563_v26  ;;  %4022 = vmatprep.mubr.bf16.mxu1 %v9563_v26  ;;  %v11691_v26 = vld [vmem:[#allocation2 + $0xe00] ss:$16 sps:$4 sm:$0xff]  }
 0x2af   :  { %3665 = vmatpush1.bf16.msra.mxu0 %v11599_v27  ;;  %3993 = vmatpush1.bf16.msra.mxu1 %v11602_v28  ;;  %v11694_v27 = vld [vmem:[#allocation2 + $0xe08] ss:$16 sps:$4 sm:$0xff]   ;;  %v11699_v28 = vld [vmem:[#allocation2 + $0xe24] ss:$16 sps:$4 sm:$0xff]  }
 0x2b0   :  { %3666 = vmatprep.subr.bf16.mxu0 %v11607_v19  ;;  %3994 = vmatprep.subr.bf16.mxu1 %v11610_v29  ;;  %v11702_v19 = vld [vmem:[#allocation2 + $0xe2c] ss:$16 sps:$4 sm:$0xff]   ;;  %v9565_v29 = vcombine.high %v12861_v25, %v12861_v25 }
 0x2b3   :  { %3667 = vmatpush1.bf16.msra.mxu0 %v11605_v30  ;;  %3995 = vmatpush1.bf16.msra.mxu1 %v11608_v31  ;;  %v11700_v30 = vld [vmem:[#allocation2 + $0xe28] ss:$16 sps:$4 sm:$0xff]   ;;  %v11705_v31 = vld [vmem:[#allocation2 + $0xe44] ss:$16 sps:$4 sm:$0xff]  }
 0x2b4   :  { %3668 = vmatprep.subr.bf16.mxu0 %v11613_v32  ;;  %3996 = vmatprep.subr.bf16.mxu1 %v11616_v33  ;;  %v11708_v32 = vld [vmem:[#allocation2 + $0xe4c] ss:$16 sps:$4 sm:$0xff]   ;;  %v11703_v33 = vld [vmem:[#allocation2 + $0xe40] ss:$16 sps:$4 sm:$0xff]  }
 0x2b7   :  { %3669 = vmatpush1.bf16.msra.mxu0 %v11611_v34  ;;  %3997 = vmatpush1.bf16.msra.mxu1 %v11614_v35  ;;  %v11706_v34 = vld [vmem:[#allocation2 + $0xe48] ss:$16 sps:$4 sm:$0xff]   ;;  %v11711_v35 = vld [vmem:[#allocation2 + $0xe64] ss:$16 sps:$4 sm:$0xff]  }
 0x2b8   :  { %3670 = vmatprep.subr.bf16.mxu0 %v11619_v36  ;;  %3998 = vmatprep.subr.bf16.mxu1 %v11622_v37  ;;  %v11714_v36 = vld [vmem:[#allocation2 + $0xe6c] ss:$16 sps:$4 sm:$0xff]   ;;  %v11709_v37 = vld [vmem:[#allocation2 + $0xe60] ss:$16 sps:$4 sm:$0xff]  }
 0x2bb   :  { %3671 = vmatpush1.bf16.msra.mxu0 %v11617_v38  ;;  %3999 = vmatpush1.bf16.msra.mxu1 %v11620_v39  ;;  %v11712_v38 = vld [vmem:[#allocation2 + $0xe68] ss:$16 sps:$4 sm:$0xff]   ;;  %v11717_v39 = vld [vmem:[#allocation2 + $0xe84] ss:$16 sps:$4 sm:$0xff]  }
 0x2bc   :  { %3672 = vmatprep.subr.bf16.mxu0 %v11625_v40  ;;  %4000 = vmatprep.subr.bf16.mxu1 %v11628_v41  ;;  %v11720_v40 = vld [vmem:[#allocation2 + $0xe8c] ss:$16 sps:$4 sm:$0xff]   ;;  %v11715_v41 = vld [vmem:[#allocation2 + $0xe80] ss:$16 sps:$4 sm:$0xff]  }
 0x2bf   :  { %3673 = vmatpush1.bf16.msra.mxu0 %v11623_v42  ;;  %4001 = vmatpush1.bf16.msra.mxu1 %v11626_v43  ;;  %v11718_v42 = vld [vmem:[#allocation2 + $0xe88] ss:$16 sps:$4 sm:$0xff]   ;;  %v11723_v43 = vld [vmem:[#allocation2 + $0xea4] ss:$16 sps:$4 sm:$0xff]  }
 0x2c0   :  { %3674 = vmatprep.subr.bf16.mxu0 %v11631_v44  ;;  %4002 = vmatprep.subr.bf16.mxu1 %v11634_v45  ;;  %v11726_v44 = vld [vmem:[#allocation2 + $0xeac] ss:$16 sps:$4 sm:$0xff]   ;;  %v11721_v45 = vld [vmem:[#allocation2 + $0xea0] ss:$16 sps:$4 sm:$0xff]  }
 0x2c3   :  { %3675 = vmatpush1.bf16.msra.mxu0 %v11629_v46  ;;  %4003 = vmatpush1.bf16.msra.mxu1 %v11632_v47  ;;  %v11724_v46 = vld [vmem:[#allocation2 + $0xea8] ss:$16 sps:$4 sm:$0xff]   ;;  %v11729_v47 = vld [vmem:[#allocation2 + $0xec4] ss:$16 sps:$4 sm:$0xff]  }
 0x2c4   :  { %3676 = vmatprep.subr.bf16.mxu0 %v11637_v48  ;;  %4004 = vmatprep.subr.bf16.mxu1 %v11640_v49  ;;  %v11732_v48 = vld [vmem:[#allocation2 + $0xecc] ss:$16 sps:$4 sm:$0xff]   ;;  %v11727_v49 = vld [vmem:[#allocation2 + $0xec0] ss:$16 sps:$4 sm:$0xff]  }
 0x2c7   :  { %3677 = vmatpush1.bf16.msra.mxu0 %v11635_v50  ;;  %4005 = vmatpush1.bf16.msra.mxu1 %v11638_v51  ;;  %v11730_v50 = vld [vmem:[#allocation2 + $0xec8] ss:$16 sps:$4 sm:$0xff]   ;;  %v11735_v51 = vld [vmem:[#allocation2 + $0xee4] ss:$16 sps:$4 sm:$0xff]  }
 0x2c8   :  { %3678 = vmatprep.subr.bf16.mxu0 %v11643_v52  ;;  %4006 = vmatprep.subr.bf16.mxu1 %v11646_v53  ;;  %v11738_v52 = vld [vmem:[#allocation2 + $0xeec] ss:$16 sps:$4 sm:$0xff]   ;;  %v11733_v53 = vld [vmem:[#allocation2 + $0xee0] ss:$16 sps:$4 sm:$0xff]  }
 0x2cb   :  { %3679 = vmatpush1.bf16.msra.mxu0 %v11641_v54  ;;  %4007 = vmatpush1.bf16.msra.mxu1 %v11644_v55  ;;  %v11736_v54 = vld [vmem:[#allocation2 + $0xee8] ss:$16 sps:$4 sm:$0xff]   ;;  %v11741_v55 = vld [vmem:[#allocation2 + $0xf04] ss:$16 sps:$4 sm:$0xff]  }
 0x2cc   :  { %3680 = vmatprep.subr.bf16.mxu0 %v11649_v56  ;;  %4008 = vmatprep.subr.bf16.mxu1 %v11652_v57  ;;  %v11744_v56 = vld [vmem:[#allocation2 + $0xf0c] ss:$16 sps:$4 sm:$0xff]   ;;  %v11739_v57 = vld [vmem:[#allocation2 + $0xf00] ss:$16 sps:$4 sm:$0xff]  }
 0x2cf   :  { %3681 = vmatpush1.bf16.msra.mxu0 %v11647_v58  ;;  %4009 = vmatpush1.bf16.msra.mxu1 %v11650_v59  ;;  %v11742_v58 = vld [vmem:[#allocation2 + $0xf08] ss:$16 sps:$4 sm:$0xff]   ;;  %v11747_v59 = vld [vmem:[#allocation2 + $0xf24] ss:$16 sps:$4 sm:$0xff]  }
 0x2d0   :  { %3682 = vmatprep.subr.bf16.mxu0 %v11655_v60  ;;  %4010 = vmatprep.subr.bf16.mxu1 %v11658_v61  ;;  %v11750_v60 = vld [vmem:[#allocation2 + $0xf2c] ss:$16 sps:$4 sm:$0xff]   ;;  %v11745_v61 = vld [vmem:[#allocation2 + $0xf20] ss:$16 sps:$4 sm:$0xff]  }
 0x2d3   :  { %3683 = vmatpush1.bf16.msra.mxu0 %v11653_v62  ;;  %4011 = vmatpush1.bf16.msra.mxu1 %v11656_v63  ;;  %v11748_v62 = vld [vmem:[#allocation2 + $0xf28] ss:$16 sps:$4 sm:$0xff]   ;;  %v11753_v63 = vld [vmem:[#allocation2 + $0xf44] ss:$16 sps:$4 sm:$0xff]  }
 0x2d4   :  { %3684 = vmatprep.subr.bf16.mxu0 %v11661_v0  ;;  %4012 = vmatprep.subr.bf16.mxu1 %v11664_v1  ;;  %v11756_v0 = vld [vmem:[#allocation2 + $0xf4c] ss:$16 sps:$4 sm:$0xff]   ;;  %v11751_v1 = vld [vmem:[#allocation2 + $0xf40] ss:$16 sps:$4 sm:$0xff]  }
 0x2d7   :  { %3685 = vmatpush1.bf16.msra.mxu0 %v11659_v2  ;;  %4013 = vmatpush1.bf16.msra.mxu1 %v11662_v3  ;;  %v11754_v2 = vld [vmem:[#allocation2 + $0xf48] ss:$16 sps:$4 sm:$0xff]   ;;  %v11759_v3 = vld [vmem:[#allocation2 + $0xf64] ss:$16 sps:$4 sm:$0xff]  }
 0x2d8   :  { %3686 = vmatprep.subr.bf16.mxu0 %v11667_v4  ;;  %4014 = vmatprep.subr.bf16.mxu1 %v11670_v5  ;;  %v11762_v4 = vld [vmem:[#allocation2 + $0xf6c] ss:$16 sps:$4 sm:$0xff]   ;;  %v11757_v5 = vld [vmem:[#allocation2 + $0xf60] ss:$16 sps:$4 sm:$0xff]  }
 0x2db   :  { %3687 = vmatpush1.bf16.msra.mxu0 %v11665_v6  ;;  %4015 = vmatpush1.bf16.msra.mxu1 %v11668_v7  ;;  %v11760_v6 = vld [vmem:[#allocation2 + $0xf68] ss:$16 sps:$4 sm:$0xff]   ;;  %v11765_v7 = vld [vmem:[#allocation2 + $0xf84] ss:$16 sps:$4 sm:$0xff]  }
 0x2dc   :  { %3688 = vmatprep.subr.bf16.mxu0 %v11673_v8  ;;  %4016 = vmatprep.subr.bf16.mxu1 %v11676_v9  ;;  %v11768_v8 = vld [vmem:[#allocation2 + $0xf8c] ss:$16 sps:$4 sm:$0xff]   ;;  %v11763_v9 = vld [vmem:[#allocation2 + $0xf80] ss:$16 sps:$4 sm:$0xff]  }
 0x2df   :  { %3689 = vmatpush1.bf16.msra.mxu0 %v11671_v10  ;;  %4017 = vmatpush1.bf16.msra.mxu1 %v11674_v12  ;;  %v11766_v10 = vld [vmem:[#allocation2 + $0xf88] ss:$16 sps:$4 sm:$0xff]   ;;  %v11771_v12 = vld [vmem:[#allocation2 + $0xfa4] ss:$16 sps:$4 sm:$0xff]  }
 0x2e0   :  { %3690 = vmatprep.subr.bf16.mxu0 %v11679_v13  ;;  %4018 = vmatprep.subr.bf16.mxu1 %v11682_v15  ;;  %v11774_v13 = vld [vmem:[#allocation2 + $0xfac] ss:$16 sps:$4 sm:$0xff]   ;;  %v11769_v15 = vld [vmem:[#allocation2 + $0xfa0] ss:$16 sps:$4 sm:$0xff]  }
 0x2e3   :  { %3691 = vmatpush1.bf16.msra.mxu0 %v11677_v16  ;;  %4019 = vmatpush1.bf16.msra.mxu1 %v11680_v18  ;;  %v11772_v16 = vld [vmem:[#allocation2 + $0xfa8] ss:$16 sps:$4 sm:$0xff]   ;;  %v11777_v18 = vld [vmem:[#allocation2 + $0xfc4] ss:$16 sps:$4 sm:$0xff]  }
 0x2e4   :  { %3692 = vmatprep.subr.bf16.mxu0 %v11685_v11  ;;  %4020 = vmatprep.subr.bf16.mxu1 %v11688_v20  ;;  %v11780_v11 = vld [vmem:[#allocation2 + $0xfcc] ss:$16 sps:$4 sm:$0xff]   ;;  %v11775_v20 = vld [vmem:[#allocation2 + $0xfc0] ss:$16 sps:$4 sm:$0xff]  }
 0x2e7   :  { %3693 = vmatpush1.bf16.msra.mxu0 %v11683_v14  ;;  %4021 = vmatpush1.bf16.msra.mxu1 %v11686_v21  ;;  %v11778_v14 = vld [vmem:[#allocation2 + $0xfc8] ss:$16 sps:$4 sm:$0xff]   ;;  %v11783_v21 = vld [vmem:[#allocation2 + $0xfe4] ss:$16 sps:$4 sm:$0xff]  }
 0x2e8   :  { %3703 = vmatprep.subr.bf16.mxu0 %v11693_v22  ;;  %4031 = vmatprep.subr.bf16.mxu1 %v11696_v23  ;;  %v11786_v22 = vld [vmem:[#allocation2 + $0xfec] ss:$16 sps:$4 sm:$0xff]   ;;  %v11781_v23 = vld [vmem:[#allocation2 + $0xfe0] ss:$16 sps:$4 sm:$0xff]  }
 0x2ea   :  { %3695 = vmatmul.mubr.bf16.vlgmr.msra.gmra.mrb[0].mxu0 %v9562_v24  ;;  %4023 = vmatmul.mubr.bf16.vlgmr.msra.gmra.mrb[0].mxu1 %v9562_v24  ;;  %v11784_v24 = vld [vmem:[#allocation2 + $0xfe8] ss:$16 sps:$4 sm:$0xff]  }
 0x2eb   :  { %3704 = vmatpush1.bf16.msra.mxu0 %v11691_v26  ;;  %4032 = vmatpush1.bf16.msra.mxu1 %v11694_v27  ;;  %v11791_v26 = vld [vmem:[#allocation4 + $0x4] ss:$8 sps:$4 sm:$0xff]   ;;  %v9564_v27 = vcombine.low %v12861_v25, %v12861_v25  ;;  %v11801_v25 = vld [vmem:[#allocation4 + $0x40] ss:$8 sps:$4 sm:$0xff]  }
 0x2ec   :  { %3705 = vmatprep.subr.bf16.mxu0 %v11699_v28  ;;  %4033 = vmatprep.subr.bf16.mxu1 %v11702_v19  ;;  %v11789_v28 = vld [vmem:[#allocation4] ss:$8 sps:$4 sm:$0xff]   ;;  %v11794_v19 = vld [vmem:[#allocation4 + $0x14] ss:$8 sps:$4 sm:$0xff]  }
 0x2ed   :  { %3735 = vmatprep.mubr.bf16.mxu0 %v9565_v29  ;;  %4063 = vmatprep.mubr.bf16.mxu1 %v9565_v29  ;;  %v11792_v29 = vld [vmem:[#allocation4 + $0x10] ss:$8 sps:$4 sm:$0xff]  }
 0x2ef   :  { %3706 = vmatpush1.bf16.msra.mxu0 %v11697_v17  ;;  %4034 = vmatpush1.bf16.msra.mxu1 %v11700_v30  ;;  %v11797_v17 = vld [vmem:[#allocation4 + $0x24] ss:$8 sps:$4 sm:$0xff]   ;;  %v11795_v30 = vld [vmem:[#allocation4 + $0x20] ss:$8 sps:$4 sm:$0xff]  }
 0x2f0   :  { %3707 = vmatprep.subr.bf16.mxu0 %v11705_v31  ;;  %4035 = vmatprep.subr.bf16.mxu1 %v11708_v32  ;;  %v11800_v31 = vld [vmem:[#allocation4 + $0x34] ss:$8 sps:$4 sm:$0xff]   ;;  %v11798_v32 = vld [vmem:[#allocation4 + $0x30] ss:$8 sps:$4 sm:$0xff]  }
 0x2f3   :  { %3708 = vmatpush1.bf16.msra.mxu0 %v11703_v33  ;;  %4036 = vmatpush1.bf16.msra.mxu1 %v11706_v34  ;;  %v11803_v33 = vld [vmem:[#allocation4 + $0x44] ss:$8 sps:$4 sm:$0xff]   ;;  %v11806_v34 = vld [vmem:[#allocation4 + $0x54] ss:$8 sps:$4 sm:$0xff]  }
 0x2f4   :  { %3709 = vmatprep.subr.bf16.mxu0 %v11711_v35  ;;  %4037 = vmatprep.subr.bf16.mxu1 %v11714_v36  ;;  %v11804_v35 = vld [vmem:[#allocation4 + $0x50] ss:$8 sps:$4 sm:$0xff]   ;;  %v11809_v36 = vld [vmem:[#allocation4 + $0x64] ss:$8 sps:$4 sm:$0xff]  }
 0x2f7   :  { %3710 = vmatpush1.bf16.msra.mxu0 %v11709_v37  ;;  %4038 = vmatpush1.bf16.msra.mxu1 %v11712_v38  ;;  %v11807_v37 = vld [vmem:[#allocation4 + $0x60] ss:$8 sps:$4 sm:$0xff]   ;;  %v11812_v38 = vld [vmem:[#allocation4 + $0x74] ss:$8 sps:$4 sm:$0xff]  }
 0x2f8   :  { %3711 = vmatprep.subr.bf16.mxu0 %v11717_v39  ;;  %4039 = vmatprep.subr.bf16.mxu1 %v11720_v40  ;;  %v11810_v39 = vld [vmem:[#allocation4 + $0x70] ss:$8 sps:$4 sm:$0xff]   ;;  %v11815_v40 = vld [vmem:[#allocation4 + $0x84] ss:$8 sps:$4 sm:$0xff]  }
 0x2fb   :  { %3712 = vmatpush1.bf16.msra.mxu0 %v11715_v41  ;;  %4040 = vmatpush1.bf16.msra.mxu1 %v11718_v42  ;;  %v11813_v41 = vld [vmem:[#allocation4 + $0x80] ss:$8 sps:$4 sm:$0xff]   ;;  %v11818_v42 = vld [vmem:[#allocation4 + $0x94] ss:$8 sps:$4 sm:$0xff]  }
 0x2fc   :  { %3713 = vmatprep.subr.bf16.mxu0 %v11723_v43  ;;  %4041 = vmatprep.subr.bf16.mxu1 %v11726_v44  ;;  %v11816_v43 = vld [vmem:[#allocation4 + $0x90] ss:$8 sps:$4 sm:$0xff]   ;;  %v11821_v44 = vld [vmem:[#allocation4 + $0xa4] ss:$8 sps:$4 sm:$0xff]  }
 0x2ff   :  { %3714 = vmatpush1.bf16.msra.mxu0 %v11721_v45  ;;  %4042 = vmatpush1.bf16.msra.mxu1 %v11724_v46  ;;  %v11819_v45 = vld [vmem:[#allocation4 + $0xa0] ss:$8 sps:$4 sm:$0xff]   ;;  %v11824_v46 = vld [vmem:[#allocation4 + $0xb4] ss:$8 sps:$4 sm:$0xff]  }
 0x300   :  { %3715 = vmatprep.subr.bf16.mxu0 %v11729_v47  ;;  %4043 = vmatprep.subr.bf16.mxu1 %v11732_v48  ;;  %v11822_v47 = vld [vmem:[#allocation4 + $0xb0] ss:$8 sps:$4 sm:$0xff]   ;;  %v11827_v48 = vld [vmem:[#allocation4 + $0xc4] ss:$8 sps:$4 sm:$0xff]  }
 0x303   :  { %3716 = vmatpush1.bf16.msra.mxu0 %v11727_v49  ;;  %4044 = vmatpush1.bf16.msra.mxu1 %v11730_v50  ;;  %v11825_v49 = vld [vmem:[#allocation4 + $0xc0] ss:$8 sps:$4 sm:$0xff]   ;;  %v11830_v50 = vld [vmem:[#allocation4 + $0xd4] ss:$8 sps:$4 sm:$0xff]  }
 0x304   :  { %3717 = vmatprep.subr.bf16.mxu0 %v11735_v51  ;;  %4045 = vmatprep.subr.bf16.mxu1 %v11738_v52  ;;  %v11828_v51 = vld [vmem:[#allocation4 + $0xd0] ss:$8 sps:$4 sm:$0xff]   ;;  %v11833_v52 = vld [vmem:[#allocation4 + $0xe4] ss:$8 sps:$4 sm:$0xff]  }
 0x307   :  { %3718 = vmatpush1.bf16.msra.mxu0 %v11733_v53  ;;  %4046 = vmatpush1.bf16.msra.mxu1 %v11736_v54  ;;  %v11831_v53 = vld [vmem:[#allocation4 + $0xe0] ss:$8 sps:$4 sm:$0xff]   ;;  %v11836_v54 = vld [vmem:[#allocation4 + $0xf4] ss:$8 sps:$4 sm:$0xff]  }
 0x308   :  { %3719 = vmatprep.subr.bf16.mxu0 %v11741_v55  ;;  %4047 = vmatprep.subr.bf16.mxu1 %v11744_v56  ;;  %v11834_v55 = vld [vmem:[#allocation4 + $0xf0] ss:$8 sps:$4 sm:$0xff]   ;;  %v11839_v56 = vld [vmem:[#allocation4 + $0x104] ss:$8 sps:$4 sm:$0xff]  }
 0x30b   :  { %3720 = vmatpush1.bf16.msra.mxu0 %v11739_v57  ;;  %4048 = vmatpush1.bf16.msra.mxu1 %v11742_v58  ;;  %v11885_v57 = vld [vmem:[#allocation6 + $0x40] sm:$0xff]  }
 0x30c   :  { %3721 = vmatprep.subr.bf16.mxu0 %v11747_v59  ;;  %4049 = vmatprep.subr.bf16.mxu1 %v11750_v60  ;;  %v11886_v58 = vld [vmem:[#allocation6] sm:$0xff]   ;;  %v11887_v59 = vld [vmem:[#allocation6 + $0x48] sm:$0xff]  }
 0x30d   :  { %v11888_v60 = vld [vmem:[#allocation6 + $0x8] sm:$0xff]  }
 0x30f   :  { %3722 = vmatpush1.bf16.msra.mxu0 %v11745_v61  ;;  %4050 = vmatpush1.bf16.msra.mxu1 %v11748_v62  ;;  %v11889_v61 = vld [vmem:[#allocation6 + $0x50] sm:$0xff]  }
 0x310   :  { %3723 = vmatprep.subr.bf16.mxu0 %v11753_v63  ;;  %4051 = vmatprep.subr.bf16.mxu1 %v11756_v0  ;;  %v11890_v62 = vld [vmem:[#allocation6 + $0x10] sm:$0xff]   ;;  %v11891_v63 = vld [vmem:[#allocation6 + $0x58] sm:$0xff]  }
 0x311   :  { %v11892_v0 = vld [vmem:[#allocation6 + $0x18] sm:$0xff]  }
 0x313   :  { %3724 = vmatpush1.bf16.msra.mxu0 %v11751_v1  ;;  %4052 = vmatpush1.bf16.msra.mxu1 %v11754_v2  ;;  %v11893_v1 = vld [vmem:[#allocation6 + $0x60] sm:$0xff]  }
 0x314   :  { %3725 = vmatprep.subr.bf16.mxu0 %v11759_v3  ;;  %4053 = vmatprep.subr.bf16.mxu1 %v11762_v4  ;;  %v11894_v2 = vld [vmem:[#allocation6 + $0x20] sm:$0xff]   ;;  %v11895_v3 = vld [vmem:[#allocation6 + $0x68] sm:$0xff]  }
 0x315   :  { %v11896_v4 = vld [vmem:[#allocation6 + $0x28] sm:$0xff]  }
 0x317   :  { %3726 = vmatpush1.bf16.msra.mxu0 %v11757_v5  ;;  %4054 = vmatpush1.bf16.msra.mxu1 %v11760_v6  ;;  %v780_v5 = vlaneseq }
 0x318   :  { %3727 = vmatprep.subr.bf16.mxu0 %v11765_v7  ;;  %4055 = vmatprep.subr.bf16.mxu1 %v11768_v8  ;;  %v12872_v8 = vld [vmem:[#allocation15] sm:$0xf] }
 0x319   :  { %v12867_v6 = vshrl.u32 %v780_v5, 7  ;;  %v11899_v5 = vld [vmem:[#allocation6 + $0x78] sm:$0xff]  }
 0x31b   :  { %3728 = vmatpush1.bf16.msra.mxu0 %v11763_v9  ;;  %4056 = vmatpush1.bf16.msra.mxu1 %v11766_v10  ;;  %v12870_v7 = vsub.s32 0, %v12867_v6  ;;  %v12875_v9 = vsub.s32 1, %v12867_v6  ;;  %v12878_v10 = vsub.s32 3, %v12867_v6 }
 0x31c   :  { %3729 = vmatprep.subr.bf16.mxu0 %v11771_v12  ;;  %4057 = vmatprep.subr.bf16.mxu1 %v11774_v13 }
 0x31d   :  { %v783_v12 = vrot.slane %v12872_v8, %v12870_v7  ;;  %v787_v13 = vrot.slane %v12872_v8, %v12875_v9 }
 0x31f   :  { %3730 = vmatpush1.bf16.msra.mxu0 %v11769_v15  ;;  %4058 = vmatpush1.bf16.msra.mxu1 %v11772_v16  ;;  %v795_v15 = vrot.slane %v12872_v8, %v12878_v10 }
 0x320   :  { %3731 = vmatprep.subr.bf16.mxu0 %v11777_v18  ;;  %4059 = vmatprep.subr.bf16.mxu1 %v11780_v11 }
 0x323   :  { %3732 = vmatpush1.bf16.msra.mxu0 %v11775_v20  ;;  %4060 = vmatpush1.bf16.msra.mxu1 %v11778_v14 }
 0x324   :  { %3733 = vmatprep.subr.bf16.mxu0 %v11783_v21  ;;  %4061 = vmatprep.subr.bf16.mxu1 %v11786_v22 }
 0x327   :  { %3734 = vmatpush1.bf16.msra.mxu0 %v11781_v23  ;;  %4062 = vmatpush1.bf16.msra.mxu1 %v11784_v24 }
 0x328   :  { %4476 = vmatprep.subr.bf16.mxu0 %v11791_v26  ;;  %10785 = vmatprep.subr.bf16.mxu1 %v11885_v57  ;;  %v11878_v57 = vld [vmem:[#allocation4 + $0x1d4] ss:$8 sps:$4 sm:$0xff]  }
 0x32a   :  { %3736 = vmatmul.mubr.bf16.vlgmr.msra.gmra.mrb[0].mxu0 %v9564_v27  ;;  %4064 = vmatmul.mubr.bf16.vlgmr.msra.gmra.mrb[0].mxu1 %v9564_v27 }
 0x32b   :  { %4477 = vmatpush1.bf16.msra.mxu0 %v11789_v28  ;;  %10786 = vmatpush3.bf16.msra.mxu1 %v11886_v58  ;;  %v11876_v58 = vld [vmem:[#allocation4 + $0x1d0] ss:$8 sps:$4 sm:$0xff]  }
 0x32c   :  { %4478 = vmatprep.subr.bf16.mxu0 %v11794_v19  ;;  %10787 = vmatprep.subr.bf16.mxu1 %v11887_v59 }
 0x32f   :  { %4479 = vmatpush1.bf16.msra.mxu0 %v11792_v29  ;;  %10788 = vmatpush3.bf16.msra.mxu1 %v11888_v60  ;;  %v11881_v60 = vld [vmem:[#allocation4 + $0x1e4] ss:$8 sps:$4 sm:$0xff]  }
 0x330   :  { %4480 = vmatprep.subr.bf16.mxu0 %v11797_v17  ;;  %10789 = vmatprep.subr.bf16.mxu1 %v11889_v61  ;;  %v11879_v61 = vld [vmem:[#allocation4 + $0x1e0] ss:$8 sps:$4 sm:$0xff]  }
 0x333   :  { %4481 = vmatpush1.bf16.msra.mxu0 %v11795_v30  ;;  %10790 = vmatpush3.bf16.msra.mxu1 %v11890_v62  ;;  %v11837_v30 = vld [vmem:[#allocation4 + $0x100] ss:$8 sps:$4 sm:$0xff]  }
 0x334   :  { %4482 = vmatprep.subr.bf16.mxu0 %v11800_v31  ;;  %10791 = vmatprep.subr.bf16.mxu1 %v11891_v63  ;;  %v11884_v63 = vld [vmem:[#allocation4 + $0x1f4] ss:$8 sps:$4 sm:$0xff]  }
 0x337   :  { %4483 = vmatpush1.bf16.msra.mxu0 %v11798_v32  ;;  %10792 = vmatpush3.bf16.msra.mxu1 %v11892_v0  ;;  %v11842_v32 = vld [vmem:[#allocation4 + $0x114] ss:$8 sps:$4 sm:$0xff]   ;;  %v11882_v0 = vld [vmem:[#allocation4 + $0x1f0] ss:$8 sps:$4 sm:$0xff]  }
 0x338   :  { %4484 = vmatprep.subr.bf16.mxu0 %v11803_v33  ;;  %10793 = vmatprep.subr.bf16.mxu1 %v11893_v1 }
 0x33b   :  { %4485 = vmatpush1.bf16.msra.mxu0 %v11801_v25  ;;  %10794 = vmatpush3.bf16.msra.mxu1 %v11894_v2  ;;  %v11840_v25 = vld [vmem:[#allocation4 + $0x110] ss:$8 sps:$4 sm:$0xff]  }
 0x33c   :  { %4486 = vmatprep.subr.bf16.mxu0 %v11806_v34  ;;  %10795 = vmatprep.subr.bf16.mxu1 %v11895_v3  ;;  %v11845_v34 = vld [vmem:[#allocation4 + $0x124] ss:$8 sps:$4 sm:$0xff]   ;;  %v11897_v3 = vld [vmem:[#allocation6 + $0x70] sm:$0xff]  }
 0x33f   :  { %4487 = vmatpush1.bf16.msra.mxu0 %v11804_v35  ;;  %10796 = vmatpush3.bf16.msra.mxu1 %v11896_v4  ;;  %v11843_v35 = vld [vmem:[#allocation4 + $0x120] ss:$8 sps:$4 sm:$0xff]   ;;  %v11898_v4 = vld [vmem:[#allocation6 + $0x30] sm:$0xff]  }
 0x340   :  { %4488 = vmatprep.subr.bf16.mxu0 %v11809_v36  ;;  %v11848_v36 = vld [vmem:[#allocation4 + $0x134] ss:$8 sps:$4 sm:$0xff]   ;;  %10797 = vmatprep.subr.bf16.mxu1 %v11897_v3  ;;  %v11929_v3 = vld [vmem:[#allocation10 + $0x40] ss:$8 sps:$4 sm:$0xff]  }
 0x343   :  { %4489 = vmatpush1.bf16.msra.mxu0 %v11807_v37  ;;  %v11846_v37 = vld [vmem:[#allocation4 + $0x130] ss:$8 sps:$4 sm:$0xff]   ;;  %10798 = vmatpush3.bf16.msra.mxu1 %v11898_v4  ;;  %v11934_v4 = vld [vmem:[#allocation10 + $0x54] ss:$8 sps:$4 sm:$0xff]  }
 0x344   :  { %4490 = vmatprep.subr.bf16.mxu0 %v11812_v38  ;;  %v11851_v38 = vld [vmem:[#allocation4 + $0x144] ss:$8 sps:$4 sm:$0xff]   ;;  %10799 = vmatprep.subr.bf16.mxu1 %v11899_v5  ;;  %v11932_v5 = vld [vmem:[#allocation10 + $0x50] ss:$8 sps:$4 sm:$0xff]  }
 0x347   :  { %4491 = vmatpush1.bf16.msra.mxu0 %v11810_v39  ;;  %v11849_v39 = vld [vmem:[#allocation4 + $0x140] ss:$8 sps:$4 sm:$0xff]  }
 0x348   :  { %4492 = vmatprep.subr.bf16.mxu0 %v11815_v40  ;;  %v11854_v40 = vld [vmem:[#allocation4 + $0x154] ss:$8 sps:$4 sm:$0xff]  }
 0x34b   :  { %4493 = vmatpush1.bf16.msra.mxu0 %v11813_v41  ;;  %v11852_v41 = vld [vmem:[#allocation4 + $0x150] ss:$8 sps:$4 sm:$0xff]  }
 0x34c   :  { %4494 = vmatprep.subr.bf16.mxu0 %v11818_v42  ;;  %v11857_v42 = vld [vmem:[#allocation4 + $0x164] ss:$8 sps:$4 sm:$0xff]  }
 0x34f   :  { %4495 = vmatpush1.bf16.msra.mxu0 %v11816_v43  ;;  %v11855_v43 = vld [vmem:[#allocation4 + $0x160] ss:$8 sps:$4 sm:$0xff]  }
 0x350   :  { %4496 = vmatprep.subr.bf16.mxu0 %v11821_v44  ;;  %v11860_v44 = vld [vmem:[#allocation4 + $0x174] ss:$8 sps:$4 sm:$0xff]  }
 0x353   :  { %4497 = vmatpush1.bf16.msra.mxu0 %v11819_v45  ;;  %v11858_v45 = vld [vmem:[#allocation4 + $0x170] ss:$8 sps:$4 sm:$0xff]  }
 0x354   :  { %4498 = vmatprep.subr.bf16.mxu0 %v11824_v46  ;;  %v11863_v46 = vld [vmem:[#allocation4 + $0x184] ss:$8 sps:$4 sm:$0xff]  }
 0x357   :  { %4499 = vmatpush1.bf16.msra.mxu0 %v11822_v47  ;;  %v11861_v47 = vld [vmem:[#allocation4 + $0x180] ss:$8 sps:$4 sm:$0xff]  }
 0x358   :  { %4500 = vmatprep.subr.bf16.mxu0 %v11827_v48  ;;  %v11866_v48 = vld [vmem:[#allocation4 + $0x194] ss:$8 sps:$4 sm:$0xff]  }
 0x35b   :  { %4501 = vmatpush1.bf16.msra.mxu0 %v11825_v49  ;;  %v11864_v49 = vld [vmem:[#allocation4 + $0x190] ss:$8 sps:$4 sm:$0xff]  }
 0x35c   :  { %4502 = vmatprep.subr.bf16.mxu0 %v11830_v50  ;;  %v11869_v50 = vld [vmem:[#allocation4 + $0x1a4] ss:$8 sps:$4 sm:$0xff]  }
 0x35f   :  { %4503 = vmatpush1.bf16.msra.mxu0 %v11828_v51  ;;  %v11867_v51 = vld [vmem:[#allocation4 + $0x1a0] ss:$8 sps:$4 sm:$0xff]  }
 0x360   :  { %4504 = vmatprep.subr.bf16.mxu0 %v11833_v52  ;;  %v11872_v52 = vld [vmem:[#allocation4 + $0x1b4] ss:$8 sps:$4 sm:$0xff]  }
 0x363   :  { %4505 = vmatpush1.bf16.msra.mxu0 %v11831_v53  ;;  %v11870_v53 = vld [vmem:[#allocation4 + $0x1b0] ss:$8 sps:$4 sm:$0xff]  }
 0x364   :  { %4506 = vmatprep.subr.bf16.mxu0 %v11836_v54  ;;  %v11875_v54 = vld [vmem:[#allocation4 + $0x1c4] ss:$8 sps:$4 sm:$0xff]  }
 0x367   :  { %4507 = vmatpush1.bf16.msra.mxu0 %v11834_v55  ;;  %v11873_v55 = vld [vmem:[#allocation4 + $0x1c0] ss:$8 sps:$4 sm:$0xff]  }
 0x368   :  { %4517 = vmatprep.subr.bf16.mxu0 %v11839_v56  ;;  %v12889_v56 = vsub.s32 2, %v12867_v6 }
 0x36a   :  { %v791_v59 = vrot.slane %v12872_v8, %v12889_v56  ;;  %v11900_v8 = vld [vmem:[#allocation6 + $0x38] sm:$0xff]  }
 0x36b   :  { %10800 = vmatpush3.bf16.msra.mxu1 %v11900_v8  ;;  %v11937_v8 = vld [vmem:[#allocation10 + $0x64] ss:$8 sps:$4 sm:$0xff]  }
 0x3fd   :  { %v3737_v16 = vpop.f32.mrb[0].mxu0  ;;  %v12886_v18 = vpop.f32.mrb[0].mxu1 }
 0x3fe   :  { %v10865_v11 = vadd.f32 %v3737_v16, %v783_v12  ;;  %v3739_v20 = vpop.f32.mrb[1].mxu0  ;;  %v4067_v14 = vpop.f32.mrb[1].mxu1  ;;  %v10867_v62 = vadd.f32 %v12886_v18, %v791_v59  ;;  %v12494_v12 = vmov 0.0  }
 0x3ff   :  { %v10866_v21 = vadd.f32 %v3739_v20, %v787_v13  ;;  %v10868_v22 = vadd.f32 %v4067_v14, %v795_v15  ;;  %v3741_v23 = vpop.f32.mrb[2].mxu0  ;;  %v4069_v24 = vpop.f32.mrb[2].mxu1  ;;  %10825 = vmatprep.subr.bf16.mxu1 %v12494_v12  ;;  %v4144_v13 = vld [vmem:[#allocation16] sm:$0x3] }
 0x400   :  { %v4072_v26 = vmax.f32 %v10865_v11, 0.0  ;;  %v3742_v27 = vpop.f32.mrb[3].mxu0  ;;  %v4070_v28 = vpop.f32.mrb[3].mxu1  ;;  %v4074_v1 = vmax.f32 %v10867_v62, 0.0  ;;  %v4149_v15 = vrot.slane %v4144_v13, %v12870_v7  ;;  %v4153_v16 = vrot.slane %v4144_v13, %v12875_v9  ;;  %v11925_v62 = vld [vmem:[#allocation10 + $0x24] ss:$8 sps:$4 sm:$0xff]  }
 0x401   :  { %v4073_v19 = vmax.f32 %v10866_v21, 0.0  ;;  %v4075_v29 = vmax.f32 %v10868_v22, 0.0  ;;  %v11901_v27 = vld [vmem:[#allocation7] sm:$0xff]   ;;  %v11940_v13 = vld [vmem:[#allocation10 + $0x74] ss:$8 sps:$4 sm:$0xff]  }
 0x402   :  { %v4076_v31 = vpack.c.bf16 %v4072_v26, %v4072_v26  ;;  %v4078_v2 = vpack.c.bf16 %v4074_v1, %v4074_v1  ;;  %v11926_v1 = vld [vmem:[#allocation10 + $0x30] ss:$8 sps:$4 sm:$0xff]  }
 0x403   :  { %v4077_v17 = vpack.c.bf16 %v4073_v19, %v4073_v19  ;;  %v4079_v33 = vpack.c.bf16 %v4075_v29, %v4075_v29  ;;  %v11902_v19 = vld [vmem:[#allocation7 + $0x8] sm:$0xff]   ;;  %v11903_v29 = vld [vmem:[#allocation7 + $0x10] sm:$0xff]  }
 0x405   :  { %4508 = vmatprep.mubr.bf16.mxu0 %v4077_v17  ;;  %v11904_v17 = vld [vmem:[#allocation7 + $0x18] sm:$0xff]  }
 0x406   :  { %4509 = vmatmul.mubr.bf16.vlgmr.msra.gmra.mrb[4].mxu0 %v4076_v31  ;;  %v11906_v31 = vld [vmem:[#allocation7 + $0x28] sm:$0xff]  }
 0x407   :  { %4518 = vmatpush1.bf16.msra.mxu0 %v11837_v30  ;;  %4549 = vmatprep.mubr.bf16.mxu0 %v4079_v33  ;;  %v11905_v30 = vld [vmem:[#allocation7 + $0x20] sm:$0xff]   ;;  %v11908_v33 = vld [vmem:[#allocation7 + $0x38] sm:$0xff]  }
 0x408   :  { %4519 = vmatprep.subr.bf16.mxu0 %v11842_v32  ;;  %v11907_v32 = vld [vmem:[#allocation7 + $0x30] sm:$0xff]  }
 0x40b   :  { %4520 = vmatpush1.bf16.msra.mxu0 %v11840_v25 }
 0x40c   :  { %4521 = vmatprep.subr.bf16.mxu0 %v11845_v34  ;;  %v10142_v34 = vld [vmem:[#allocation18] ss:$0 sm:$0xff] }
 0x40f   :  { %4522 = vmatpush1.bf16.msra.mxu0 %v11843_v35 }
 0x410   :  { %4523 = vmatprep.subr.bf16.mxu0 %v11848_v36 }
 0x413   :  { %4524 = vmatpush1.bf16.msra.mxu0 %v11846_v37 }
 0x414   :  { %4525 = vmatprep.subr.bf16.mxu0 %v11851_v38 }
 0x417   :  { %4526 = vmatpush1.bf16.msra.mxu0 %v11849_v39 }
 0x418   :  { %4527 = vmatprep.subr.bf16.mxu0 %v11854_v40 }
 0x41b   :  { %4528 = vmatpush1.bf16.msra.mxu0 %v11852_v41  ;;  %v11909_v41 = vld [vmem:[#allocation9] sm:$0xff]  }
 0x41c   :  { %4529 = vmatprep.subr.bf16.mxu0 %v11857_v42 }
 0x41f   :  { %4530 = vmatpush1.bf16.msra.mxu0 %v11855_v43  ;;  %v11910_v43 = vld [vmem:[#allocation9 + $0x8] sm:$0xff]  }
 0x420   :  { %4531 = vmatprep.subr.bf16.mxu0 %v11860_v44  ;;  %v11911_v44 = vld [vmem:[#allocation9 + $0x10] sm:$0xff]  }
 0x423   :  { %4532 = vmatpush1.bf16.msra.mxu0 %v11858_v45  ;;  %v11912_v45 = vld [vmem:[#allocation9 + $0x18] sm:$0xff]  }
 0x424   :  { %4533 = vmatprep.subr.bf16.mxu0 %v11863_v46  ;;  %v11913_v46 = vld [vmem:[#allocation9 + $0x20] sm:$0xff]  }
 0x427   :  { %4534 = vmatpush1.bf16.msra.mxu0 %v11861_v47  ;;  %v11914_v47 = vld [vmem:[#allocation9 + $0x28] sm:$0xff]  }
 0x428   :  { %4535 = vmatprep.subr.bf16.mxu0 %v11866_v48  ;;  %v11915_v48 = vld [vmem:[#allocation9 + $0x30] sm:$0xff]  }
 0x42b   :  { %4536 = vmatpush1.bf16.msra.mxu0 %v11864_v49  ;;  %v11916_v49 = vld [vmem:[#allocation9 + $0x38] sm:$0xff]  }
 0x42c   :  { %4537 = vmatprep.subr.bf16.mxu0 %v11869_v50  ;;  %v11919_v50 = vld [vmem:[#allocation10 + $0x4] ss:$8 sps:$4 sm:$0xff]  }
 0x42f   :  { %4538 = vmatpush1.bf16.msra.mxu0 %v11867_v51  ;;  %v10159_v51 = vld [vmem:[#allocation19] ss:$0 sm:$0xff] }
 0x430   :  { %4539 = vmatprep.subr.bf16.mxu0 %v11872_v52 }
 0x433   :  { %4540 = vmatpush1.bf16.msra.mxu0 %v11870_v53 }
 0x434   :  { %4541 = vmatprep.subr.bf16.mxu0 %v11875_v54 }
 0x437   :  { %4542 = vmatpush1.bf16.msra.mxu0 %v11873_v55 }
 0x438   :  { %4543 = vmatprep.subr.bf16.mxu0 %v11878_v57  ;;  %v11917_v57 = vld [vmem:[#allocation10] ss:$8 sps:$4 sm:$0xff]  }
 0x43b   :  { %4544 = vmatpush1.bf16.msra.mxu0 %v11876_v58 }
 0x43c   :  { %4545 = vmatprep.subr.bf16.mxu0 %v11881_v60  ;;  %v11922_v60 = vld [vmem:[#allocation10 + $0x14] ss:$8 sps:$4 sm:$0xff]  }
 0x43f   :  { %4546 = vmatpush1.bf16.msra.mxu0 %v11879_v61  ;;  %v11920_v61 = vld [vmem:[#allocation10 + $0x10] ss:$8 sps:$4 sm:$0xff]  }
 0x440   :  { %4547 = vmatprep.subr.bf16.mxu0 %v11884_v63  ;;  %v11923_v63 = vld [vmem:[#allocation10 + $0x20] ss:$8 sps:$4 sm:$0xff]  }
 0x443   :  { %4548 = vmatpush1.bf16.msra.mxu0 %v11882_v0  ;;  %v11928_v0 = vld [vmem:[#allocation10 + $0x34] ss:$8 sps:$4 sm:$0xff]  }
 0x446   :  { %4550 = vmatmul.mubr.bf16.vlgmr.msra.gmra.mrb[4].mxu0 %v4078_v2  ;;  %v11931_v2 = vld [vmem:[#allocation10 + $0x44] ss:$8 sps:$4 sm:$0xff]  }
 0x519   :  { %v4551_v18 = vpop.f32.mrb[4].mxu0 }
 0x51a   :  { %v10869_v11 = vadd.f32 %v4551_v18, %v4149_v15  ;;  %v4553_v20 = vpop.f32.mrb[5].mxu0  ;;  %v11938_v15 = vld [vmem:[#allocation10 + $0x70] ss:$8 sps:$4 sm:$0xff]  }
 0x51b   :  { %v10870_v14 = vadd.f32 %v4553_v20, %v4153_v16  ;;  %v4555_v21 = vpop.f32.mrb[6].mxu0  ;;  %v12496_v16 = vmov 0   ;;  %v11941_v18 = vld [vmem:[#allocation12] ss:$16 sps:$4 sm:$0xff]   ;;  %v11946_v20 = vld [vmem:[#allocation12 + $0xc] ss:$16 sps:$4 sm:$0xff]  }
 0x51c   :  { %v4558_v22 = vmax.f32 %v10869_v11, 0.0  ;;  %v4556_v23 = vpop.f32.mrb[7].mxu0  ;;  %v11943_v11 = vld [vmem:[#allocation12 + $0x4] ss:$16 sps:$4 sm:$0xff]   ;;  %v11947_v21 = vld [vmem:[#allocation12 + $0x20] ss:$16 sps:$4 sm:$0xff]  }
 0x51d   :  { %v4559_v24 = vmax.f32 %v10870_v14, 0.0  ;;  %v11949_v14 = vld [vmem:[#allocation12 + $0x24] ss:$16 sps:$4 sm:$0xff]   ;;  %5523 = vmatprep.subr.bf16.mxu0 %v11943_v11  ;;  %v11953_v23 = vld [vmem:[#allocation12 + $0x40] ss:$16 sps:$4 sm:$0xff]  }
 0x51e   :  { %v4560_v28 = vpack.c.bf16 %v4558_v22, %v4558_v22  ;;  %5524 = vmatpush1.bf16.msra.mxu0 %v11941_v18  ;;  %v11955_v22 = vld [vmem:[#allocation12 + $0x44] ss:$16 sps:$4 sm:$0xff]   ;;  %v12010_v18 = vld [vmem:[#allocation12 + $0x168] ss:$16 sps:$4 sm:$0xff]   ;;  %v12018_v11 = vld [vmem:[#allocation12 + $0x18c] ss:$16 sps:$4 sm:$0xff]  }
 0x51f   :  { %v4561_v26 = vpack.c.bf16 %v4559_v24, %v4559_v24  ;;  %5525 = vmatprep.subr.bf16.mxu0 %v11949_v14  ;;  %v11961_v24 = vld [vmem:[#allocation12 + $0x64] ss:$16 sps:$4 sm:$0xff]   ;;  %v12024_v14 = vld [vmem:[#allocation12 + $0x1ac] ss:$16 sps:$4 sm:$0xff]  }
 0x521   :  { %4729 = vmatprep.mubr.bf16.mxu1 %v4561_v26  ;;  %v11959_v26 = vld [vmem:[#allocation12 + $0x60] ss:$16 sps:$4 sm:$0xff]  }
 0x522   :  { %4730 = vmatmul.mubr.bf16.vlgmr.msra.gmra.mrb[4].mxu1 %v4560_v28  ;;  %5526 = vmatpush1.bf16.msra.mxu0 %v11947_v21  ;;  %v11965_v28 = vld [vmem:[#allocation12 + $0x80] ss:$16 sps:$4 sm:$0xff]   ;;  %v12022_v21 = vld [vmem:[#allocation12 + $0x1a8] ss:$16 sps:$4 sm:$0xff]  }
 0x523   :  { %10826 = vmatpush3.bf16.msra.mxu1 %v11901_v27  ;;  %10841 = vmatprep.mubr.msk.bf16.mxu1 %vm12495_vm0, %v12494_v12  ;;  %v11967_v27 = vld [vmem:[#allocation12 + $0x84] ss:$16 sps:$4 sm:$0xff]  }
 0x524   :  { %10827 = vmatprep.subr.bf16.mxu1 %v12494_v12  ;;  %5527 = vmatprep.subr.bf16.mxu0 %v11955_v22  ;;  %v12027_v22 = vld [vmem:[#allocation12 + $0x1c4] ss:$16 sps:$4 sm:$0xff]  }
 0x526   :  { %5528 = vmatpush1.bf16.msra.mxu0 %v11953_v23  ;;  %v12030_v23 = vld [vmem:[#allocation12 + $0x1cc] ss:$16 sps:$4 sm:$0xff]  }
 0x527   :  { %10828 = vmatpush3.bf16.msra.mxu1 %v11902_v19  ;;  %5529 = vmatprep.subr.bf16.mxu0 %v11961_v24  ;;  %v11973_v19 = vld [vmem:[#allocation12 + $0xa4] ss:$16 sps:$4 sm:$0xff]   ;;  %v12025_v24 = vld [vmem:[#allocation12 + $0x1c0] ss:$16 sps:$4 sm:$0xff]  }
 0x528   :  { %10829 = vmatprep.subr.bf16.mxu1 %v12494_v12 }
 0x52a   :  { %5530 = vmatpush1.bf16.msra.mxu0 %v11959_v26  ;;  %v12028_v26 = vld [vmem:[#allocation12 + $0x1c8] ss:$16 sps:$4 sm:$0xff]  }
 0x52b   :  { %10830 = vmatpush3.bf16.msra.mxu1 %v11903_v29  ;;  %5531 = vmatprep.subr.bf16.mxu0 %v11967_v27  ;;  %v11971_v29 = vld [vmem:[#allocation12 + $0xa0] ss:$16 sps:$4 sm:$0xff]   ;;  %v12033_v27 = vld [vmem:[#allocation12 + $0x1e4] ss:$16 sps:$4 sm:$0xff]  }
 0x52c   :  { %10831 = vmatprep.subr.bf16.mxu1 %v12494_v12 }
 0x52e   :  { %5532 = vmatpush1.bf16.msra.mxu0 %v11965_v28  ;;  %v12036_v28 = vld [vmem:[#allocation12 + $0x1ec] ss:$16 sps:$4 sm:$0xff]  }
 0x52f   :  { %10832 = vmatpush3.bf16.msra.mxu1 %v11904_v17  ;;  %5533 = vmatprep.subr.bf16.mxu0 %v11973_v19  ;;  %v11979_v17 = vld [vmem:[#allocation12 + $0xc4] ss:$16 sps:$4 sm:$0xff]   ;;  %v12031_v19 = vld [vmem:[#allocation12 + $0x1e0] ss:$16 sps:$4 sm:$0xff]  }
 0x530   :  { %10833 = vmatprep.subr.bf16.mxu1 %v12494_v12 }
 0x532   :  { %5534 = vmatpush1.bf16.msra.mxu0 %v11971_v29  ;;  %v12034_v29 = vld [vmem:[#allocation12 + $0x1e8] ss:$16 sps:$4 sm:$0xff]  }
 0x533   :  { %10834 = vmatpush3.bf16.msra.mxu1 %v11905_v30  ;;  %v11977_v30 = vld [vmem:[#allocation12 + $0xc0] ss:$16 sps:$4 sm:$0xff]   ;;  %5535 = vmatprep.subr.bf16.mxu0 %v11979_v17 }
 0x534   :  { %10835 = vmatprep.subr.bf16.mxu1 %v12494_v12  ;;  %v5613_v17 = vld [vmem:[#allocation13] sm:$0xff] }
 0x536   :  { %5536 = vmatpush1.bf16.msra.mxu0 %v11977_v30  ;;  %v5621_v30 = vld [vmem:[#allocation13 + $0x40] sm:$0xff] }
 0x537   :  { %10836 = vmatpush3.bf16.msra.mxu1 %v11906_v31  ;;  %v11985_v31 = vld [vmem:[#allocation12 + $0xe4] ss:$16 sps:$4 sm:$0xff]  }
 0x538   :  { %10837 = vmatprep.subr.bf16.mxu1 %v12494_v12  ;;  %5537 = vmatprep.subr.bf16.mxu0 %v11985_v31  ;;  %v5614_v31 = vld [vmem:[#allocation13 + $0x8] sm:$0xff] }
 0x53b   :  { %10838 = vmatpush3.bf16.msra.mxu1 %v11907_v32  ;;  %v11983_v32 = vld [vmem:[#allocation12 + $0xe0] ss:$16 sps:$4 sm:$0xff]  }
 0x53c   :  { %10839 = vmatprep.subr.bf16.mxu1 %v12494_v12  ;;  %5538 = vmatpush1.bf16.msra.mxu0 %v11983_v32  ;;  %v10257_v32 = vcombine.low %v5613_v17, %v5621_v30 }
 0x53f   :  { %10840 = vmatpush3.bf16.msra.mxu1 %v11908_v33  ;;  %v11991_v33 = vld [vmem:[#allocation12 + $0x104] ss:$16 sps:$4 sm:$0xff]  }
 0x540   :  { %10845 = vmatprep.subr.bf16.mxu1 %v12494_v12  ;;  %5539 = vmatprep.subr.bf16.mxu0 %v11991_v33  ;;  %v10258_v33 = vcombine.high %v5613_v17, %v5621_v30  ;;  %v5709_v17 = vld [vmem:[#allocation13 + $0x300] sm:$0xff] }
 0x541   :  { %v5717_v30 = vld [vmem:[#allocation13 + $0x340] sm:$0xff] }
 0x5f5   :  { %v10801_v25 = vpop.f32.mrb[4].mxu1 }
 0x5f6   :  { %v10802_v35 = vpop.f32.mrb[5].mxu1 }
 0x5f7   :  { %v10803_v36 = vadd.f32 %v10802_v35, %v10801_v25  ;;  %v10804_v37 = vpop.f32.mrb[6].mxu1  ;;  %v11989_v25 = vld [vmem:[#allocation12 + $0x100] ss:$16 sps:$4 sm:$0xff]  }
 0x5f8   :  { %v10805_v38 = vpop.f32.mrb[7].mxu1  ;;  %5540 = vmatpush1.bf16.msra.mxu0 %v11989_v25  ;;  %v11995_v35 = vld [vmem:[#allocation12 + $0x120] ss:$16 sps:$4 sm:$0xff]   ;;  %v5622_v25 = vld [vmem:[#allocation13 + $0x48] sm:$0xff] }
 0x5f9   :  { %v4732_v39 = vadd.f32 %v10803_v36, %v10142_v34  ;;  %v11997_v34 = vld [vmem:[#allocation12 + $0x124] ss:$16 sps:$4 sm:$0xff]   ;;  %v12001_v37 = vld [vmem:[#allocation12 + $0x140] ss:$16 sps:$4 sm:$0xff]  }
 0x5fa   :  { %5541 = vmatprep.subr.bf16.mxu0 %v11997_v34  ;;  %v12003_v36 = vld [vmem:[#allocation12 + $0x144] ss:$16 sps:$4 sm:$0xff]   ;;  %v10259_v34 = vcombine.low %v5614_v31, %v5622_v25 }
 0x5fb   :  { %v4737_v40 = vmax.f32 %v4732_v39, 0.0  ;;  %v12009_v38 = vld [vmem:[#allocation12 + $0x164] ss:$16 sps:$4 sm:$0xff]   ;;  %v12007_v39 = vld [vmem:[#allocation12 + $0x160] ss:$16 sps:$4 sm:$0xff]  }
 0x5fc   :  { %5542 = vmatpush1.bf16.msra.mxu0 %v11995_v35  ;;  %v10260_v35 = vcombine.high %v5614_v31, %v5622_v25  ;;  %v5710_v31 = vld [vmem:[#allocation13 + $0x308] sm:$0xff] }
 0x5fd   :  { %v4738_v42 = vpack.c.bf16 %v4737_v40, %v4737_v40  ;;  %5543 = vmatprep.subr.bf16.mxu0 %v12003_v36  ;;  %v12015_v40 = vld [vmem:[#allocation12 + $0x184] ss:$16 sps:$4 sm:$0xff]   ;;  %v4980_v36 = vld [vmem:[#allocation22] sm:$0x3] }
 0x5ff   :  { %10842 = vmatmul.mubr.bf16.vlgmr.msra.gmra.mrb[8].mxu1 %v4738_v42  ;;  %v12021_v42 = vld [vmem:[#allocation12 + $0x1a4] ss:$16 sps:$4 sm:$0xff]  }
 0x600   :  { %10846 = vmatpush3.bf16.msra.mxu1 %v11909_v41  ;;  %10861 = vmatprep.mubr.msk.bf16.mxu1 %vm12495_vm0, %v12494_v12  ;;  %v12013_v41 = vld [vmem:[#allocation12 + $0x180] ss:$16 sps:$4 sm:$0xff]  }
 0x601   :  { %10847 = vmatprep.subr.bf16.mxu1 %v12494_v12  ;;  %5544 = vmatpush1.bf16.msra.mxu0 %v12001_v37  ;;  %v4985_v37 = vrot.slane %v4980_v36, %v12870_v7 }
 0x602   :  { %5545 = vmatprep.subr.bf16.mxu0 %v12009_v38  ;;  %v4989_v38 = vrot.slane %v4980_v36, %v12875_v9  ;;  %v5725_v36 = vld [vmem:[#allocation13 + $0x380] sm:$0xff] }
 0x604   :  { %10848 = vmatpush3.bf16.msra.mxu1 %v11910_v43  ;;  %v12019_v43 = vld [vmem:[#allocation12 + $0x1a0] ss:$16 sps:$4 sm:$0xff]  }
 0x605   :  { %10849 = vmatprep.subr.bf16.mxu1 %v12494_v12  ;;  %5546 = vmatpush1.bf16.msra.mxu0 %v12007_v39 }
 0x606   :  { %5547 = vmatprep.subr.bf16.mxu0 %v12015_v40 }
 0x608   :  { %10850 = vmatpush3.bf16.msra.mxu1 %v11911_v44  ;;  %v10168_v44 = vld [vmem:[#allocation21] ss:$0 sm:$0xff] }
 0x609   :  { %10851 = vmatprep.subr.bf16.mxu1 %v12494_v12  ;;  %5548 = vmatpush1.bf16.msra.mxu0 %v12013_v41 }
 0x60a   :  { %5549 = vmatprep.subr.bf16.mxu0 %v12021_v42 }
 0x60c   :  { %10852 = vmatpush3.bf16.msra.mxu1 %v11912_v45 }
 0x60d   :  { %10853 = vmatprep.subr.bf16.mxu1 %v12494_v12  ;;  %5550 = vmatpush1.bf16.msra.mxu0 %v12019_v43 }
 0x60e   :  { %5551 = vmatprep.subr.bf16.mxu0 %v12027_v22  ;;  %v5693_v22 = vld [vmem:[#allocation13 + $0x280] sm:$0xff] }
 0x610   :  { %10854 = vmatpush3.bf16.msra.mxu1 %v11913_v46 }
 0x611   :  { %10855 = vmatprep.subr.bf16.mxu1 %v12494_v12  ;;  %5552 = vmatpush1.bf16.msra.mxu0 %v12025_v24  ;;  %v5694_v24 = vld [vmem:[#allocation13 + $0x288] sm:$0xff] }
 0x612   :  { %5553 = vmatprep.subr.bf16.mxu0 %v12033_v27 }
 0x614   :  { %10856 = vmatpush3.bf16.msra.mxu1 %v11914_v47 }
 0x615   :  { %10857 = vmatprep.subr.bf16.mxu1 %v12494_v12  ;;  %5554 = vmatpush1.bf16.msra.mxu0 %v12031_v19 }
 0x616   :  { %8769 = vmatprep.subr.bf16.mxu0 %v10258_v33 }
 0x618   :  { %10858 = vmatpush3.bf16.msra.mxu1 %v11915_v48 }
 0x619   :  { %10859 = vmatprep.subr.bf16.mxu1 %v12494_v12  ;;  %v11935_v12 = vld [vmem:[#allocation10 + $0x60] ss:$8 sps:$4 sm:$0xff]  }
 0x61c   :  { %10860 = vmatpush3.bf16.msra.mxu1 %v11916_v49 }
 0x61d   :  { %5072 = vmatprep.subr.bf16.mxu1 %v11919_v50 }
 0x6d2   :  { %v4844_v52 = vpop.f32.mrb[8].mxu1 }
 0x6d3   :  { %v4845_v53 = vadd.f32 %v10159_v51, %v4844_v52  ;;  %v10843_v54 = vpop.f32.mrb[9].mxu1  ;;  %v11944_v51 = vld [vmem:[#allocation12 + $0x8] ss:$16 sps:$4 sm:$0xff]  }
 0x6d4   :  { %v4847_v55 = vpop.f32.mrb[10].mxu1  ;;  %v11950_v54 = vld [vmem:[#allocation12 + $0x28] ss:$16 sps:$4 sm:$0xff]  }
 0x6d5   :  { %v4850_v58 = vpack.c.bf16 %v4845_v53, %v4845_v53  ;;  %v10844_v59 = vpop.f32.mrb[11].mxu1  ;;  %v11952_v53 = vld [vmem:[#allocation12 + $0x2c] ss:$16 sps:$4 sm:$0xff]  }
 0x6d6   :  { %v11958_v55 = vld [vmem:[#allocation12 + $0x4c] ss:$16 sps:$4 sm:$0xff]   ;;  %v11962_v59 = vld [vmem:[#allocation12 + $0x68] ss:$16 sps:$4 sm:$0xff]  }
 0x6d7   :  { %10862 = vmatmul.mubr.bf16.vlgmr.msra.gmra.mrb[12].mxu1 %v4850_v58  ;;  %v11964_v58 = vld [vmem:[#allocation12 + $0x6c] ss:$16 sps:$4 sm:$0xff]  }
 0x6d8   :  { %5073 = vmatpush1.bf16.msra.mxu1 %v11917_v57  ;;  %5104 = vmatprep.mubr.bf16.mxu1 %v12496_v16  ;;  %v11956_v57 = vld [vmem:[#allocation12 + $0x48] ss:$16 sps:$4 sm:$0xff]   ;;  %v12012_v16 = vld [vmem:[#allocation12 + $0x16c] ss:$16 sps:$4 sm:$0xff]  }
 0x6d9   :  { %5074 = vmatprep.subr.bf16.mxu1 %v11922_v60  ;;  %v11970_v60 = vld [vmem:[#allocation12 + $0x8c] ss:$16 sps:$4 sm:$0xff]  }
 0x6dc   :  { %5075 = vmatpush1.bf16.msra.mxu1 %v11920_v61  ;;  %v11968_v61 = vld [vmem:[#allocation12 + $0x88] ss:$16 sps:$4 sm:$0xff]  }
 0x6dd   :  { %5076 = vmatprep.subr.bf16.mxu1 %v11925_v62  ;;  %v11976_v62 = vld [vmem:[#allocation12 + $0xac] ss:$16 sps:$4 sm:$0xff]  }
 0x6e0   :  { %5077 = vmatpush1.bf16.msra.mxu1 %v11923_v63  ;;  %v11974_v63 = vld [vmem:[#allocation12 + $0xa8] ss:$16 sps:$4 sm:$0xff]  }
 0x6e1   :  { %5078 = vmatprep.subr.bf16.mxu1 %v11928_v0  ;;  %v11982_v0 = vld [vmem:[#allocation12 + $0xcc] ss:$16 sps:$4 sm:$0xff]  }
 0x6e4   :  { %5079 = vmatpush1.bf16.msra.mxu1 %v11926_v1  ;;  %v11980_v1 = vld [vmem:[#allocation12 + $0xc8] ss:$16 sps:$4 sm:$0xff]  }
 0x6e5   :  { %5080 = vmatprep.subr.bf16.mxu1 %v11931_v2  ;;  %v11988_v2 = vld [vmem:[#allocation12 + $0xec] ss:$16 sps:$4 sm:$0xff]  }
 0x6e8   :  { %5081 = vmatpush1.bf16.msra.mxu1 %v11929_v3  ;;  %v11986_v3 = vld [vmem:[#allocation12 + $0xe8] ss:$16 sps:$4 sm:$0xff]  }
 0x6e9   :  { %5082 = vmatprep.subr.bf16.mxu1 %v11934_v4  ;;  %v11994_v4 = vld [vmem:[#allocation12 + $0x10c] ss:$16 sps:$4 sm:$0xff]  }
 0x6ec   :  { %5083 = vmatpush1.bf16.msra.mxu1 %v11932_v5  ;;  %v11992_v5 = vld [vmem:[#allocation12 + $0x108] ss:$16 sps:$4 sm:$0xff]  }
 0x6ed   :  { %5084 = vmatprep.subr.bf16.mxu1 %v11937_v8  ;;  %v12000_v8 = vld [vmem:[#allocation12 + $0x12c] ss:$16 sps:$4 sm:$0xff]  }
 0x6f0   :  { %5085 = vmatpush1.bf16.msra.mxu1 %v11935_v12  ;;  %v11998_v12 = vld [vmem:[#allocation12 + $0x128] ss:$16 sps:$4 sm:$0xff]  }
 0x6f1   :  { %5086 = vmatprep.subr.bf16.mxu1 %v11940_v13  ;;  %v12006_v13 = vld [vmem:[#allocation12 + $0x14c] ss:$16 sps:$4 sm:$0xff]  }
 0x6f4   :  { %5087 = vmatpush1.bf16.msra.mxu1 %v11938_v15  ;;  %v12004_v15 = vld [vmem:[#allocation12 + $0x148] ss:$16 sps:$4 sm:$0xff]  }
 0x6f5   :  { %5564 = vmatprep.subr.bf16.mxu1 %v11946_v20  ;;  %v12016_v20 = vld [vmem:[#allocation12 + $0x188] ss:$16 sps:$4 sm:$0xff]  }
 0x7aa   :  { %v4956_v45 = vpop.f32.mrb[12].mxu1 }
 0x7ab   :  { %v4957_v46 = vadd.f32 %v10168_v44, %v4956_v45  ;;  %v10863_v47 = vpop.f32.mrb[13].mxu1 }
 0x7ac   :  { %v4959_v48 = vpop.f32.mrb[14].mxu1 }
 0x7ad   :  { %v4962_v49 = vmax.f32 %v4957_v46, 0.0  ;;  %v10864_v50 = vpop.f32.mrb[15].mxu1  ;;  %v5629_v46 = vld [vmem:[#allocation13 + $0x80] sm:$0xff] }
 0x7ae   :  { %v5637_v48 = vld [vmem:[#allocation13 + $0xc0] sm:$0xff]  ;;  %v5638_v50 = vld [vmem:[#allocation13 + $0xc8] sm:$0xff] }
 0x7af   :  { %v4963_v52 = vpack.c.bf16 %v4962_v49, %v4962_v49  ;;  %v5630_v49 = vld [vmem:[#allocation13 + $0x88] sm:$0xff] }
 0x7b1   :  { %5105 = vmatmul.mubr.bf16.vlgmr.msra.gmra.mrb[16].mxu1 %v4963_v52 }
 0x7b2   :  { %5565 = vmatpush1.bf16.msra.mxu1 %v11944_v51 }
 0x7b3   :  { %5566 = vmatprep.subr.bf16.mxu1 %v11952_v53  ;;  %v10274_v53 = vcombine.high %v5629_v46, %v5637_v48 }
 0x7b6   :  { %5567 = vmatpush1.bf16.msra.mxu1 %v11950_v54  ;;  %v10276_v54 = vcombine.high %v5630_v49, %v5638_v50 }
 0x7b7   :  { %5568 = vmatprep.subr.bf16.mxu1 %v11958_v55  ;;  %v5645_v55 = vld [vmem:[#allocation13 + $0x100] sm:$0xff] }
 0x7ba   :  { %5569 = vmatpush1.bf16.msra.mxu1 %v11956_v57  ;;  %v5653_v57 = vld [vmem:[#allocation13 + $0x140] sm:$0xff] }
 0x7bb   :  { %5570 = vmatprep.subr.bf16.mxu1 %v11964_v58  ;;  %v5646_v58 = vld [vmem:[#allocation13 + $0x108] sm:$0xff] }
 0x7be   :  { %5571 = vmatpush1.bf16.msra.mxu1 %v11962_v59  ;;  %v5654_v59 = vld [vmem:[#allocation13 + $0x148] sm:$0xff] }
 0x7bf   :  { %5572 = vmatprep.subr.bf16.mxu1 %v11970_v60  ;;  %v10273_v60 = vcombine.low %v5629_v46, %v5637_v48  ;;  %v5742_v46 = vld [vmem:[#allocation13 + $0x408] sm:$0xff] }
 0x7c2   :  { %5573 = vmatpush1.bf16.msra.mxu1 %v11968_v61  ;;  %v10275_v61 = vcombine.low %v5630_v49, %v5638_v50 }
 0x7c3   :  { %5574 = vmatprep.subr.bf16.mxu1 %v11976_v62  ;;  %v10290_v62 = vcombine.high %v5645_v55, %v5653_v57 }
 0x7c6   :  { %5575 = vmatpush1.bf16.msra.mxu1 %v11974_v63  ;;  %v10292_v63 = vcombine.high %v5646_v58, %v5654_v59 }
 0x7c7   :  { %5576 = vmatprep.subr.bf16.mxu1 %v11982_v0  ;;  %v5661_v0 = vld [vmem:[#allocation13 + $0x180] sm:$0xff] }
 0x7ca   :  { %5577 = vmatpush1.bf16.msra.mxu1 %v11980_v1  ;;  %v5669_v1 = vld [vmem:[#allocation13 + $0x1c0] sm:$0xff] }
 0x7cb   :  { %5578 = vmatprep.subr.bf16.mxu1 %v11988_v2  ;;  %v5662_v2 = vld [vmem:[#allocation13 + $0x188] sm:$0xff] }
 0x7ce   :  { %5579 = vmatpush1.bf16.msra.mxu1 %v11986_v3  ;;  %v5670_v3 = vld [vmem:[#allocation13 + $0x1c8] sm:$0xff] }
 0x7cf   :  { %5580 = vmatprep.subr.bf16.mxu1 %v11994_v4  ;;  %v10289_v4 = vcombine.low %v5645_v55, %v5653_v57  ;;  %v5766_v55 = vld [vmem:[#allocation13 + $0x4c8] sm:$0xff] }
 0x7d2   :  { %5581 = vmatpush1.bf16.msra.mxu1 %v11992_v5  ;;  %v10291_v5 = vcombine.low %v5646_v58, %v5654_v59 }
 0x7d3   :  { %5582 = vmatprep.subr.bf16.mxu1 %v12000_v8  ;;  %v10306_v8 = vcombine.high %v5661_v0, %v5669_v1 }
 0x7d6   :  { %5583 = vmatpush1.bf16.msra.mxu1 %v11998_v12  ;;  %v10308_v12 = vcombine.high %v5662_v2, %v5670_v3 }
 0x7d7   :  { %5584 = vmatprep.subr.bf16.mxu1 %v12006_v13  ;;  %v5677_v13 = vld [vmem:[#allocation13 + $0x200] sm:$0xff] }
 0x7da   :  { %5585 = vmatpush1.bf16.msra.mxu1 %v12004_v15  ;;  %v5685_v15 = vld [vmem:[#allocation13 + $0x240] sm:$0xff] }
 0x7db   :  { %5586 = vmatprep.subr.bf16.mxu1 %v12012_v16  ;;  %v5678_v16 = vld [vmem:[#allocation13 + $0x208] sm:$0xff]  ;;  %v10321_v27 = vcombine.low %v5677_v13, %v5685_v15 }
 0x7de   :  { %5587 = vmatpush1.bf16.msra.mxu1 %v12010_v18  ;;  %v5686_v18 = vld [vmem:[#allocation13 + $0x248] sm:$0xff] }
 0x7df   :  { %5588 = vmatprep.subr.bf16.mxu1 %v12018_v11  ;;  %v10305_v11 = vcombine.low %v5661_v0, %v5669_v1  ;;  %v5782_v0 = vld [vmem:[#allocation13 + $0x548] sm:$0xff] }
 0x7e2   :  { %5589 = vmatpush1.bf16.msra.mxu1 %v12016_v20  ;;  %v10307_v20 = vcombine.low %v5662_v2, %v5670_v3 }
 0x7e3   :  { %5590 = vmatprep.subr.bf16.mxu1 %v12024_v14  ;;  %v10322_v14 = vcombine.high %v5677_v13, %v5685_v15  ;;  %v5798_v13 = vld [vmem:[#allocation13 + $0x5c8] sm:$0xff] }
 0x7e6   :  { %5591 = vmatpush1.bf16.msra.mxu1 %v12022_v21  ;;  %v10324_v21 = vcombine.high %v5678_v16, %v5686_v18 }
 0x7e7   :  { %5592 = vmatprep.subr.bf16.mxu1 %v12030_v23  ;;  %v5701_v23 = vld [vmem:[#allocation13 + $0x2c0] sm:$0xff] }
 0x7e8   :  { %v10338_v19 = vcombine.high %v5693_v22, %v5701_v23  ;;  %v10337_v33 = vcombine.low %v5693_v22, %v5701_v23  ;;  %v5814_v22 = vld [vmem:[#allocation13 + $0x648] sm:$0xff] }
 0x7ea   :  { %5593 = vmatpush1.bf16.msra.mxu1 %v12028_v26  ;;  %v5702_v26 = vld [vmem:[#allocation13 + $0x2c8] sm:$0xff] }
 0x7eb   :  { %5594 = vmatprep.subr.bf16.mxu1 %v12036_v28  ;;  %v10323_v28 = vcombine.low %v5678_v16, %v5686_v18  ;;  %v10339_v25 = vcombine.low %v5694_v24, %v5702_v26 }
 0x7ee   :  { %5595 = vmatpush1.bf16.msra.mxu1 %v12034_v29  ;;  %v10340_v29 = vcombine.high %v5694_v24, %v5702_v26 }
 0x7ef   :  { %8851 = vmatprep.subr.bf16.mxu1 %v10260_v35 }
 0x884   :  { %v5106_v39 = vpop.f32.mrb[16].mxu1 }
 0x885   :  { %v5107_v40 = vadd.f32 %v5106_v39, %v4985_v37  ;;  %v5108_v41 = vpop.f32.mrb[17].mxu1  ;;  %v5733_v37 = vld [vmem:[#allocation13 + $0x3c0] sm:$0xff]  ;;  %v5734_v39 = vld [vmem:[#allocation13 + $0x3c8] sm:$0xff] }
 0x886   :  { %v5109_v42 = vadd.f32 %v5108_v41, %v4989_v38  ;;  %v5110_v43 = vpop.f32.mrb[18].mxu1  ;;  %v5726_v38 = vld [vmem:[#allocation13 + $0x388] sm:$0xff]  ;;  %v10369_v48 = vcombine.low %v5725_v36, %v5733_v37 }
 0x887   :  { %v5113_v44 = vmax.f32 %v5107_v40, 0.0  ;;  %v5111_v45 = vpop.f32.mrb[19].mxu1  ;;  %v10353_v40 = vcombine.low %v5709_v17, %v5717_v30  ;;  %v10372_v43 = vcombine.high %v5726_v38, %v5734_v39  ;;  %v10371_v49 = vcombine.low %v5726_v38, %v5734_v39  ;;  %v5846_v39 = vld [vmem:[#allocation13 + $0x748] sm:$0xff] }
 0x888   :  { %v5114_v47 = vmax.f32 %v5109_v42, 0.0  ;;  %v10370_v42 = vcombine.high %v5725_v36, %v5733_v37  ;;  %v5749_v45 = vld [vmem:[#allocation13 + $0x440] sm:$0xff]  ;;  %v5838_v37 = vld [vmem:[#allocation13 + $0x708] sm:$0xff] }
 0x889   :  { %v5115_v52 = vpack.c.bf16 %v5113_v44, %v5113_v44  ;;  %v5741_v44 = vld [vmem:[#allocation13 + $0x400] sm:$0xff] }
 0x88a   :  { %v5116_v51 = vpack.c.bf16 %v5114_v47, %v5114_v47  ;;  %v5750_v47 = vld [vmem:[#allocation13 + $0x448] sm:$0xff]  ;;  %v10386_v50 = vcombine.high %v5741_v44, %v5749_v45  ;;  %v10385_v57 = vcombine.low %v5741_v44, %v5749_v45  ;;  %v5845_v36 = vld [vmem:[#allocation13 + $0x740] sm:$0xff] }
 0x88b   :  { %v10387_v58 = vcombine.low %v5742_v46, %v5750_v47  ;;  %v5861_v44 = vld [vmem:[#allocation13 + $0x7c0] sm:$0xff]  ;;  %v5854_v45 = vld [vmem:[#allocation13 + $0x788] sm:$0xff] }
 0x88c   :  { %5555 = vmatprep.mubr.bf16.mxu0 %v5116_v51  ;;  %5596 = vmatprep.mubr.bf16.mxu1 %v5116_v51  ;;  %v10388_v51 = vcombine.high %v5742_v46, %v5750_v47  ;;  %v5862_v47 = vld [vmem:[#allocation13 + $0x7c8] sm:$0xff] }
 0x88d   :  { %5556 = vmatmul.mubr.bf16.vlgmr.msra.gmra.mrb[8].mxu0 %v5115_v52  ;;  %5597 = vmatmul.mubr.bf16.vlgmr.msra.gmra.mrb[20].mxu1 %v5115_v52  ;;  %v5757_v52 = vld [vmem:[#allocation13 + $0x480] sm:$0xff] }
 0x88e   :  { %8770 = vmatpush1.bf16.msra.mxu0 %v10257_v32  ;;  %8852 = vmatpush1.bf16.msra.mxu1 %v10259_v34  ;;  %v5718_v32 = vld [vmem:[#allocation13 + $0x348] sm:$0xff]  ;;  %v10354_v34 = vcombine.high %v5709_v17, %v5717_v30 }
 0x88f   :  { %8771 = vmatprep.subr.bf16.mxu0 %v10274_v53  ;;  %8853 = vmatprep.subr.bf16.mxu1 %v10276_v54  ;;  %v10356_v35 = vcombine.high %v5710_v31, %v5718_v32  ;;  %v10355_v41 = vcombine.low %v5710_v31, %v5718_v32  ;;  %v5765_v53 = vld [vmem:[#allocation13 + $0x4c0] sm:$0xff]  ;;  %v5758_v54 = vld [vmem:[#allocation13 + $0x488] sm:$0xff] }
 0x890   :  { %v10402_v59 = vcombine.high %v5757_v52, %v5765_v53  ;;  %v10401_v1 = vcombine.low %v5757_v52, %v5765_v53  ;;  %v10403_v2 = vcombine.low %v5758_v54, %v5766_v55  ;;  %v5830_v17 = vld [vmem:[#allocation13 + $0x6c8] sm:$0xff]  ;;  %v5877_v52 = vld [vmem:[#allocation13 + $0x840] sm:$0xff] }
 0x891   :  { %v5870_v53 = vld [vmem:[#allocation13 + $0x808] sm:$0xff] }
 0x892   :  { %8772 = vmatpush1.bf16.msra.mxu0 %v10273_v60  ;;  %8854 = vmatpush1.bf16.msra.mxu1 %v10275_v61  ;;  %v10404_v60 = vcombine.high %v5758_v54, %v5766_v55  ;;  %v5773_v61 = vld [vmem:[#allocation13 + $0x500] sm:$0xff]  ;;  %v5878_v55 = vld [vmem:[#allocation13 + $0x848] sm:$0xff] }
 0x893   :  { %8773 = vmatprep.subr.bf16.mxu0 %v10290_v62  ;;  %8855 = vmatprep.subr.bf16.mxu1 %v10292_v63  ;;  %v5781_v62 = vld [vmem:[#allocation13 + $0x540] sm:$0xff]  ;;  %v5774_v63 = vld [vmem:[#allocation13 + $0x508] sm:$0xff] }
 0x894   :  { %v10418_v3 = vcombine.high %v5773_v61, %v5781_v62  ;;  %v10417_v15 = vcombine.low %v5773_v61, %v5781_v62  ;;  %v10419_v16 = vcombine.low %v5774_v63, %v5782_v0 }
 0x896   :  { %8774 = vmatpush1.bf16.msra.mxu0 %v10289_v4  ;;  %8856 = vmatpush1.bf16.msra.mxu1 %v10291_v5  ;;  %v10420_v4 = vcombine.high %v5774_v63, %v5782_v0  ;;  %v5789_v5 = vld [vmem:[#allocation13 + $0x580] sm:$0xff] }
 0x897   :  { %8775 = vmatprep.subr.bf16.mxu0 %v10306_v8  ;;  %8857 = vmatprep.subr.bf16.mxu1 %v10308_v12  ;;  %v5797_v8 = vld [vmem:[#allocation13 + $0x5c0] sm:$0xff]  ;;  %v5790_v12 = vld [vmem:[#allocation13 + $0x588] sm:$0xff] }
 0x898   :  { %v10434_v18 = vcombine.high %v5789_v5, %v5797_v8  ;;  %v10433_v23 = vcombine.low %v5789_v5, %v5797_v8  ;;  %v10435_v24 = vcombine.low %v5790_v12, %v5798_v13 }
 0x89a   :  { %8776 = vmatpush1.bf16.msra.mxu0 %v10305_v11  ;;  %8858 = vmatpush1.bf16.msra.mxu1 %v10307_v20  ;;  %v10436_v11 = vcombine.high %v5790_v12, %v5798_v13  ;;  %v5805_v20 = vld [vmem:[#allocation13 + $0x600] sm:$0xff] }
 0x89b   :  { %8777 = vmatprep.subr.bf16.mxu0 %v10322_v14  ;;  %8859 = vmatprep.subr.bf16.mxu1 %v10324_v21  ;;  %v5813_v14 = vld [vmem:[#allocation13 + $0x640] sm:$0xff]  ;;  %v5806_v21 = vld [vmem:[#allocation13 + $0x608] sm:$0xff] }
 0x89c   :  { %v10450_v26 = vcombine.high %v5805_v20, %v5813_v14  ;;  %v10449_v30 = vcombine.low %v5805_v20, %v5813_v14  ;;  %v10451_v31 = vcombine.low %v5806_v21, %v5814_v22  ;;  %v5885_v20 = vld [vmem:[#allocation13 + $0x880] sm:$0xff] }
 0x89e   :  { %8778 = vmatpush1.bf16.msra.mxu0 %v10321_v27  ;;  %8860 = vmatpush1.bf16.msra.mxu1 %v10323_v28  ;;  %v10452_v27 = vcombine.high %v5806_v21, %v5814_v22  ;;  %v5821_v28 = vld [vmem:[#allocation13 + $0x680] sm:$0xff]  ;;  %v5886_v22 = vld [vmem:[#allocation13 + $0x888] sm:$0xff] }
 0x89f   :  { %8779 = vmatprep.subr.bf16.mxu0 %v10338_v19  ;;  %8861 = vmatprep.subr.bf16.mxu1 %v10340_v29  ;;  %v5829_v19 = vld [vmem:[#allocation13 + $0x6c0] sm:$0xff]  ;;  %v5822_v29 = vld [vmem:[#allocation13 + $0x688] sm:$0xff] }
 0x8a0   :  { %v10466_v32 = vcombine.high %v5821_v28, %v5829_v19  ;;  %v5893_v21 = vld [vmem:[#allocation13 + $0x8c0] sm:$0xff] }
 0x8a2   :  { %8780 = vmatpush1.bf16.msra.mxu0 %v10337_v33  ;;  %8862 = vmatpush1.bf16.msra.mxu1 %v10339_v25  ;;  %v10468_v33 = vcombine.high %v5822_v29, %v5830_v17  ;;  %v10465_v25 = vcombine.low %v5821_v28, %v5829_v19  ;;  %v10530_v28 = vcombine.high %v5885_v20, %v5893_v21 }
 0x8a3   :  { %8781 = vmatprep.subr.bf16.mxu0 %v10354_v34  ;;  %8863 = vmatprep.subr.bf16.mxu1 %v10356_v35  ;;  %v10467_v34 = vcombine.low %v5822_v29, %v5830_v17  ;;  %v5837_v35 = vld [vmem:[#allocation13 + $0x700] sm:$0xff]  ;;  %v5902_v17 = vld [vmem:[#allocation13 + $0x908] sm:$0xff] }
 0x8a4   :  { %v10482_v38 = vcombine.high %v5837_v35, %v5845_v36  ;;  %v5909_v29 = vld [vmem:[#allocation13 + $0x940] sm:$0xff] }
 0x8a6   :  { %8782 = vmatpush1.bf16.msra.mxu0 %v10353_v40  ;;  %8864 = vmatpush1.bf16.msra.mxu1 %v10355_v41  ;;  %v10481_v40 = vcombine.low %v5837_v35, %v5845_v36  ;;  %v10483_v41 = vcombine.low %v5838_v37, %v5846_v39  ;;  %v5917_v35 = vld [vmem:[#allocation13 + $0x980] sm:$0xff] }
 0x8a7   :  { %8783 = vmatprep.subr.bf16.mxu0 %v10370_v42  ;;  %8865 = vmatprep.subr.bf16.mxu1 %v10372_v43  ;;  %v10484_v42 = vcombine.high %v5838_v37, %v5846_v39  ;;  %v5853_v43 = vld [vmem:[#allocation13 + $0x780] sm:$0xff]  ;;  %v5918_v37 = vld [vmem:[#allocation13 + $0x988] sm:$0xff] }
 0x8a8   :  { %v10498_v46 = vcombine.high %v5853_v43, %v5861_v44  ;;  %v5925_v36 = vld [vmem:[#allocation13 + $0x9c0] sm:$0xff] }
 0x8aa   :  { %8784 = vmatpush1.bf16.msra.mxu0 %v10369_v48  ;;  %8866 = vmatpush1.bf16.msra.mxu1 %v10371_v49  ;;  %v10497_v48 = vcombine.low %v5853_v43, %v5861_v44  ;;  %v10499_v49 = vcombine.low %v5854_v45, %v5862_v47  ;;  %v5933_v43 = vld [vmem:[#allocation13 + $0xa00] sm:$0xff] }
 0x8ab   :  { %8785 = vmatprep.subr.bf16.mxu0 %v10386_v50  ;;  %8867 = vmatprep.subr.bf16.mxu1 %v10388_v51  ;;  %v10500_v50 = vcombine.high %v5854_v45, %v5862_v47  ;;  %v5869_v51 = vld [vmem:[#allocation13 + $0x800] sm:$0xff]  ;;  %v5934_v45 = vld [vmem:[#allocation13 + $0xa08] sm:$0xff]  ;;  %v10561_v47 = vcombine.low %v5917_v35, %v5925_v36 }
 0x8ac   :  { %v10514_v54 = vcombine.high %v5869_v51, %v5877_v52  ;;  %v5941_v44 = vld [vmem:[#allocation13 + $0xa40] sm:$0xff] }
 0x8ae   :  { %8786 = vmatpush1.bf16.msra.mxu0 %v10385_v57  ;;  %8868 = vmatpush1.bf16.msra.mxu1 %v10387_v58  ;;  %v10513_v57 = vcombine.low %v5869_v51, %v5877_v52  ;;  %v10515_v58 = vcombine.low %v5870_v53, %v5878_v55  ;;  %v5949_v51 = vld [vmem:[#allocation13 + $0xa80] sm:$0xff] }
 0x8af   :  { %8787 = vmatprep.subr.bf16.mxu0 %v10402_v59  ;;  %8869 = vmatprep.subr.bf16.mxu1 %v10404_v60  ;;  %v10516_v59 = vcombine.high %v5870_v53, %v5878_v55  ;;  %v12916_v60 = vld [vmem:[#allocation24] sm:$0xf]  ;;  %v5957_v52 = vld [vmem:[#allocation13 + $0xac0] sm:$0xff]  ;;  %v10577_v55 = vcombine.low %v5933_v43, %v5941_v44 }
 0x8b0   :  { %v5186_v61 = vrot.slane %v12916_v60, %v12870_v7  ;;  %v5190_v62 = vrot.slane %v12916_v60, %v12875_v9  ;;  %v5198_v63 = vrot.slane %v12916_v60, %v12878_v10  ;;  %v5950_v53 = vld [vmem:[#allocation13 + $0xa88] sm:$0xff] }
 0x8b2   :  { %8788 = vmatpush1.bf16.msra.mxu0 %v10401_v1  ;;  %8870 = vmatpush1.bf16.msra.mxu1 %v10403_v2 }
 0x8b3   :  { %8789 = vmatprep.subr.bf16.mxu0 %v10418_v3  ;;  %8871 = vmatprep.subr.bf16.mxu1 %v10420_v4 }
 0x8b6   :  { %8790 = vmatpush1.bf16.msra.mxu0 %v10417_v15  ;;  %8872 = vmatpush1.bf16.msra.mxu1 %v10419_v16 }
 0x8b7   :  { %8791 = vmatprep.subr.bf16.mxu0 %v10434_v18  ;;  %8873 = vmatprep.subr.bf16.mxu1 %v10436_v11 }
 0x8ba   :  { %8792 = vmatpush1.bf16.msra.mxu0 %v10433_v23  ;;  %8874 = vmatpush1.bf16.msra.mxu1 %v10435_v24  ;;  %v5894_v23 = vld [vmem:[#allocation13 + $0x8c8] sm:$0xff] }
 0x8bb   :  { %8793 = vmatprep.subr.bf16.mxu0 %v10450_v26  ;;  %8875 = vmatprep.subr.bf16.mxu1 %v10452_v27  ;;  %v5901_v27 = vld [vmem:[#allocation13 + $0x900] sm:$0xff]  ;;  %v10532_v19 = vcombine.high %v5886_v22, %v5894_v23 }
 0x8bc   :  { %v10545_v39 = vcombine.low %v5901_v27, %v5909_v29 }
 0x8be   :  { %8794 = vmatpush1.bf16.msra.mxu0 %v10449_v30  ;;  %8876 = vmatpush1.bf16.msra.mxu1 %v10451_v31  ;;  %v5910_v30 = vld [vmem:[#allocation13 + $0x948] sm:$0xff] }
 0x8bf   :  { %8795 = vmatprep.subr.bf16.mxu0 %v10466_v32  ;;  %8877 = vmatprep.subr.bf16.mxu1 %v10468_v33  ;;  %v10529_v32 = vcombine.low %v5885_v20, %v5893_v21  ;;  %v10531_v33 = vcombine.low %v5886_v22, %v5894_v23  ;;  %v6005_v21 = vld [vmem:[#allocation13 + $0xc40] sm:$0xff]  ;;  %v5998_v22 = vld [vmem:[#allocation13 + $0xc08] sm:$0xff] }
 0x8c0   :  { %v6006_v23 = vld [vmem:[#allocation13 + $0xc48] sm:$0xff] }
 0x8c2   :  { %8796 = vmatpush1.bf16.msra.mxu0 %v10465_v25  ;;  %8878 = vmatpush1.bf16.msra.mxu1 %v10467_v34  ;;  %v10546_v25 = vcombine.high %v5901_v27, %v5909_v29  ;;  %v10548_v34 = vcombine.high %v5902_v17, %v5910_v30  ;;  %v10644_v29 = vcombine.high %v5998_v22, %v6006_v23 }
 0x8c3   :  { %8797 = vmatprep.subr.bf16.mxu0 %v10482_v38  ;;  %8879 = vmatprep.subr.bf16.mxu1 %v10484_v42  ;;  %v5926_v38 = vld [vmem:[#allocation13 + $0x9c8] sm:$0xff] }
 0x8c4   :  { %v10564_v42 = vcombine.high %v5918_v37, %v5926_v38 }
 0x8c6   :  { %8798 = vmatpush1.bf16.msra.mxu0 %v10481_v40  ;;  %8880 = vmatpush1.bf16.msra.mxu1 %v10483_v41  ;;  %v10547_v40 = vcombine.low %v5902_v17, %v5910_v30  ;;  %v10562_v41 = vcombine.high %v5917_v35, %v5925_v36  ;;  %v6013_v17 = vld [vmem:[#allocation13 + $0xc80] sm:$0xff] }
 0x8c7   :  { %8799 = vmatprep.subr.bf16.mxu0 %v10498_v46  ;;  %8881 = vmatprep.subr.bf16.mxu1 %v10500_v50  ;;  %v5942_v46 = vld [vmem:[#allocation13 + $0xa48] sm:$0xff]  ;;  %v6021_v30 = vld [vmem:[#allocation13 + $0xcc0] sm:$0xff] }
 0x8c8   :  { %v10580_v50 = vcombine.high %v5934_v45, %v5942_v46  ;;  %v10658_v35 = vcombine.high %v6013_v17, %v6021_v30 }
 0x8ca   :  { %8800 = vmatpush1.bf16.msra.mxu0 %v10497_v48  ;;  %8882 = vmatpush1.bf16.msra.mxu1 %v10499_v49  ;;  %v10563_v48 = vcombine.low %v5918_v37, %v5926_v38  ;;  %v10578_v49 = vcombine.high %v5933_v43, %v5941_v44  ;;  %v6029_v37 = vld [vmem:[#allocation13 + $0xd00] sm:$0xff] }
 0x8cb   :  { %8810 = vmatprep.subr.bf16.mxu0 %v10514_v54  ;;  %8892 = vmatprep.subr.bf16.mxu1 %v10516_v59  ;;  %v5958_v54 = vld [vmem:[#allocation13 + $0xac8] sm:$0xff]  ;;  %v6037_v38 = vld [vmem:[#allocation13 + $0xd40] sm:$0xff] }
 0x8cc   :  { %v10596_v59 = vcombine.high %v5950_v53, %v5958_v54  ;;  %v10674_v43 = vcombine.high %v6029_v37, %v6037_v38 }
 0x960   :  { %v5557_v0 = vpop.f32.mrb[8].mxu0  ;;  %v12924_v1 = vpop.f32.mrb[20].mxu1 }
 0x961   :  { %v5558_v2 = vadd.f32 %v5557_v0, %v5186_v61  ;;  %v5559_v3 = vpop.f32.mrb[9].mxu0  ;;  %v5600_v4 = vpop.f32.mrb[21].mxu1  ;;  %v5965_v61 = vld [vmem:[#allocation13 + $0xb00] sm:$0xff]  ;;  %v5974_v0 = vld [vmem:[#allocation13 + $0xb48] sm:$0xff] }
 0x962   :  { %v5560_v5 = vadd.f32 %v5559_v3, %v5190_v62  ;;  %v5601_v8 = vadd.f32 %v5600_v4, %v5198_v63  ;;  %v5561_v12 = vpop.f32.mrb[10].mxu0  ;;  %v5602_v13 = vpop.f32.mrb[22].mxu1  ;;  %v5973_v62 = vld [vmem:[#allocation13 + $0xb40] sm:$0xff]  ;;  %v5966_v63 = vld [vmem:[#allocation13 + $0xb08] sm:$0xff]  ;;  %v10595_v3 = vcombine.low %v5950_v53, %v5958_v54 }
 0x963   :  { %v5605_v15 = vmax.f32 %v5558_v2, 0.0  ;;  %v5562_v16 = vpop.f32.mrb[11].mxu0  ;;  %v5603_v18 = vpop.f32.mrb[23].mxu1  ;;  %v10593_v2 = vcombine.low %v5949_v51, %v5957_v52  ;;  %v10610_v4 = vcombine.high %v5965_v61, %v5973_v62  ;;  %v5989_v12 = vld [vmem:[#allocation13 + $0xbc0] sm:$0xff]  ;;  %v5982_v13 = vld [vmem:[#allocation13 + $0xb88] sm:$0xff] }
 0x964   :  { %v5606_v11 = vmax.f32 %v5560_v5, 0.0  ;;  %v5608_v14 = vmax.f32 %v5601_v8, 0.0  ;;  %v10612_v5 = vcombine.high %v5966_v63, %v5974_v0  ;;  %v5981_v8 = vld [vmem:[#allocation13 + $0xb80] sm:$0xff]  ;;  %v10609_v16 = vcombine.low %v5965_v61, %v5973_v62 }
 0x965   :  { %v12928_v26 = vpack.c.bf16 %v5605_v15, %v5605_v15  ;;  %v5990_v15 = vld [vmem:[#allocation13 + $0xbc8] sm:$0xff]  ;;  %v10611_v18 = vcombine.low %v5966_v63, %v5974_v0  ;;  %v10625_v27 = vcombine.low %v5981_v8, %v5989_v12  ;;  %v6061_v53 = vld [vmem:[#allocation13 + $0xe00] sm:$0xff] }
 0x966   :  { %v12926_v24 = vpack.c.bf16 %v5606_v11, %v5606_v11  ;;  %v12932_v31 = vpack.c.bf16 %v5608_v14, %v5608_v14  ;;  %v10626_v11 = vcombine.high %v5981_v8, %v5989_v12  ;;  %v10628_v20 = vcombine.high %v5982_v13, %v5990_v15  ;;  %v5997_v14 = vld [vmem:[#allocation13 + $0xc00] sm:$0xff] }
 0x967   :  { %v6069_v54 = vld [vmem:[#allocation13 + $0xe40] sm:$0xff] }
 0x968   :  { %8801 = vmatprep.mubr.bf16.mxu0 %v12926_v24  ;;  %8883 = vmatprep.mubr.bf16.mxu1 %v12926_v24  ;;  %v10706_v61 = vcombine.high %v6061_v53, %v6069_v54  ;;  %v6077_v63 = vld [vmem:[#allocation13 + $0xe80] sm:$0xff] }
 0x969   :  { %8802 = vmatmul.mubr.bf16.vlgmr.msra.gmra.mrb[12].mxu0 %v12928_v26  ;;  %8884 = vmatmul.mubr.bf16.vlgmr.msra.gmra.mrb[24].mxu1 %v12928_v26  ;;  %v6085_v0 = vld [vmem:[#allocation13 + $0xec0] sm:$0xff] }
 0x96a   :  { %8811 = vmatpush1.bf16.msra.mxu0 %v10513_v57  ;;  %8893 = vmatpush1.bf16.msra.mxu1 %v10515_v58  ;;  %v10579_v57 = vcombine.low %v5934_v45, %v5942_v46  ;;  %v10594_v58 = vcombine.high %v5949_v51, %v5957_v52  ;;  %v6045_v45 = vld [vmem:[#allocation13 + $0xd80] sm:$0xff]  ;;  %v10722_v8 = vcombine.high %v6077_v63, %v6085_v0 }
 0x96b   :  { %8842 = vmatprep.mubr.bf16.mxu0 %v12932_v31  ;;  %8924 = vmatprep.mubr.bf16.mxu1 %v12932_v31  ;;  %v6053_v46 = vld [vmem:[#allocation13 + $0xdc0] sm:$0xff] }
 0x96c   :  { %8812 = vmatprep.subr.bf16.mxu0 %v10530_v28  ;;  %8894 = vmatprep.subr.bf16.mxu1 %v10532_v19  ;;  %v10627_v28 = vcombine.low %v5982_v13, %v5990_v15  ;;  %v10642_v19 = vcombine.high %v5997_v14, %v6005_v21  ;;  %v10690_v51 = vcombine.high %v6045_v45, %v6053_v46  ;;  %v6093_v13 = vld [vmem:[#allocation13 + $0xf00] sm:$0xff] }
 0x96d   :  { %v6101_v15 = vld [vmem:[#allocation13 + $0xf40] sm:$0xff] }
 0x96e   :  { %8813 = vmatpush1.bf16.msra.mxu0 %v10529_v32  ;;  %8895 = vmatpush1.bf16.msra.mxu1 %v10531_v33  ;;  %v6014_v32 = vld [vmem:[#allocation13 + $0xc88] sm:$0xff] }
 0x96f   :  { %8814 = vmatprep.subr.bf16.mxu0 %v10546_v25  ;;  %8896 = vmatprep.subr.bf16.mxu1 %v10548_v34  ;;  %v6022_v33 = vld [vmem:[#allocation13 + $0xcc8] sm:$0xff]  ;;  %v10641_v25 = vcombine.low %v5997_v14, %v6005_v21  ;;  %v10643_v34 = vcombine.low %v5998_v22, %v6006_v23  ;;  %v5194_v14 = vrot.slane %v12916_v60, %v12889_v56  ;;  %v6109_v23 = vld [vmem:[#allocation13 + $0xf80] sm:$0xff]  ;;  %v5623_v60 = vld [vmem:[#allocation13 + $0x50] sm:$0xff] }
 0x970   :  { %v10660_v36 = vcombine.high %v6014_v32, %v6022_v33  ;;  %v10738_v21 = vcombine.high %v6093_v13, %v6101_v15 }
 0x972   :  { %8815 = vmatpush1.bf16.msra.mxu0 %v10545_v39  ;;  %8897 = vmatpush1.bf16.msra.mxu1 %v10547_v40  ;;  %v6030_v39 = vld [vmem:[#allocation13 + $0xd08] sm:$0xff] }
 0x973   :  { %8816 = vmatprep.subr.bf16.mxu0 %v10562_v41  ;;  %8898 = vmatprep.subr.bf16.mxu1 %v10564_v42  ;;  %v6038_v40 = vld [vmem:[#allocation13 + $0xd48] sm:$0xff]  ;;  %v10657_v41 = vcombine.low %v6013_v17, %v6021_v30  ;;  %v10659_v42 = vcombine.low %v6014_v32, %v6022_v33  ;;  %v5599_v30 = vadd.f32 %v12924_v1, %v5194_v14  ;;  %v5632_v1 = vld [vmem:[#allocation13 + $0x98] sm:$0xff] }
 0x974   :  { %v10676_v44 = vcombine.high %v6030_v39, %v6038_v40  ;;  %v5696_v14 = vld [vmem:[#allocation13 + $0x298] sm:$0xff] }
 0x976   :  { %8817 = vmatpush1.bf16.msra.mxu0 %v10561_v47  ;;  %8899 = vmatpush1.bf16.msra.mxu1 %v10563_v48  ;;  %v6046_v47 = vld [vmem:[#allocation13 + $0xd88] sm:$0xff] }
 0x977   :  { %8818 = vmatprep.subr.bf16.mxu0 %v10578_v49  ;;  %8900 = vmatprep.subr.bf16.mxu1 %v10580_v50  ;;  %v6054_v48 = vld [vmem:[#allocation13 + $0xdc8] sm:$0xff]  ;;  %v10673_v49 = vcombine.low %v6029_v37, %v6037_v38  ;;  %v10675_v50 = vcombine.low %v6030_v39, %v6038_v40  ;;  %v5607_v38 = vmax.f32 %v5599_v30, 0.0  ;;  %v5720_v30 = vld [vmem:[#allocation13 + $0x358] sm:$0xff] }
 0x978   :  { %v10692_v52 = vcombine.high %v6046_v47, %v6054_v48 }
 0x97a   :  { %8819 = vmatpush1.bf16.msra.mxu0 %v10577_v55  ;;  %8901 = vmatpush1.bf16.msra.mxu1 %v10579_v57  ;;  %v6062_v55 = vld [vmem:[#allocation13 + $0xe08] sm:$0xff] }
 0x97b   :  { %8820 = vmatprep.subr.bf16.mxu0 %v10594_v58  ;;  %8902 = vmatprep.subr.bf16.mxu1 %v10596_v59  ;;  %v6070_v57 = vld [vmem:[#allocation13 + $0xe48] sm:$0xff]  ;;  %v10689_v58 = vcombine.low %v6045_v45, %v6053_v46  ;;  %v10691_v59 = vcombine.low %v6046_v47, %v6054_v48  ;;  %v12941_v45 = vpack.c.bf16 %v5607_v38, %v5607_v38 }
 0x97c   :  { %v10708_v62 = vcombine.high %v6062_v55, %v6070_v57 }
 0x97e   :  { %8821 = vmatpush1.bf16.msra.mxu0 %v10593_v2  ;;  %8903 = vmatpush1.bf16.msra.mxu1 %v10595_v3  ;;  %v6078_v2 = vld [vmem:[#allocation13 + $0xe88] sm:$0xff] }
 0x97f   :  { %8822 = vmatprep.subr.bf16.mxu0 %v10610_v4  ;;  %8904 = vmatprep.subr.bf16.mxu1 %v10612_v5  ;;  %v6086_v3 = vld [vmem:[#allocation13 + $0xec8] sm:$0xff]  ;;  %v10705_v4 = vcombine.low %v6061_v53, %v6069_v54  ;;  %v10707_v5 = vcombine.low %v6062_v55, %v6070_v57 }
 0x980   :  { %v10724_v12 = vcombine.high %v6078_v2, %v6086_v3 }
 0x982   :  { %8823 = vmatpush1.bf16.msra.mxu0 %v10609_v16  ;;  %8905 = vmatpush1.bf16.msra.mxu1 %v10611_v18  ;;  %v6094_v16 = vld [vmem:[#allocation13 + $0xf08] sm:$0xff] }
 0x983   :  { %8824 = vmatprep.subr.bf16.mxu0 %v10626_v11  ;;  %8906 = vmatprep.subr.bf16.mxu1 %v10628_v20  ;;  %v6102_v18 = vld [vmem:[#allocation13 + $0xf48] sm:$0xff]  ;;  %v10721_v11 = vcombine.low %v6077_v63, %v6085_v0  ;;  %v10723_v20 = vcombine.low %v6078_v2, %v6086_v3 }
 0x984   :  { %v10740_v22 = vcombine.high %v6094_v16, %v6102_v18  ;;  %v10739_v17 = vcombine.low %v6094_v16, %v6102_v18 }
 0x986   :  { %8825 = vmatpush1.bf16.msra.mxu0 %v10625_v27  ;;  %8907 = vmatpush1.bf16.msra.mxu1 %v10627_v28  ;;  %v6117_v27 = vld [vmem:[#allocation13 + $0xfc0] sm:$0xff]  ;;  %v6110_v28 = vld [vmem:[#allocation13 + $0xf88] sm:$0xff] }
 0x987   :  { %8826 = vmatprep.subr.bf16.mxu0 %v10642_v19  ;;  %8908 = vmatprep.subr.bf16.mxu1 %v10644_v29  ;;  %v6118_v19 = vld [vmem:[#allocation13 + $0xfc8] sm:$0xff]  ;;  %v10737_v29 = vcombine.low %v6093_v13, %v6101_v15  ;;  %v10754_v32 = vcombine.high %v6109_v23, %v6117_v27 }
 0x988   :  { %v10756_v33 = vcombine.high %v6110_v28, %v6118_v19  ;;  %v10755_v37 = vcombine.low %v6110_v28, %v6118_v19  ;;  %v5711_v19 = vld [vmem:[#allocation13 + $0x310] sm:$0xff] }
 0x98a   :  { %8827 = vmatpush1.bf16.msra.mxu0 %v10641_v25  ;;  %8909 = vmatpush1.bf16.msra.mxu1 %v10643_v34  ;;  %v5615_v25 = vld [vmem:[#allocation13 + $0x10] sm:$0xff]  ;;  %v5616_v34 = vld [vmem:[#allocation13 + $0x18] sm:$0xff] }
 0x98b   :  { %8828 = vmatprep.subr.bf16.mxu0 %v10658_v35  ;;  %8910 = vmatprep.subr.bf16.mxu1 %v10660_v36  ;;  %v5624_v35 = vld [vmem:[#allocation13 + $0x58] sm:$0xff]  ;;  %v10753_v36 = vcombine.low %v6109_v23, %v6117_v27  ;;  %v10262_v39 = vcombine.high %v5615_v25, %v5623_v60 }
 0x98c   :  { %v10264_v40 = vcombine.high %v5616_v34, %v5624_v35  ;;  %v10263_v46 = vcombine.low %v5616_v34, %v5624_v35  ;;  %v5727_v34 = vld [vmem:[#allocation13 + $0x390] sm:$0xff] }
 0x98d   :  { %v5735_v35 = vld [vmem:[#allocation13 + $0x3d0] sm:$0xff] }
 0x98e   :  { %8829 = vmatpush1.bf16.msra.mxu0 %v10657_v41  ;;  %8911 = vmatpush1.bf16.msra.mxu1 %v10659_v42  ;;  %v5631_v41 = vld [vmem:[#allocation13 + $0x90] sm:$0xff] }
 0x98f   :  { %8830 = vmatprep.subr.bf16.mxu0 %v10674_v43  ;;  %8912 = vmatprep.subr.bf16.mxu1 %v10676_v44  ;;  %v5639_v42 = vld [vmem:[#allocation13 + $0xd0] sm:$0xff]  ;;  %v5640_v43 = vld [vmem:[#allocation13 + $0xd8] sm:$0xff]  ;;  %v10261_v44 = vcombine.low %v5615_v25, %v5623_v60 }
 0x990   :  { %v10278_v47 = vcombine.high %v5631_v41, %v5639_v42  ;;  %v10280_v48 = vcombine.high %v5632_v1, %v5640_v43  ;;  %v10277_v53 = vcombine.low %v5631_v41, %v5639_v42  ;;  %v10279_v54 = vcombine.low %v5632_v1, %v5640_v43  ;;  %v5743_v42 = vld [vmem:[#allocation13 + $0x410] sm:$0xff]  ;;  %v5744_v43 = vld [vmem:[#allocation13 + $0x418] sm:$0xff] }
 0x991   :  { %v5751_v1 = vld [vmem:[#allocation13 + $0x450] sm:$0xff] }
 0x992   :  { %8831 = vmatpush1.bf16.msra.mxu0 %v10673_v49  ;;  %8913 = vmatpush1.bf16.msra.mxu1 %v10675_v50  ;;  %v5647_v49 = vld [vmem:[#allocation13 + $0x110] sm:$0xff] }
 0x993   :  { %8832 = vmatprep.subr.bf16.mxu0 %v10690_v51  ;;  %8914 = vmatprep.subr.bf16.mxu1 %v10692_v52  ;;  %v5655_v50 = vld [vmem:[#allocation13 + $0x150] sm:$0xff]  ;;  %v5648_v51 = vld [vmem:[#allocation13 + $0x118] sm:$0xff] }
 0x994   :  { %v5656_v52 = vld [vmem:[#allocation13 + $0x158] sm:$0xff]  ;;  %v10294_v55 = vcombine.high %v5647_v49, %v5655_v50  ;;  %v10293_v63 = vcombine.low %v5647_v49, %v5655_v50  ;;  %v5759_v50 = vld [vmem:[#allocation13 + $0x490] sm:$0xff] }
 0x995   :  { %v10296_v57 = vcombine.high %v5648_v51, %v5656_v52  ;;  %v10295_v0 = vcombine.low %v5648_v51, %v5656_v52  ;;  %v5767_v51 = vld [vmem:[#allocation13 + $0x4d0] sm:$0xff]  ;;  %v5760_v52 = vld [vmem:[#allocation13 + $0x498] sm:$0xff] }
 0x996   :  { %8833 = vmatpush1.bf16.msra.mxu0 %v10689_v58  ;;  %8915 = vmatpush1.bf16.msra.mxu1 %v10691_v59  ;;  %v5663_v58 = vld [vmem:[#allocation13 + $0x190] sm:$0xff] }
 0x997   :  { %8834 = vmatprep.subr.bf16.mxu0 %v10706_v61  ;;  %8916 = vmatprep.subr.bf16.mxu1 %v10708_v62  ;;  %v5671_v59 = vld [vmem:[#allocation13 + $0x1d0] sm:$0xff]  ;;  %v5664_v61 = vld [vmem:[#allocation13 + $0x198] sm:$0xff] }
 0x998   :  { %v5672_v62 = vld [vmem:[#allocation13 + $0x1d8] sm:$0xff]  ;;  %v10310_v2 = vcombine.high %v5663_v58, %v5671_v59  ;;  %v10309_v13 = vcombine.low %v5663_v58, %v5671_v59  ;;  %v5775_v59 = vld [vmem:[#allocation13 + $0x510] sm:$0xff] }
 0x999   :  { %v10312_v3 = vcombine.high %v5664_v61, %v5672_v62  ;;  %v10311_v15 = vcombine.low %v5664_v61, %v5672_v62  ;;  %v5783_v61 = vld [vmem:[#allocation13 + $0x550] sm:$0xff]  ;;  %v5776_v62 = vld [vmem:[#allocation13 + $0x518] sm:$0xff] }
 0x99a   :  { %8835 = vmatpush1.bf16.msra.mxu0 %v10705_v4  ;;  %8917 = vmatpush1.bf16.msra.mxu1 %v10707_v5  ;;  %v5679_v4 = vld [vmem:[#allocation13 + $0x210] sm:$0xff] }
 0x99b   :  { %8836 = vmatprep.subr.bf16.mxu0 %v10722_v8  ;;  %8918 = vmatprep.subr.bf16.mxu1 %v10724_v12  ;;  %v5687_v5 = vld [vmem:[#allocation13 + $0x250] sm:$0xff]  ;;  %v5680_v8 = vld [vmem:[#allocation13 + $0x218] sm:$0xff] }
 0x99c   :  { %v5688_v12 = vld [vmem:[#allocation13 + $0x258] sm:$0xff]  ;;  %v10326_v16 = vcombine.high %v5679_v4, %v5687_v5 }
 0x99d   :  { %v10328_v18 = vcombine.high %v5680_v8, %v5688_v12  ;;  %v10327_v23 = vcombine.low %v5680_v8, %v5688_v12  ;;  %v5799_v8 = vld [vmem:[#allocation13 + $0x5d0] sm:$0xff]  ;;  %v5792_v12 = vld [vmem:[#allocation13 + $0x598] sm:$0xff] }
 0x99e   :  { %8837 = vmatpush1.bf16.msra.mxu0 %v10721_v11  ;;  %8919 = vmatpush1.bf16.msra.mxu1 %v10723_v20  ;;  %v5695_v11 = vld [vmem:[#allocation13 + $0x290] sm:$0xff] }
 0x99f   :  { %8838 = vmatprep.subr.bf16.mxu0 %v10738_v21  ;;  %8920 = vmatprep.subr.bf16.mxu1 %v10740_v22  ;;  %v5703_v20 = vld [vmem:[#allocation13 + $0x2d0] sm:$0xff]  ;;  %v5704_v21 = vld [vmem:[#allocation13 + $0x2d8] sm:$0xff]  ;;  %v10325_v22 = vcombine.low %v5679_v4, %v5687_v5 }
 0x9a0   :  { %v10342_v27 = vcombine.high %v5695_v11, %v5703_v20  ;;  %v10344_v28 = vcombine.high %v5696_v14, %v5704_v21  ;;  %v5791_v5 = vld [vmem:[#allocation13 + $0x590] sm:$0xff] }
 0x9a2   :  { %8839 = vmatpush1.bf16.msra.mxu0 %v10737_v29  ;;  %8921 = vmatpush1.bf16.msra.mxu1 %v10739_v17  ;;  %v5719_v29 = vld [vmem:[#allocation13 + $0x350] sm:$0xff]  ;;  %v5712_v17 = vld [vmem:[#allocation13 + $0x318] sm:$0xff] }
 0x9a3   :  { %8840 = vmatprep.subr.bf16.mxu0 %v10754_v32  ;;  %8922 = vmatprep.subr.bf16.mxu1 %v10756_v33  ;;  %v10341_v32 = vcombine.low %v5695_v11, %v5703_v20  ;;  %v10343_v33 = vcombine.low %v5696_v14, %v5704_v21  ;;  %v10358_v25 = vcombine.high %v5711_v19, %v5719_v29  ;;  %v5807_v20 = vld [vmem:[#allocation13 + $0x610] sm:$0xff]  ;;  %v5808_v21 = vld [vmem:[#allocation13 + $0x618] sm:$0xff] }
 0x9a4   :  { %v10360_v60 = vcombine.high %v5712_v17, %v5720_v30  ;;  %v10357_v38 = vcombine.low %v5711_v19, %v5719_v29  ;;  %v5815_v14 = vld [vmem:[#allocation13 + $0x650] sm:$0xff] }
 0x9a5   :  { %v5823_v29 = vld [vmem:[#allocation13 + $0x690] sm:$0xff] }
 0x9a6   :  { %8841 = vmatpush1.bf16.msra.mxu0 %v10753_v36  ;;  %8923 = vmatpush1.bf16.msra.mxu1 %v10755_v37  ;;  %v5728_v36 = vld [vmem:[#allocation13 + $0x398] sm:$0xff] }
 0x9a7   :  { %8933 = vmatprep.subr.bf16.mxu0 %v10262_v39  ;;  %9015 = vmatprep.subr.bf16.mxu1 %v10264_v40  ;;  %v5736_v37 = vld [vmem:[#allocation13 + $0x3d8] sm:$0xff]  ;;  %v10359_v39 = vcombine.low %v5712_v17, %v5720_v30  ;;  %v10374_v40 = vcombine.high %v5727_v34, %v5735_v35  ;;  %v5831_v17 = vld [vmem:[#allocation13 + $0x6d0] sm:$0xff] }
 0x9a8   :  { %v10376_v41 = vcombine.high %v5728_v36, %v5736_v37  ;;  %v5824_v30 = vld [vmem:[#allocation13 + $0x698] sm:$0xff] }
 0x9a9   :  { %8843 = vmatmul.mubr.bf16.vlgmr.msra.gmra.mrb[12].mxu0 %v12941_v45  ;;  %8925 = vmatmul.mubr.bf16.vlgmr.msra.gmra.mrb[24].mxu1 %v12941_v45 }
 0x9aa   :  { %8934 = vmatpush1.bf16.msra.mxu0 %v10261_v44  ;;  %8965 = vmatprep.mubr.bf16.mxu0 %v12926_v24  ;;  %v5752_v44 = vld [vmem:[#allocation13 + $0x458] sm:$0xff] }
 0x9ab   :  { %9016 = vmatpush1.bf16.msra.mxu1 %v10263_v46  ;;  %9047 = vmatprep.mubr.bf16.mxu1 %v12926_v24  ;;  %v10373_v46 = vcombine.low %v5727_v34, %v5735_v35  ;;  %v10392_v49 = vcombine.high %v5744_v43, %v5752_v44  ;;  %v5839_v35 = vld [vmem:[#allocation13 + $0x710] sm:$0xff] }
 0x9ac   :  { %8935 = vmatprep.subr.bf16.mxu0 %v10278_v47  ;;  %9017 = vmatprep.subr.bf16.mxu1 %v10280_v48  ;;  %v10375_v47 = vcombine.low %v5728_v36, %v5736_v37  ;;  %v10390_v48 = vcombine.high %v5743_v42, %v5751_v1  ;;  %v5847_v36 = vld [vmem:[#allocation13 + $0x750] sm:$0xff]  ;;  %v5840_v37 = vld [vmem:[#allocation13 + $0x718] sm:$0xff] }
 0x9ae   :  { %8936 = vmatpush1.bf16.msra.mxu0 %v10277_v53  ;;  %v5768_v53 = vld [vmem:[#allocation13 + $0x4d8] sm:$0xff] }
 0x9af   :  { %9018 = vmatpush1.bf16.msra.mxu1 %v10279_v54  ;;  %8937 = vmatprep.subr.bf16.mxu0 %v10294_v55  ;;  %v10389_v54 = vcombine.low %v5743_v42, %v5751_v1  ;;  %v10391_v55 = vcombine.low %v5744_v43, %v5752_v44  ;;  %v10408_v58 = vcombine.high %v5760_v52, %v5768_v53  ;;  %v5855_v1 = vld [vmem:[#allocation13 + $0x790] sm:$0xff]  ;;  %v5856_v44 = vld [vmem:[#allocation13 + $0x798] sm:$0xff] }
 0x9b0   :  { %9019 = vmatprep.subr.bf16.mxu1 %v10296_v57  ;;  %v10406_v57 = vcombine.high %v5759_v50, %v5767_v51  ;;  %v5863_v43 = vld [vmem:[#allocation13 + $0x7d0] sm:$0xff] }
 0x9b2   :  { %8938 = vmatpush1.bf16.msra.mxu0 %v10293_v63  ;;  %v5784_v63 = vld [vmem:[#allocation13 + $0x558] sm:$0xff] }
 0x9b3   :  { %9020 = vmatpush1.bf16.msra.mxu1 %v10295_v0  ;;  %8939 = vmatprep.subr.bf16.mxu0 %v10310_v2  ;;  %v10405_v0 = vcombine.low %v5759_v50, %v5767_v51  ;;  %v10407_v2 = vcombine.low %v5760_v52, %v5768_v53  ;;  %v10424_v4 = vcombine.high %v5776_v62, %v5784_v63  ;;  %v5871_v51 = vld [vmem:[#allocation13 + $0x810] sm:$0xff]  ;;  %v5872_v53 = vld [vmem:[#allocation13 + $0x818] sm:$0xff] }
 0x9b4   :  { %9021 = vmatprep.subr.bf16.mxu1 %v10312_v3  ;;  %v10422_v3 = vcombine.high %v5775_v59, %v5783_v61  ;;  %v5879_v52 = vld [vmem:[#allocation13 + $0x850] sm:$0xff] }
 0x9b6   :  { %8940 = vmatpush1.bf16.msra.mxu0 %v10309_v13  ;;  %v5800_v13 = vld [vmem:[#allocation13 + $0x5d8] sm:$0xff] }
 0x9b7   :  { %9022 = vmatpush1.bf16.msra.mxu1 %v10311_v15  ;;  %8941 = vmatprep.subr.bf16.mxu0 %v10326_v16  ;;  %v10421_v15 = vcombine.low %v5775_v59, %v5783_v61  ;;  %v10423_v16 = vcombine.low %v5776_v62, %v5784_v63  ;;  %v10440_v11 = vcombine.high %v5792_v12, %v5800_v13  ;;  %v5887_v61 = vld [vmem:[#allocation13 + $0x890] sm:$0xff] }
 0x9b8   :  { %9023 = vmatprep.subr.bf16.mxu1 %v10328_v18  ;;  %v10438_v18 = vcombine.high %v5791_v5, %v5799_v8  ;;  %v5895_v62 = vld [vmem:[#allocation13 + $0x8d0] sm:$0xff]  ;;  %v10517_v63 = vcombine.low %v5871_v51, %v5879_v52 }
 0x9ba   :  { %8942 = vmatpush1.bf16.msra.mxu0 %v10325_v22  ;;  %v5816_v22 = vld [vmem:[#allocation13 + $0x658] sm:$0xff] }
 0x9bb   :  { %9024 = vmatpush1.bf16.msra.mxu1 %v10327_v23  ;;  %8943 = vmatprep.subr.bf16.mxu0 %v10342_v27  ;;  %v10437_v23 = vcombine.low %v5791_v5, %v5799_v8  ;;  %v10439_v27 = vcombine.low %v5792_v12, %v5800_v13  ;;  %v10456_v19 = vcombine.high %v5808_v21, %v5816_v22  ;;  %v5903_v5 = vld [vmem:[#allocation13 + $0x910] sm:$0xff]  ;;  %v5904_v13 = vld [vmem:[#allocation13 + $0x918] sm:$0xff] }
 0x9bc   :  { %9025 = vmatprep.subr.bf16.mxu1 %v10344_v28  ;;  %v10454_v28 = vcombine.high %v5807_v20, %v5815_v14  ;;  %v5911_v8 = vld [vmem:[#allocation13 + $0x950] sm:$0xff] }
 0x9be   :  { %8944 = vmatpush1.bf16.msra.mxu0 %v10341_v32  ;;  %v5832_v32 = vld [vmem:[#allocation13 + $0x6d8] sm:$0xff] }
 0x9bf   :  { %9026 = vmatpush1.bf16.msra.mxu1 %v10343_v33  ;;  %8945 = vmatprep.subr.bf16.mxu0 %v10358_v25  ;;  %v10453_v33 = vcombine.low %v5807_v20, %v5815_v14  ;;  %v10455_v25 = vcombine.low %v5808_v21, %v5816_v22  ;;  %v10472_v34 = vcombine.high %v5824_v30, %v5832_v32  ;;  %v5919_v14 = vld [vmem:[#allocation13 + $0x990] sm:$0xff]  ;;  %v5920_v22 = vld [vmem:[#allocation13 + $0x998] sm:$0xff] }
 0x9c0   :  { %9027 = vmatprep.subr.bf16.mxu1 %v10360_v60  ;;  %v10470_v60 = vcombine.high %v5823_v29, %v5831_v17  ;;  %v5927_v21 = vld [vmem:[#allocation13 + $0x9d0] sm:$0xff] }
 0x9c2   :  { %8946 = vmatpush1.bf16.msra.mxu0 %v10357_v38  ;;  %v5848_v38 = vld [vmem:[#allocation13 + $0x758] sm:$0xff] }
 0x9c3   :  { %9028 = vmatpush1.bf16.msra.mxu1 %v10359_v39  ;;  %8947 = vmatprep.subr.bf16.mxu0 %v10374_v40  ;;  %v10469_v39 = vcombine.low %v5823_v29, %v5831_v17  ;;  %v10471_v40 = vcombine.low %v5824_v30, %v5832_v32  ;;  %v10488_v42 = vcombine.high %v5840_v37, %v5848_v38  ;;  %v5935_v17 = vld [vmem:[#allocation13 + $0xa10] sm:$0xff]  ;;  %v5936_v32 = vld [vmem:[#allocation13 + $0xa18] sm:$0xff] }
 0x9c4   :  { %9029 = vmatprep.subr.bf16.mxu1 %v10376_v41  ;;  %v10486_v41 = vcombine.high %v5839_v35, %v5847_v36  ;;  %v5943_v30 = vld [vmem:[#allocation13 + $0xa50] sm:$0xff] }
 0x9c6   :  { %8948 = vmatpush1.bf16.msra.mxu0 %v10373_v46  ;;  %v5864_v46 = vld [vmem:[#allocation13 + $0x7d8] sm:$0xff] }
 0x9c7   :  { %9030 = vmatpush1.bf16.msra.mxu1 %v10375_v47  ;;  %8949 = vmatprep.subr.bf16.mxu0 %v10390_v48  ;;  %v10485_v47 = vcombine.low %v5839_v35, %v5847_v36  ;;  %v10487_v48 = vcombine.low %v5840_v37, %v5848_v38  ;;  %v10504_v50 = vcombine.high %v5856_v44, %v5864_v46  ;;  %v5951_v36 = vld [vmem:[#allocation13 + $0xa90] sm:$0xff]  ;;  %v5952_v38 = vld [vmem:[#allocation13 + $0xa98] sm:$0xff] }
 0x9c8   :  { %9031 = vmatprep.subr.bf16.mxu1 %v10392_v49  ;;  %v10502_v49 = vcombine.high %v5855_v1, %v5863_v43  ;;  %v5959_v37 = vld [vmem:[#allocation13 + $0xad0] sm:$0xff] }
 0x9ca   :  { %8950 = vmatpush1.bf16.msra.mxu0 %v10389_v54  ;;  %v5880_v54 = vld [vmem:[#allocation13 + $0x858] sm:$0xff] }
 0x9cb   :  { %9032 = vmatpush1.bf16.msra.mxu1 %v10391_v55  ;;  %8951 = vmatprep.subr.bf16.mxu0 %v10406_v57  ;;  %v10501_v55 = vcombine.low %v5855_v1, %v5863_v43  ;;  %v10503_v57 = vcombine.low %v5856_v44, %v5864_v46  ;;  %v10520_v59 = vcombine.high %v5872_v53, %v5880_v54  ;;  %v5967_v43 = vld [vmem:[#allocation13 + $0xb10] sm:$0xff]  ;;  %v5968_v46 = vld [vmem:[#allocation13 + $0xb18] sm:$0xff] }
 0x9cc   :  { %9033 = vmatprep.subr.bf16.mxu1 %v10408_v58  ;;  %v10518_v58 = vcombine.high %v5871_v51, %v5879_v52  ;;  %v5975_v44 = vld [vmem:[#allocation13 + $0xb50] sm:$0xff] }
 0x9cd   :  { %v5983_v52 = vld [vmem:[#allocation13 + $0xb90] sm:$0xff] }
 0x9ce   :  { %8952 = vmatpush1.bf16.msra.mxu0 %v10405_v0  ;;  %v5888_v0 = vld [vmem:[#allocation13 + $0x898] sm:$0xff] }
 0x9cf   :  { %9034 = vmatpush1.bf16.msra.mxu1 %v10407_v2  ;;  %8953 = vmatprep.subr.bf16.mxu0 %v10422_v3  ;;  %v5896_v2 = vld [vmem:[#allocation13 + $0x8d8] sm:$0xff]  ;;  %v10519_v3 = vcombine.low %v5872_v53, %v5880_v54  ;;  %v5991_v53 = vld [vmem:[#allocation13 + $0xbd0] sm:$0xff] }
 0x9d0   :  { %9035 = vmatprep.subr.bf16.mxu1 %v10424_v4  ;;  %v10534_v4 = vcombine.high %v5887_v61, %v5895_v62  ;;  %v10536_v12 = vcombine.high %v5888_v0, %v5896_v2  ;;  %v5984_v54 = vld [vmem:[#allocation13 + $0xb98] sm:$0xff] }
 0x9d2   :  { %8954 = vmatpush1.bf16.msra.mxu0 %v10421_v15  ;;  %v5912_v15 = vld [vmem:[#allocation13 + $0x958] sm:$0xff] }
 0x9d3   :  { %9036 = vmatpush1.bf16.msra.mxu1 %v10423_v16  ;;  %8955 = vmatprep.subr.bf16.mxu0 %v10438_v18  ;;  %v10533_v16 = vcombine.low %v5887_v61, %v5895_v62  ;;  %v10535_v18 = vcombine.low %v5888_v0, %v5896_v2  ;;  %v10552_v20 = vcombine.high %v5904_v13, %v5912_v15  ;;  %v5999_v62 = vld [vmem:[#allocation13 + $0xc10] sm:$0xff]  ;;  %v6000_v0 = vld [vmem:[#allocation13 + $0xc18] sm:$0xff] }
 0x9d4   :  { %9037 = vmatprep.subr.bf16.mxu1 %v10440_v11  ;;  %v10550_v11 = vcombine.high %v5903_v5, %v5911_v8  ;;  %v6008_v2 = vld [vmem:[#allocation13 + $0xc58] sm:$0xff] }
 0x9d6   :  { %8956 = vmatpush1.bf16.msra.mxu0 %v10437_v23  ;;  %v5928_v23 = vld [vmem:[#allocation13 + $0x9d8] sm:$0xff] }
 0x9d7   :  { %9038 = vmatpush1.bf16.msra.mxu1 %v10439_v27  ;;  %8957 = vmatprep.subr.bf16.mxu0 %v10454_v28  ;;  %v10549_v27 = vcombine.low %v5903_v5, %v5911_v8  ;;  %v10551_v28 = vcombine.low %v5904_v13, %v5912_v15  ;;  %v10568_v29 = vcombine.high %v5920_v22, %v5928_v23  ;;  %v6023_v13 = vld [vmem:[#allocation13 + $0xcd0] sm:$0xff]  ;;  %v6016_v15 = vld [vmem:[#allocation13 + $0xc98] sm:$0xff] }
 0x9d8   :  { %9039 = vmatprep.subr.bf16.mxu1 %v10456_v19  ;;  %v10566_v19 = vcombine.high %v5919_v14, %v5927_v21  ;;  %v10648_v8 = vcombine.high %v6000_v0, %v6008_v2 }
 0x9da   :  { %8958 = vmatpush1.bf16.msra.mxu0 %v10453_v33  ;;  %v5944_v33 = vld [vmem:[#allocation13 + $0xa58] sm:$0xff] }
 0x9db   :  { %9040 = vmatpush1.bf16.msra.mxu1 %v10455_v25  ;;  %8959 = vmatprep.subr.bf16.mxu0 %v10470_v60  ;;  %v10565_v25 = vcombine.low %v5919_v14, %v5927_v21  ;;  %v10567_v60 = vcombine.low %v5920_v22, %v5928_v23  ;;  %v10584_v35 = vcombine.high %v5936_v32, %v5944_v33  ;;  %v6031_v21 = vld [vmem:[#allocation13 + $0xd10] sm:$0xff]  ;;  %v6032_v23 = vld [vmem:[#allocation13 + $0xd18] sm:$0xff] }
 0x9dc   :  { %9041 = vmatprep.subr.bf16.mxu1 %v10472_v34  ;;  %v10582_v34 = vcombine.high %v5935_v17, %v5943_v30  ;;  %v6039_v22 = vld [vmem:[#allocation13 + $0xd50] sm:$0xff] }
 0x9de   :  { %8960 = vmatpush1.bf16.msra.mxu0 %v10469_v39  ;;  %v5960_v39 = vld [vmem:[#allocation13 + $0xad8] sm:$0xff] }
 0x9df   :  { %9042 = vmatpush1.bf16.msra.mxu1 %v10471_v40  ;;  %8961 = vmatprep.subr.bf16.mxu0 %v10486_v41  ;;  %v10581_v40 = vcombine.low %v5935_v17, %v5943_v30  ;;  %v10583_v41 = vcombine.low %v5936_v32, %v5944_v33  ;;  %v10600_v1 = vcombine.high %v5952_v38, %v5960_v39  ;;  %v6047_v30 = vld [vmem:[#allocation13 + $0xd90] sm:$0xff]  ;;  %v6048_v33 = vld [vmem:[#allocation13 + $0xd98] sm:$0xff] }
 0x9e0   :  { %9043 = vmatprep.subr.bf16.mxu1 %v10488_v42  ;;  %v10598_v42 = vcombine.high %v5951_v36, %v5959_v37  ;;  %v6055_v32 = vld [vmem:[#allocation13 + $0xdd0] sm:$0xff] }
 0x9e2   :  { %8962 = vmatpush1.bf16.msra.mxu0 %v10485_v47  ;;  %v5976_v47 = vld [vmem:[#allocation13 + $0xb58] sm:$0xff] }
 0x9e3   :  { %9044 = vmatpush1.bf16.msra.mxu1 %v10487_v48  ;;  %8963 = vmatprep.subr.bf16.mxu0 %v10502_v49  ;;  %v10597_v48 = vcombine.low %v5951_v36, %v5959_v37  ;;  %v10599_v49 = vcombine.low %v5952_v38, %v5960_v39  ;;  %v10616_v51 = vcombine.high %v5968_v46, %v5976_v47  ;;  %v6063_v37 = vld [vmem:[#allocation13 + $0xe10] sm:$0xff]  ;;  %v6064_v39 = vld [vmem:[#allocation13 + $0xe18] sm:$0xff] }
 0x9e4   :  { %9045 = vmatprep.subr.bf16.mxu1 %v10504_v50  ;;  %v10614_v50 = vcombine.high %v5967_v43, %v5975_v44  ;;  %v6071_v38 = vld [vmem:[#allocation13 + $0xe50] sm:$0xff] }
 0x9e6   :  { %8964 = vmatpush1.bf16.msra.mxu0 %v10501_v55  ;;  %v5992_v55 = vld [vmem:[#allocation13 + $0xbd8] sm:$0xff] }
 0x9e7   :  { %9046 = vmatpush1.bf16.msra.mxu1 %v10503_v57  ;;  %8974 = vmatprep.subr.bf16.mxu0 %v10518_v58  ;;  %v10613_v57 = vcombine.low %v5967_v43, %v5975_v44  ;;  %v10615_v58 = vcombine.low %v5968_v46, %v5976_v47  ;;  %v10632_v61 = vcombine.high %v5984_v54, %v5992_v55  ;;  %v6079_v44 = vld [vmem:[#allocation13 + $0xe90] sm:$0xff]  ;;  %v6080_v47 = vld [vmem:[#allocation13 + $0xe98] sm:$0xff] }
 0x9e8   :  { %9056 = vmatprep.subr.bf16.mxu1 %v10520_v59  ;;  %v10630_v59 = vcombine.high %v5983_v52, %v5991_v53  ;;  %v6087_v46 = vld [vmem:[#allocation13 + $0xed0] sm:$0xff] }
 0x9e9   :  { %8966 = vmatmul.mubr.bf16.vlgmr.msra.gmra.mrb[16].mxu0 %v12928_v26 }
 0x9ea   :  { %9048 = vmatmul.mubr.bf16.vlgmr.msra.gmra.mrb[28].mxu1 %v12928_v26  ;;  %8975 = vmatpush1.bf16.msra.mxu0 %v10517_v63  ;;  %v6007_v63 = vld [vmem:[#allocation13 + $0xc50] sm:$0xff] }
 0x9eb   :  { %9006 = vmatprep.mubr.bf16.mxu0 %v12932_v31  ;;  %9057 = vmatpush1.bf16.msra.mxu1 %v10519_v3  ;;  %v10629_v3 = vcombine.low %v5983_v52, %v5991_v53  ;;  %v10646_v5 = vcombine.high %v5999_v62, %v6007_v63  ;;  %v6095_v53 = vld [vmem:[#allocation13 + $0xf10] sm:$0xff] }
 0x9ec   :  { %9088 = vmatprep.mubr.bf16.mxu1 %v12932_v31  ;;  %8976 = vmatprep.subr.bf16.mxu0 %v10534_v4  ;;  %v10631_v4 = vcombine.low %v5984_v54, %v5992_v55  ;;  %v6103_v54 = vld [vmem:[#allocation13 + $0xf50] sm:$0xff]  ;;  %v6096_v55 = vld [vmem:[#allocation13 + $0xf18] sm:$0xff] }
 0x9ed   :  { %9058 = vmatprep.subr.bf16.mxu1 %v10536_v12  ;;  %v6015_v12 = vld [vmem:[#allocation13 + $0xc90] sm:$0xff] }
 0x9ee   :  { %8977 = vmatpush1.bf16.msra.mxu0 %v10533_v16  ;;  %v6024_v16 = vld [vmem:[#allocation13 + $0xcd8] sm:$0xff] }
 0x9ef   :  { %9059 = vmatpush1.bf16.msra.mxu1 %v10535_v18  ;;  %8978 = vmatprep.subr.bf16.mxu0 %v10550_v11  ;;  %v10645_v18 = vcombine.low %v5999_v62, %v6007_v63  ;;  %v10647_v11 = vcombine.low %v6000_v0, %v6008_v2  ;;  %v10664_v14 = vcombine.high %v6016_v15, %v6024_v16  ;;  %v6111_v63 = vld [vmem:[#allocation13 + $0xf90] sm:$0xff]  ;;  %v6112_v2 = vld [vmem:[#allocation13 + $0xf98] sm:$0xff] }
 0x9f0   :  { %9060 = vmatprep.subr.bf16.mxu1 %v10552_v20  ;;  %v10662_v20 = vcombine.high %v6015_v12, %v6023_v13  ;;  %v6119_v0 = vld [vmem:[#allocation13 + $0xfd0] sm:$0xff] }
 0x9f2   :  { %8979 = vmatpush1.bf16.msra.mxu0 %v10549_v27  ;;  %v6040_v27 = vld [vmem:[#allocation13 + $0xd58] sm:$0xff] }
 0x9f3   :  { %9061 = vmatpush1.bf16.msra.mxu1 %v10551_v28  ;;  %8980 = vmatprep.subr.bf16.mxu0 %v10566_v19  ;;  %v10661_v28 = vcombine.low %v6015_v12, %v6023_v13  ;;  %v10663_v19 = vcombine.low %v6016_v15, %v6024_v16  ;;  %v10680_v17 = vcombine.high %v6032_v23, %v6040_v27  ;;  %v5617_v13 = vld [vmem:[#allocation13 + $0x20] sm:$0xff]  ;;  %v5618_v16 = vld [vmem:[#allocation13 + $0x28] sm:$0xff] }
 0x9f4   :  { %9062 = vmatprep.subr.bf16.mxu1 %v10568_v29  ;;  %v10678_v29 = vcombine.high %v6031_v21, %v6039_v22  ;;  %v5625_v15 = vld [vmem:[#allocation13 + $0x60] sm:$0xff] }
 0x9f6   :  { %8981 = vmatpush1.bf16.msra.mxu0 %v10565_v25  ;;  %v6056_v25 = vld [vmem:[#allocation13 + $0xdd8] sm:$0xff] }
 0x9f7   :  { %9063 = vmatpush1.bf16.msra.mxu1 %v10567_v60  ;;  %8982 = vmatprep.subr.bf16.mxu0 %v10582_v34  ;;  %v10677_v60 = vcombine.low %v6031_v21, %v6039_v22  ;;  %v10679_v34 = vcombine.low %v6032_v23, %v6040_v27  ;;  %v10696_v36 = vcombine.high %v6048_v33, %v6056_v25  ;;  %v5633_v22 = vld [vmem:[#allocation13 + $0xa0] sm:$0xff] }
 0x9f8   :  { %9064 = vmatprep.subr.bf16.mxu1 %v10584_v35  ;;  %v10694_v35 = vcombine.high %v6047_v30, %v6055_v32  ;;  %v5641_v23 = vld [vmem:[#allocation13 + $0xe0] sm:$0xff]  ;;  %v10265_v27 = vcombine.low %v5617_v13, %v5625_v15 }
 0x9fa   :  { %8983 = vmatpush1.bf16.msra.mxu0 %v10581_v40  ;;  %v6072_v40 = vld [vmem:[#allocation13 + $0xe58] sm:$0xff] }
 0x9fb   :  { %9065 = vmatpush1.bf16.msra.mxu1 %v10583_v41  ;;  %8984 = vmatprep.subr.bf16.mxu0 %v10598_v42  ;;  %v10693_v41 = vcombine.low %v6047_v30, %v6055_v32  ;;  %v10695_v42 = vcombine.low %v6048_v33, %v6056_v25  ;;  %v10712_v43 = vcombine.high %v6064_v39, %v6072_v40  ;;  %v5649_v30 = vld [vmem:[#allocation13 + $0x120] sm:$0xff]  ;;  %v5650_v25 = vld [vmem:[#allocation13 + $0x128] sm:$0xff] }
 0x9fc   :  { %9066 = vmatprep.subr.bf16.mxu1 %v10600_v1  ;;  %v10710_v1 = vcombine.high %v6063_v37, %v6071_v38  ;;  %v5657_v32 = vld [vmem:[#allocation13 + $0x160] sm:$0xff] }
 0x9fe   :  { %8985 = vmatpush1.bf16.msra.mxu0 %v10597_v48  ;;  %v6088_v48 = vld [vmem:[#allocation13 + $0xed8] sm:$0xff] }
 0x9ff   :  { %9067 = vmatpush1.bf16.msra.mxu1 %v10599_v49  ;;  %8986 = vmatprep.subr.bf16.mxu0 %v10614_v50  ;;  %v10709_v49 = vcombine.low %v6063_v37, %v6071_v38  ;;  %v10711_v50 = vcombine.low %v6064_v39, %v6072_v40  ;;  %v10728_v52 = vcombine.high %v6080_v47, %v6088_v48  ;;  %v5665_v38 = vld [vmem:[#allocation13 + $0x1a0] sm:$0xff]  ;;  %v5666_v40 = vld [vmem:[#allocation13 + $0x1a8] sm:$0xff] }
 0xa00   :  { %9068 = vmatprep.subr.bf16.mxu1 %v10616_v51  ;;  %v10726_v51 = vcombine.high %v6079_v44, %v6087_v46  ;;  %v5673_v39 = vld [vmem:[#allocation13 + $0x1e0] sm:$0xff] }
 0xa02   :  { %8987 = vmatpush1.bf16.msra.mxu0 %v10613_v57  ;;  %v6104_v57 = vld [vmem:[#allocation13 + $0xf58] sm:$0xff] }
 0xa03   :  { %9069 = vmatpush1.bf16.msra.mxu1 %v10615_v58  ;;  %8988 = vmatprep.subr.bf16.mxu0 %v10630_v59  ;;  %v10725_v58 = vcombine.low %v6079_v44, %v6087_v46  ;;  %v10727_v59 = vcombine.low %v6080_v47, %v6088_v48  ;;  %v10744_v62 = vcombine.high %v6096_v55, %v6104_v57  ;;  %v5681_v46 = vld [vmem:[#allocation13 + $0x220] sm:$0xff]  ;;  %v5682_v48 = vld [vmem:[#allocation13 + $0x228] sm:$0xff] }
 0xa04   :  { %9070 = vmatprep.subr.bf16.mxu1 %v10632_v61  ;;  %v10742_v61 = vcombine.high %v6095_v53, %v6103_v54  ;;  %v5689_v47 = vld [vmem:[#allocation13 + $0x260] sm:$0xff] }
 0xa06   :  { %8989 = vmatpush1.bf16.msra.mxu0 %v10629_v3  ;;  %v6120_v3 = vld [vmem:[#allocation13 + $0xfd8] sm:$0xff] }
 0xa07   :  { %9071 = vmatpush1.bf16.msra.mxu1 %v10631_v4  ;;  %8990 = vmatprep.subr.bf16.mxu0 %v10646_v5  ;;  %v10741_v4 = vcombine.low %v6095_v53, %v6103_v54  ;;  %v10743_v5 = vcombine.low %v6096_v55, %v6104_v57  ;;  %v10760_v12 = vcombine.high %v6112_v2, %v6120_v3  ;;  %v5697_v54 = vld [vmem:[#allocation13 + $0x2a0] sm:$0xff]  ;;  %v5698_v57 = vld [vmem:[#allocation13 + $0x2a8] sm:$0xff] }
 0xa08   :  { %9072 = vmatprep.subr.bf16.mxu1 %v10648_v8  ;;  %v10758_v8 = vcombine.high %v6111_v63, %v6119_v0  ;;  %v5705_v55 = vld [vmem:[#allocation13 + $0x2e0] sm:$0xff] }
 0xa0a   :  { %8991 = vmatpush1.bf16.msra.mxu0 %v10645_v18  ;;  %v5626_v18 = vld [vmem:[#allocation13 + $0x68] sm:$0xff] }
 0xa0b   :  { %9073 = vmatpush1.bf16.msra.mxu1 %v10647_v11  ;;  %8992 = vmatprep.subr.bf16.mxu0 %v10662_v20  ;;  %v10757_v11 = vcombine.low %v6111_v63, %v6119_v0  ;;  %v10759_v20 = vcombine.low %v6112_v2, %v6120_v3  ;;  %v10268_v21 = vcombine.high %v5618_v16, %v5626_v18  ;;  %v5713_v0 = vld [vmem:[#allocation13 + $0x320] sm:$0xff]  ;;  %v5714_v3 = vld [vmem:[#allocation13 + $0x328] sm:$0xff] }
 0xa0c   :  { %9074 = vmatprep.subr.bf16.mxu1 %v10664_v14  ;;  %v10266_v14 = vcombine.high %v5617_v13, %v5625_v15  ;;  %v5721_v2 = vld [vmem:[#allocation13 + $0x360] sm:$0xff] }
 0xa0d   :  { %v5729_v15 = vld [vmem:[#allocation13 + $0x3a0] sm:$0xff] }
 0xa0e   :  { %8993 = vmatpush1.bf16.msra.mxu0 %v10661_v28  ;;  %v5634_v28 = vld [vmem:[#allocation13 + $0xa8] sm:$0xff] }
 0xa0f   :  { %9075 = vmatpush1.bf16.msra.mxu1 %v10663_v19  ;;  %8994 = vmatprep.subr.bf16.mxu0 %v10678_v29  ;;  %v5642_v19 = vld [vmem:[#allocation13 + $0xe8] sm:$0xff]  ;;  %v10267_v29 = vcombine.low %v5618_v16, %v5626_v18  ;;  %v5737_v16 = vld [vmem:[#allocation13 + $0x3e0] sm:$0xff] }
 0xa10   :  { %9076 = vmatprep.subr.bf16.mxu1 %v10680_v17  ;;  %v10282_v17 = vcombine.high %v5633_v22, %v5641_v23  ;;  %v10284_v33 = vcombine.high %v5634_v28, %v5642_v19  ;;  %v5730_v18 = vld [vmem:[#allocation13 + $0x3a8] sm:$0xff] }
 0xa12   :  { %8995 = vmatpush1.bf16.msra.mxu0 %v10677_v60  ;;  %v5658_v60 = vld [vmem:[#allocation13 + $0x168] sm:$0xff] }
 0xa13   :  { %9077 = vmatpush1.bf16.msra.mxu1 %v10679_v34  ;;  %8996 = vmatprep.subr.bf16.mxu0 %v10694_v35  ;;  %v10281_v34 = vcombine.low %v5633_v22, %v5641_v23  ;;  %v10283_v35 = vcombine.low %v5634_v28, %v5642_v19  ;;  %v10300_v37 = vcombine.high %v5650_v25, %v5658_v60  ;;  %v5745_v23 = vld [vmem:[#allocation13 + $0x420] sm:$0xff]  ;;  %v5746_v28 = vld [vmem:[#allocation13 + $0x428] sm:$0xff] }
 0xa14   :  { %9078 = vmatprep.subr.bf16.mxu1 %v10696_v36  ;;  %v10298_v36 = vcombine.high %v5649_v30, %v5657_v32  ;;  %v5754_v19 = vld [vmem:[#allocation13 + $0x468] sm:$0xff] }
 0xa16   :  { %8997 = vmatpush1.bf16.msra.mxu0 %v10693_v41  ;;  %v5674_v41 = vld [vmem:[#allocation13 + $0x1e8] sm:$0xff] }
 0xa17   :  { %9079 = vmatpush1.bf16.msra.mxu1 %v10695_v42  ;;  %8998 = vmatprep.subr.bf16.mxu0 %v10710_v1  ;;  %v10297_v42 = vcombine.low %v5649_v30, %v5657_v32  ;;  %v10299_v1 = vcombine.low %v5650_v25, %v5658_v60  ;;  %v10316_v44 = vcombine.high %v5666_v40, %v5674_v41  ;;  %v5769_v25 = vld [vmem:[#allocation13 + $0x4e0] sm:$0xff]  ;;  %v5762_v60 = vld [vmem:[#allocation13 + $0x4a8] sm:$0xff] }
 0xa18   :  { %9080 = vmatprep.subr.bf16.mxu1 %v10712_v43  ;;  %v10314_v43 = vcombine.high %v5665_v38, %v5673_v39  ;;  %v10396_v32 = vcombine.high %v5746_v28, %v5754_v19 }
 0xa1a   :  { %8999 = vmatpush1.bf16.msra.mxu0 %v10709_v49  ;;  %v5690_v49 = vld [vmem:[#allocation13 + $0x268] sm:$0xff] }
 0xa1b   :  { %9081 = vmatpush1.bf16.msra.mxu1 %v10711_v50  ;;  %9000 = vmatprep.subr.bf16.mxu0 %v10726_v51  ;;  %v10313_v50 = vcombine.low %v5665_v38, %v5673_v39  ;;  %v10315_v51 = vcombine.low %v5666_v40, %v5674_v41  ;;  %v10332_v53 = vcombine.high %v5682_v48, %v5690_v49  ;;  %v5777_v39 = vld [vmem:[#allocation13 + $0x520] sm:$0xff]  ;;  %v5778_v41 = vld [vmem:[#allocation13 + $0x528] sm:$0xff] }
 0xa1c   :  { %9082 = vmatprep.subr.bf16.mxu1 %v10728_v52  ;;  %v10330_v52 = vcombine.high %v5681_v46, %v5689_v47  ;;  %v5785_v40 = vld [vmem:[#allocation13 + $0x560] sm:$0xff] }
 0xa1e   :  { %9001 = vmatpush1.bf16.msra.mxu0 %v10725_v58  ;;  %v5706_v58 = vld [vmem:[#allocation13 + $0x2e8] sm:$0xff] }
 0xa1f   :  { %9083 = vmatpush1.bf16.msra.mxu1 %v10727_v59  ;;  %9002 = vmatprep.subr.bf16.mxu0 %v10742_v61  ;;  %v10329_v59 = vcombine.low %v5681_v46, %v5689_v47  ;;  %v10331_v61 = vcombine.low %v5682_v48, %v5690_v49  ;;  %v10348_v63 = vcombine.high %v5698_v57, %v5706_v58  ;;  %v5793_v47 = vld [vmem:[#allocation13 + $0x5a0] sm:$0xff]  ;;  %v5794_v49 = vld [vmem:[#allocation13 + $0x5a8] sm:$0xff] }
 0xa20   :  { %9084 = vmatprep.subr.bf16.mxu1 %v10744_v62  ;;  %v10346_v62 = vcombine.high %v5697_v54, %v5705_v55  ;;  %v5801_v48 = vld [vmem:[#allocation13 + $0x5e0] sm:$0xff] }
 0xa22   :  { %9003 = vmatpush1.bf16.msra.mxu0 %v10741_v4  ;;  %v5722_v4 = vld [vmem:[#allocation13 + $0x368] sm:$0xff] }
 0xa23   :  { %9085 = vmatpush1.bf16.msra.mxu1 %v10743_v5  ;;  %9004 = vmatprep.subr.bf16.mxu0 %v10758_v8  ;;  %v10345_v5 = vcombine.low %v5697_v54, %v5705_v55  ;;  %v10347_v8 = vcombine.low %v5698_v57, %v5706_v58  ;;  %v10364_v13 = vcombine.high %v5714_v3, %v5722_v4  ;;  %v5809_v55 = vld [vmem:[#allocation13 + $0x620] sm:$0xff]  ;;  %v5810_v58 = vld [vmem:[#allocation13 + $0x628] sm:$0xff] }
 0xa24   :  { %9086 = vmatprep.subr.bf16.mxu1 %v10760_v12  ;;  %v10362_v12 = vcombine.high %v5713_v0, %v5721_v2  ;;  %v5817_v57 = vld [vmem:[#allocation13 + $0x660] sm:$0xff] }
 0xa26   :  { %9005 = vmatpush1.bf16.msra.mxu0 %v10757_v11  ;;  %v5738_v11 = vld [vmem:[#allocation13 + $0x3e8] sm:$0xff] }
 0xa27   :  { %9087 = vmatpush1.bf16.msra.mxu1 %v10759_v20  ;;  %9097 = vmatprep.subr.bf16.mxu0 %v10266_v14  ;;  %v10361_v20 = vcombine.low %v5713_v0, %v5721_v2  ;;  %v10363_v14 = vcombine.low %v5714_v3, %v5722_v4  ;;  %v10380_v22 = vcombine.high %v5730_v18, %v5738_v11  ;;  %v5825_v2 = vld [vmem:[#allocation13 + $0x6a0] sm:$0xff]  ;;  %v5826_v4 = vld [vmem:[#allocation13 + $0x6a8] sm:$0xff] }
 0xa28   :  { %9179 = vmatprep.subr.bf16.mxu1 %v10268_v21  ;;  %v10378_v21 = vcombine.high %v5729_v15, %v5737_v16  ;;  %v5833_v3 = vld [vmem:[#allocation13 + $0x6e0] sm:$0xff] }
 0xa29   :  { %9007 = vmatmul.mubr.bf16.vlgmr.msra.gmra.mrb[16].mxu0 %v12941_v45 }
 0xa2a   :  { %9089 = vmatmul.mubr.bf16.vlgmr.msra.gmra.mrb[28].mxu1 %v12941_v45  ;;  %9098 = vmatpush1.bf16.msra.mxu0 %v10265_v27  ;;  %v5753_v27 = vld [vmem:[#allocation13 + $0x460] sm:$0xff] }
 0xa2b   :  { %9129 = vmatprep.mubr.bf16.mxu0 %v12926_v24  ;;  %9180 = vmatpush1.bf16.msra.mxu1 %v10267_v29  ;;  %v10377_v29 = vcombine.low %v5729_v15, %v5737_v16  ;;  %v10394_v30 = vcombine.high %v5745_v23, %v5753_v27  ;;  %v5841_v16 = vld [vmem:[#allocation13 + $0x720] sm:$0xff] }
 0xa2c   :  { %9211 = vmatprep.mubr.bf16.mxu1 %v12926_v24  ;;  %9099 = vmatprep.subr.bf16.mxu0 %v10282_v17  ;;  %v10379_v17 = vcombine.low %v5730_v18, %v5738_v11  ;;  %v5849_v18 = vld [vmem:[#allocation13 + $0x760] sm:$0xff]  ;;  %v5842_v11 = vld [vmem:[#allocation13 + $0x728] sm:$0xff] }
 0xa2d   :  { %9181 = vmatprep.subr.bf16.mxu1 %v10284_v33  ;;  %v5761_v33 = vld [vmem:[#allocation13 + $0x4a0] sm:$0xff] }
 0xa2e   :  { %9100 = vmatpush1.bf16.msra.mxu0 %v10281_v34  ;;  %v5770_v34 = vld [vmem:[#allocation13 + $0x4e8] sm:$0xff] }
 0xa2f   :  { %9182 = vmatpush1.bf16.msra.mxu1 %v10283_v35  ;;  %9101 = vmatprep.subr.bf16.mxu0 %v10298_v36  ;;  %v10393_v35 = vcombine.low %v5745_v23, %v5753_v27  ;;  %v10395_v36 = vcombine.low %v5746_v28, %v5754_v19  ;;  %v10412_v38 = vcombine.high %v5762_v60, %v5770_v34  ;;  %v5857_v27 = vld [vmem:[#allocation13 + $0x7a0] sm:$0xff]  ;;  %v5858_v19 = vld [vmem:[#allocation13 + $0x7a8] sm:$0xff] }
 0xa30   :  { %9183 = vmatprep.subr.bf16.mxu1 %v10300_v37  ;;  %v10410_v37 = vcombine.high %v5761_v33, %v5769_v25  ;;  %v5865_v28 = vld [vmem:[#allocation13 + $0x7e0] sm:$0xff] }
 0xa32   :  { %9102 = vmatpush1.bf16.msra.mxu0 %v10297_v42  ;;  %v5786_v42 = vld [vmem:[#allocation13 + $0x568] sm:$0xff] }
 0xa33   :  { %9184 = vmatpush1.bf16.msra.mxu1 %v10299_v1  ;;  %9103 = vmatprep.subr.bf16.mxu0 %v10314_v43  ;;  %v10409_v1 = vcombine.low %v5761_v33, %v5769_v25  ;;  %v10411_v43 = vcombine.low %v5762_v60, %v5770_v34  ;;  %v10428_v46 = vcombine.high %v5778_v41, %v5786_v42  ;;  %v5873_v25 = vld [vmem:[#allocation13 + $0x820] sm:$0xff]  ;;  %v5874_v34 = vld [vmem:[#allocation13 + $0x828] sm:$0xff] }
 0xa34   :  { %9185 = vmatprep.subr.bf16.mxu1 %v10316_v44  ;;  %v10426_v44 = vcombine.high %v5777_v39, %v5785_v40  ;;  %v5881_v60 = vld [vmem:[#allocation13 + $0x860] sm:$0xff] }
 0xa36   :  { %9104 = vmatpush1.bf16.msra.mxu0 %v10313_v50  ;;  %v5802_v50 = vld [vmem:[#allocation13 + $0x5e8] sm:$0xff] }
 0xa37   :  { %9186 = vmatpush1.bf16.msra.mxu1 %v10315_v51  ;;  %9105 = vmatprep.subr.bf16.mxu0 %v10330_v52  ;;  %v10425_v51 = vcombine.low %v5777_v39, %v5785_v40  ;;  %v10427_v52 = vcombine.low %v5778_v41, %v5786_v42  ;;  %v10444_v54 = vcombine.high %v5794_v49, %v5802_v50  ;;  %v5889_v40 = vld [vmem:[#allocation13 + $0x8a0] sm:$0xff] }
 0xa38   :  { %9187 = vmatprep.subr.bf16.mxu1 %v10332_v53  ;;  %v10442_v53 = vcombine.high %v5793_v47, %v5801_v48  ;;  %v5897_v41 = vld [vmem:[#allocation13 + $0x8e0] sm:$0xff]  ;;  %v10521_v42 = vcombine.low %v5873_v25, %v5881_v60 }
 0xa3a   :  { %9106 = vmatpush1.bf16.msra.mxu0 %v10329_v59  ;;  %v5818_v59 = vld [vmem:[#allocation13 + $0x668] sm:$0xff] }
 0xa3b   :  { %9188 = vmatpush1.bf16.msra.mxu1 %v10331_v61  ;;  %9107 = vmatprep.subr.bf16.mxu0 %v10346_v62  ;;  %v10441_v61 = vcombine.low %v5793_v47, %v5801_v48  ;;  %v10443_v62 = vcombine.low %v5794_v49, %v5802_v50  ;;  %v10460_v0 = vcombine.high %v5810_v58, %v5818_v59  ;;  %v5905_v47 = vld [vmem:[#allocation13 + $0x920] sm:$0xff]  ;;  %v5906_v50 = vld [vmem:[#allocation13 + $0x928] sm:$0xff] }
 0xa3c   :  { %9189 = vmatprep.subr.bf16.mxu1 %v10348_v63  ;;  %v10458_v63 = vcombine.high %v5809_v55, %v5817_v57  ;;  %v5913_v48 = vld [vmem:[#allocation13 + $0x960] sm:$0xff] }
 0xa3e   :  { %9108 = vmatpush1.bf16.msra.mxu0 %v10345_v5  ;;  %v5834_v5 = vld [vmem:[#allocation13 + $0x6e8] sm:$0xff] }
 0xa3f   :  { %9190 = vmatpush1.bf16.msra.mxu1 %v10347_v8  ;;  %9109 = vmatprep.subr.bf16.mxu0 %v10362_v12  ;;  %v10457_v8 = vcombine.low %v5809_v55, %v5817_v57  ;;  %v10459_v12 = vcombine.low %v5810_v58, %v5818_v59  ;;  %v10476_v15 = vcombine.high %v5826_v4, %v5834_v5  ;;  %v5921_v57 = vld [vmem:[#allocation13 + $0x9a0] sm:$0xff]  ;;  %v5922_v59 = vld [vmem:[#allocation13 + $0x9a8] sm:$0xff] }
 0xa40   :  { %9191 = vmatprep.subr.bf16.mxu1 %v10364_v13  ;;  %v10474_v13 = vcombine.high %v5825_v2, %v5833_v3  ;;  %v5929_v58 = vld [vmem:[#allocation13 + $0x9e0] sm:$0xff] }
 0xa42   :  { %9110 = vmatpush1.bf16.msra.mxu0 %v10361_v20  ;;  %v5850_v20 = vld [vmem:[#allocation13 + $0x768] sm:$0xff] }
 0xa43   :  { %9192 = vmatpush1.bf16.msra.mxu1 %v10363_v14  ;;  %9111 = vmatprep.subr.bf16.mxu0 %v10378_v21  ;;  %v10473_v14 = vcombine.low %v5825_v2, %v5833_v3  ;;  %v10475_v21 = vcombine.low %v5826_v4, %v5834_v5  ;;  %v10492_v23 = vcombine.high %v5842_v11, %v5850_v20  ;;  %v5937_v3 = vld [vmem:[#allocation13 + $0xa20] sm:$0xff]  ;;  %v5938_v5 = vld [vmem:[#allocation13 + $0xa28] sm:$0xff] }
 0xa44   :  { %9193 = vmatprep.subr.bf16.mxu1 %v10380_v22  ;;  %v10490_v22 = vcombine.high %v5841_v16, %v5849_v18  ;;  %v5945_v4 = vld [vmem:[#allocation13 + $0xa60] sm:$0xff] }
 0xa46   :  { %9112 = vmatpush1.bf16.msra.mxu0 %v10377_v29  ;;  %v5866_v29 = vld [vmem:[#allocation13 + $0x7e8] sm:$0xff] }
 0xa47   :  { %9194 = vmatpush1.bf16.msra.mxu1 %v10379_v17  ;;  %9113 = vmatprep.subr.bf16.mxu0 %v10394_v30  ;;  %v10489_v17 = vcombine.low %v5841_v16, %v5849_v18  ;;  %v10491_v30 = vcombine.low %v5842_v11, %v5850_v20  ;;  %v10508_v33 = vcombine.high %v5858_v19, %v5866_v29  ;;  %v5953_v18 = vld [vmem:[#allocation13 + $0xaa0] sm:$0xff]  ;;  %v5954_v20 = vld [vmem:[#allocation13 + $0xaa8] sm:$0xff] }
 0xa48   :  { %9195 = vmatprep.subr.bf16.mxu1 %v10396_v32  ;;  %v10506_v32 = vcombine.high %v5857_v27, %v5865_v28  ;;  %v5961_v11 = vld [vmem:[#allocation13 + $0xae0] sm:$0xff] }
 0xa4a   :  { %9114 = vmatpush1.bf16.msra.mxu0 %v10393_v35  ;;  %v5882_v35 = vld [vmem:[#allocation13 + $0x868] sm:$0xff] }
 0xa4b   :  { %9196 = vmatpush1.bf16.msra.mxu1 %v10395_v36  ;;  %9115 = vmatprep.subr.bf16.mxu0 %v10410_v37  ;;  %v10505_v36 = vcombine.low %v5857_v27, %v5865_v28  ;;  %v10507_v37 = vcombine.low %v5858_v19, %v5866_v29  ;;  %v10524_v39 = vcombine.high %v5874_v34, %v5882_v35  ;;  %v5969_v19 = vld [vmem:[#allocation13 + $0xb20] sm:$0xff] }
 0xa4c   :  { %9197 = vmatprep.subr.bf16.mxu1 %v10412_v38  ;;  %v10522_v38 = vcombine.high %v5873_v25, %v5881_v60  ;;  %v10602_v27 = vcombine.high %v5953_v18, %v5961_v11  ;;  %v5977_v29 = vld [vmem:[#allocation13 + $0xb60] sm:$0xff] }
 0xa4e   :  { %9116 = vmatpush1.bf16.msra.mxu0 %v10409_v1  ;;  %v5890_v1 = vld [vmem:[#allocation13 + $0x8a8] sm:$0xff] }
 0xa4f   :  { %9198 = vmatpush1.bf16.msra.mxu1 %v10411_v43  ;;  %9117 = vmatprep.subr.bf16.mxu0 %v10426_v44  ;;  %v5898_v43 = vld [vmem:[#allocation13 + $0x8e8] sm:$0xff]  ;;  %v10523_v44 = vcombine.low %v5874_v34, %v5882_v35  ;;  %v10601_v34 = vcombine.low %v5953_v18, %v5961_v11 }
 0xa50   :  { %9199 = vmatprep.subr.bf16.mxu1 %v10428_v46  ;;  %v10538_v46 = vcombine.high %v5889_v40, %v5897_v41  ;;  %v10540_v49 = vcombine.high %v5890_v1, %v5898_v43  ;;  %v6018_v18 = vld [vmem:[#allocation13 + $0xca8] sm:$0xff] }
 0xa51   :  { %v6026_v11 = vld [vmem:[#allocation13 + $0xce8] sm:$0xff] }
 0xa52   :  { %9118 = vmatpush1.bf16.msra.mxu0 %v10425_v51  ;;  %v5914_v51 = vld [vmem:[#allocation13 + $0x968] sm:$0xff] }
 0xa53   :  { %9200 = vmatpush1.bf16.msra.mxu1 %v10427_v52  ;;  %9119 = vmatprep.subr.bf16.mxu0 %v10442_v53  ;;  %v10537_v52 = vcombine.low %v5889_v40, %v5897_v41  ;;  %v10539_v53 = vcombine.low %v5890_v1, %v5898_v43  ;;  %v10556_v55 = vcombine.high %v5906_v50, %v5914_v51  ;;  %v5985_v40 = vld [vmem:[#allocation13 + $0xba0] sm:$0xff] }
 0xa54   :  { %9201 = vmatprep.subr.bf16.mxu1 %v10444_v54  ;;  %v10554_v54 = vcombine.high %v5905_v47, %v5913_v48  ;;  %v5993_v41 = vld [vmem:[#allocation13 + $0xbe0] sm:$0xff] }
 0xa56   :  { %9120 = vmatpush1.bf16.msra.mxu0 %v10441_v61  ;;  %v5930_v61 = vld [vmem:[#allocation13 + $0x9e8] sm:$0xff] }
 0xa57   :  { %9202 = vmatpush1.bf16.msra.mxu1 %v10443_v62  ;;  %9121 = vmatprep.subr.bf16.mxu0 %v10458_v63  ;;  %v10553_v62 = vcombine.low %v5905_v47, %v5913_v48  ;;  %v10555_v63 = vcombine.low %v5906_v50, %v5914_v51  ;;  %v10572_v2 = vcombine.high %v5922_v59, %v5930_v61  ;;  %v5994_v47 = vld [vmem:[#allocation13 + $0xbe8] sm:$0xff] }
 0xa58   :  { %9203 = vmatprep.subr.bf16.mxu1 %v10460_v0  ;;  %v10570_v0 = vcombine.high %v5921_v57, %v5929_v58 }
 0xa5a   :  { %9122 = vmatpush1.bf16.msra.mxu0 %v10457_v8  ;;  %v5946_v8 = vld [vmem:[#allocation13 + $0xa68] sm:$0xff] }
 0xa5b   :  { %9204 = vmatpush1.bf16.msra.mxu1 %v10459_v12  ;;  %9123 = vmatprep.subr.bf16.mxu0 %v10474_v13  ;;  %v10569_v12 = vcombine.low %v5921_v57, %v5929_v58  ;;  %v10571_v13 = vcombine.low %v5922_v59, %v5930_v61  ;;  %v10588_v16 = vcombine.high %v5938_v5, %v5946_v8 }
 0xa5c   :  { %9205 = vmatprep.subr.bf16.mxu1 %v10476_v15  ;;  %v10586_v15 = vcombine.high %v5937_v3, %v5945_v4  ;;  %v10634_v59 = vcombine.high %v5985_v40, %v5993_v41 }
 0xa5e   :  { %9124 = vmatpush1.bf16.msra.mxu0 %v10473_v14  ;;  %v5962_v14 = vld [vmem:[#allocation13 + $0xae8] sm:$0xff] }
 0xa5f   :  { %9206 = vmatpush1.bf16.msra.mxu1 %v10475_v21  ;;  %9125 = vmatprep.subr.bf16.mxu0 %v10490_v22  ;;  %v10585_v21 = vcombine.low %v5937_v3, %v5945_v4  ;;  %v12959_v22 = vld [vmem:[#allocation25] sm:$0xff]  ;;  %v10604_v28 = vcombine.high %v5954_v20, %v5962_v14  ;;  %v10603_v35 = vcombine.low %v5954_v20, %v5962_v14  ;;  %v6002_v3 = vld [vmem:[#allocation13 + $0xc28] sm:$0xff] }
 0xa60   :  { %9207 = vmatprep.subr.bf16.mxu1 %v10492_v23  ;;  %v10587_v23 = vcombine.low %v5938_v5, %v5946_v8  ;;  %v6136_v25 = vrot.slane %v12959_v22, %v12875_v9  ;;  %v6144_v60 = vrot.slane %v12959_v22, %v12878_v10  ;;  %v6010_v4 = vld [vmem:[#allocation13 + $0xc68] sm:$0xff]  ;;  %v10633_v5 = vcombine.low %v5985_v40, %v5993_v41 }
 0xa61   :  { %v10651_v14 = vcombine.low %v6002_v3, %v6010_v4  ;;  %v6058_v40 = vld [vmem:[#allocation13 + $0xde8] sm:$0xff] }
 0xa62   :  { %9126 = vmatpush1.bf16.msra.mxu0 %v10489_v17  ;;  %v6132_v17 = vrot.slane %v12959_v22, %v12870_v7 }
 0xa63   :  { %9208 = vmatpush1.bf16.msra.mxu1 %v10491_v30  ;;  %9127 = vmatprep.subr.bf16.mxu0 %v10506_v32  ;;  %v6140_v30 = vrot.slane %v12959_v22, %v12889_v56  ;;  %v5970_v32 = vld [vmem:[#allocation13 + $0xb28] sm:$0xff] }
 0xa64   :  { %9209 = vmatprep.subr.bf16.mxu1 %v10508_v33  ;;  %v5978_v33 = vld [vmem:[#allocation13 + $0xb68] sm:$0xff] }
 0xa65   :  { %v10619_v58 = vcombine.low %v5970_v32, %v5978_v33 }
 0xa66   :  { %9128 = vmatpush1.bf16.msra.mxu0 %v10505_v36  ;;  %v10618_v36 = vcombine.high %v5969_v19, %v5977_v29 }
 0xa67   :  { %9210 = vmatpush1.bf16.msra.mxu1 %v10507_v37  ;;  %9138 = vmatprep.subr.bf16.mxu0 %v10522_v38 }
 0xa68   :  { %9220 = vmatprep.subr.bf16.mxu1 %v10524_v39  ;;  %v10620_v39 = vcombine.high %v5970_v32, %v5978_v33  ;;  %v10667_v32 = vcombine.low %v6018_v18, %v6026_v11 }
 0xa69   :  { %9130 = vmatmul.mubr.bf16.vlgmr.msra.gmra.mrb[20].mxu0 %v12928_v26 }
 0xa6a   :  { %9212 = vmatmul.mubr.bf16.vlgmr.msra.gmra.mrb[32].mxu1 %v12928_v26  ;;  %9139 = vmatpush1.bf16.msra.mxu0 %v10521_v42 }
 0xa6b   :  { %9170 = vmatprep.mubr.bf16.mxu0 %v12932_v31  ;;  %9221 = vmatpush1.bf16.msra.mxu1 %v10523_v44 }
 0xa6c   :  { %9252 = vmatprep.mubr.bf16.mxu1 %v12932_v31  ;;  %9140 = vmatprep.subr.bf16.mxu0 %v10538_v46  ;;  %v5986_v46 = vld [vmem:[#allocation13 + $0xba8] sm:$0xff] }
 0xa6d   :  { %9222 = vmatprep.subr.bf16.mxu1 %v10540_v49  ;;  %v10635_v8 = vcombine.low %v5986_v46, %v5994_v47 }
 0xa6e   :  { %9141 = vmatpush1.bf16.msra.mxu0 %v10537_v52  ;;  %v10617_v52 = vcombine.low %v5969_v19, %v5977_v29  ;;  %v6034_v19 = vld [vmem:[#allocation13 + $0xd28] sm:$0xff] }
 0xa6f   :  { %9223 = vmatpush1.bf16.msra.mxu1 %v10539_v53  ;;  %9142 = vmatprep.subr.bf16.mxu0 %v10554_v54  ;;  %v6042_v29 = vld [vmem:[#allocation13 + $0xd68] sm:$0xff] }
 0xa70   :  { %9224 = vmatprep.subr.bf16.mxu1 %v10556_v55 }
 0xa72   :  { %9143 = vmatpush1.bf16.msra.mxu0 %v10553_v62 }
 0xa73   :  { %9225 = vmatpush1.bf16.msra.mxu1 %v10555_v63  ;;  %9144 = vmatprep.subr.bf16.mxu0 %v10570_v0  ;;  %v10636_v63 = vcombine.high %v5986_v46, %v5994_v47  ;;  %v6001_v0 = vld [vmem:[#allocation13 + $0xc20] sm:$0xff] }
 0xa74   :  { %9226 = vmatprep.subr.bf16.mxu1 %v10572_v2  ;;  %v6009_v2 = vld [vmem:[#allocation13 + $0xc60] sm:$0xff] }
 0xa75   :  { %v10649_v20 = vcombine.low %v6001_v0, %v6009_v2 }
 0xa76   :  { %9145 = vmatpush1.bf16.msra.mxu0 %v10569_v12  ;;  %v10650_v12 = vcombine.high %v6001_v0, %v6009_v2 }
 0xa77   :  { %9227 = vmatpush1.bf16.msra.mxu1 %v10571_v13  ;;  %9146 = vmatprep.subr.bf16.mxu0 %v10586_v15  ;;  %v10652_v13 = vcombine.high %v6002_v3, %v6010_v4  ;;  %v6017_v15 = vld [vmem:[#allocation13 + $0xca0] sm:$0xff] }
 0xa78   :  { %9228 = vmatprep.subr.bf16.mxu1 %v10588_v16  ;;  %v6025_v16 = vld [vmem:[#allocation13 + $0xce0] sm:$0xff] }
 0xa79   :  { %v6097_v4 = vld [vmem:[#allocation13 + $0xf20] sm:$0xff] }
 0xa7a   :  { %9147 = vmatpush1.bf16.msra.mxu0 %v10585_v21  ;;  %v10666_v21 = vcombine.high %v6017_v15, %v6025_v16 }
 0xa7b   :  { %9229 = vmatpush1.bf16.msra.mxu1 %v10587_v23  ;;  %9148 = vmatprep.subr.bf16.mxu0 %v10602_v27  ;;  %v10668_v23 = vcombine.high %v6018_v18, %v6026_v11  ;;  %v6033_v27 = vld [vmem:[#allocation13 + $0xd20] sm:$0xff] }
 0xa7c   :  { %v8844_v37 = vpop.f32.mrb[12].mxu0  ;;  %v8926_v38 = vpop.f32.mrb[24].mxu1  ;;  %9230 = vmatprep.subr.bf16.mxu1 %v10604_v28  ;;  %v6041_v28 = vld [vmem:[#allocation13 + $0xd60] sm:$0xff] }
 0xa7d   :  { %v10871_v42 = vadd.f32 %v8844_v37, %v6132_v17  ;;  %v10873_v1 = vadd.f32 %v8926_v38, %v6140_v30  ;;  %v8846_v43 = vpop.f32.mrb[13].mxu0  ;;  %v8928_v44 = vpop.f32.mrb[25].mxu1  ;;  %v10665_v17 = vcombine.low %v6017_v15, %v6025_v16  ;;  %v10682_v33 = vcombine.high %v6033_v27, %v6041_v28 }
 0xa7e   :  { %v10872_v48 = vadd.f32 %v8846_v43, %v6136_v25  ;;  %v10874_v49 = vadd.f32 %v8928_v44, %v6144_v60  ;;  %v8848_v50 = vpop.f32.mrb[14].mxu0  ;;  %v8930_v51 = vpop.f32.mrb[26].mxu1  ;;  %9149 = vmatpush1.bf16.msra.mxu0 %v10601_v34  ;;  %v10684_v34 = vcombine.high %v6034_v19, %v6042_v29  ;;  %v10683_v44 = vcombine.low %v6034_v19, %v6042_v29 }
 0xa7f   :  { %v10769_v53 = vmul.f32 -1.442695, %v10871_v42  ;;  %v10771_v54 = vmul.f32 -1.442695, %v10873_v1  ;;  %9231 = vmatpush1.bf16.msra.mxu1 %v10603_v35  ;;  %v8849_v55 = vpop.f32.mrb[15].mxu0  ;;  %v8931_v57 = vpop.f32.mrb[27].mxu1  ;;  %9150 = vmatprep.subr.bf16.mxu0 %v10618_v36  ;;  %v10681_v1 = vcombine.low %v6033_v27, %v6041_v28 }
 0xa80   :  { %v10770_v61 = vmul.f32 -1.442695, %v10872_v48  ;;  %v10772_v62 = vmul.f32 -1.442695, %v10874_v49  ;;  %9232 = vmatprep.subr.bf16.mxu1 %v10620_v39  ;;  %v6049_v35 = vld [vmem:[#allocation13 + $0xda0] sm:$0xff]  ;;  %v6050_v39 = vld [vmem:[#allocation13 + $0xda8] sm:$0xff] }
 0xa81   :  { %12037 = vpow2.f32 %v10769_v53  ;;  %v6057_v36 = vld [vmem:[#allocation13 + $0xde0] sm:$0xff]  ;;  %v10700_v47 = vcombine.high %v6050_v39, %v6058_v40  ;;  %v6066_v50 = vld [vmem:[#allocation13 + $0xe28] sm:$0xff]  ;;  %v10699_v53 = vcombine.low %v6050_v39, %v6058_v40  ;;  %v5643_v39 = vld [vmem:[#allocation13 + $0xf0] sm:$0xff] }
 0xa82   :  { %12039 = vpow2.f32 %v10771_v54  ;;  %9151 = vmatpush1.bf16.msra.mxu0 %v10617_v52  ;;  %v10698_v46 = vcombine.high %v6049_v35, %v6057_v36  ;;  %v6065_v48 = vld [vmem:[#allocation13 + $0xe20] sm:$0xff]  ;;  %v6074_v51 = vld [vmem:[#allocation13 + $0xe68] sm:$0xff]  ;;  %v10697_v52 = vcombine.low %v6049_v35, %v6057_v36 }
 0xa83   :  { %12041 = vpow2.f32 %v10770_v61  ;;  %9233 = vmatpush1.bf16.msra.mxu1 %v10619_v58  ;;  %9152 = vmatprep.subr.bf16.mxu0 %v10634_v59  ;;  %v6073_v49 = vld [vmem:[#allocation13 + $0xe60] sm:$0xff]  ;;  %v10716_v55 = vcombine.high %v6066_v50, %v6074_v51  ;;  %v6082_v59 = vld [vmem:[#allocation13 + $0xea8] sm:$0xff] }
 0xa84   :  { %12043 = vpow2.f32 %v10772_v62  ;;  %9234 = vmatprep.subr.bf16.mxu1 %v10636_v63  ;;  %v10714_v54 = vcombine.high %v6065_v48, %v6073_v49  ;;  %v6081_v57 = vld [vmem:[#allocation13 + $0xea0] sm:$0xff]  ;;  %v6090_v61 = vld [vmem:[#allocation13 + $0xee8] sm:$0xff]  ;;  %v10713_v62 = vcombine.low %v6065_v48, %v6073_v49  ;;  %v10715_v63 = vcombine.low %v6066_v50, %v6074_v51  ;;  %v5652_v48 = vld [vmem:[#allocation13 + $0x138] sm:$0xff] }
 0xa85   :  { %v6089_v58 = vld [vmem:[#allocation13 + $0xee0] sm:$0xff]  ;;  %v10732_v3 = vcombine.high %v6082_v59, %v6090_v61  ;;  %v10731_v11 = vcombine.low %v6082_v59, %v6090_v61  ;;  %v6114_v27 = vld [vmem:[#allocation13 + $0xfa8] sm:$0xff]  ;;  %v5660_v49 = vld [vmem:[#allocation13 + $0x178] sm:$0xff] }
 0xa86   :  { %9153 = vmatpush1.bf16.msra.mxu0 %v10633_v5  ;;  %v10730_v0 = vcombine.high %v6081_v57, %v6089_v58  ;;  %v6105_v5 = vld [vmem:[#allocation13 + $0xf60] sm:$0xff]  ;;  %v10729_v16 = vcombine.low %v6081_v57, %v6089_v58  ;;  %v6122_v28 = vld [vmem:[#allocation13 + $0xfe8] sm:$0xff]  ;;  %v5668_v57 = vld [vmem:[#allocation13 + $0x1b8] sm:$0xff]  ;;  %v10303_v61 = vcombine.low %v5652_v48, %v5660_v49 }
 0xa87   :  { %9235 = vmatpush1.bf16.msra.mxu1 %v10635_v8  ;;  %9154 = vmatprep.subr.bf16.mxu0 %v10650_v12  ;;  %v6098_v12 = vld [vmem:[#allocation13 + $0xf28] sm:$0xff]  ;;  %v10745_v19 = vcombine.low %v6097_v4, %v6105_v5  ;;  %v10763_v35 = vcombine.low %v6114_v27, %v6122_v28  ;;  %v5676_v58 = vld [vmem:[#allocation13 + $0x1f8] sm:$0xff] }
 0xa88   :  { %9236 = vmatprep.subr.bf16.mxu1 %v10652_v13  ;;  %v6106_v13 = vld [vmem:[#allocation13 + $0xf68] sm:$0xff] }
 0xa89   :  { %v10747_v29 = vcombine.low %v6098_v12, %v6106_v13 }
 0xa8a   :  { %9155 = vmatpush1.bf16.msra.mxu0 %v10649_v20  ;;  %v10746_v20 = vcombine.high %v6097_v4, %v6105_v5  ;;  %v5692_v4 = vld [vmem:[#allocation13 + $0x278] sm:$0xff]  ;;  %v10319_v5 = vcombine.low %v5668_v57, %v5676_v58 }
 0xa8b   :  { %v12038_v30 = vpop.eup %12037  ;;  %9237 = vmatpush1.bf16.msra.mxu1 %v10651_v14  ;;  %9156 = vmatprep.subr.bf16.mxu0 %v10666_v21  ;;  %v10748_v14 = vcombine.high %v6098_v12, %v6106_v13  ;;  %v6113_v21 = vld [vmem:[#allocation13 + $0xfa0] sm:$0xff]  ;;  %v5699_v13 = vld [vmem:[#allocation13 + $0x2b0] sm:$0xff] }
 0xa8c   :  { %v12040_v25 = vpop.eup %12039  ;;  %v9473_v60 = vadd.f32 1.0, %v12038_v30  ;;  %9238 = vmatprep.subr.bf16.mxu1 %v10668_v23  ;;  %v6121_v23 = vld [vmem:[#allocation13 + $0xfe0] sm:$0xff]  ;;  %v10764_v30 = vcombine.high %v6114_v27, %v6122_v28  ;;  %v5723_v27 = vld [vmem:[#allocation13 + $0x370] sm:$0xff]  ;;  %v5716_v28 = vld [vmem:[#allocation13 + $0x338] sm:$0xff] }
 0xa8d   :  { %v12042_v37 = vpop.eup %12041  ;;  %v9475_v38 = vadd.f32 1.0, %v12040_v25  ;;  %v5620_v25 = vld [vmem:[#allocation13 + $0x38] sm:$0xff] }
 0xa8e   :  { %v12044_v41 = vpop.eup %12043  ;;  %12045 = vrcp.f32 %v9473_v60  ;;  %v9474_v42 = vadd.f32 1.0, %v12042_v37  ;;  %9157 = vmatpush1.bf16.msra.mxu0 %v10665_v17  ;;  %v10762_v17 = vcombine.high %v6113_v21, %v6121_v23  ;;  %v5628_v60 = vld [vmem:[#allocation13 + $0x78] sm:$0xff] }
 0xa8f   :  { %12047 = vrcp.f32 %v9475_v38  ;;  %v9476_v43 = vadd.f32 1.0, %v12044_v41  ;;  %9239 = vmatpush1.bf16.msra.mxu1 %v10667_v32  ;;  %9158 = vmatprep.subr.bf16.mxu0 %v10682_v33  ;;  %v5619_v32 = vld [vmem:[#allocation13 + $0x30] sm:$0xff]  ;;  %v10272_v37 = vcombine.high %v5620_v25, %v5628_v60  ;;  %v5636_v41 = vld [vmem:[#allocation13 + $0xb8] sm:$0xff] }
 0xa90   :  { %12049 = vrcp.f32 %v9474_v42  ;;  %9240 = vmatprep.subr.bf16.mxu1 %v10684_v34  ;;  %v5627_v33 = vld [vmem:[#allocation13 + $0x70] sm:$0xff]  ;;  %v10761_v34 = vcombine.low %v6113_v21, %v6121_v23  ;;  %v5644_v42 = vld [vmem:[#allocation13 + $0xf8] sm:$0xff] }
 0xa91   :  { %12051 = vrcp.f32 %v9476_v43  ;;  %v10270_v36 = vcombine.high %v5619_v32, %v5627_v33  ;;  %v5635_v38 = vld [vmem:[#allocation13 + $0xb0] sm:$0xff]  ;;  %v10269_v40 = vcombine.low %v5619_v32, %v5627_v33  ;;  %v10287_v51 = vcombine.low %v5636_v41, %v5644_v42 }
 0xa92   :  { %9159 = vmatpush1.bf16.msra.mxu0 %v10681_v1  ;;  %v10271_v1 = vcombine.low %v5620_v25, %v5628_v60  ;;  %v10286_v43 = vcombine.high %v5635_v38, %v5643_v39  ;;  %v10285_v50 = vcombine.low %v5635_v38, %v5643_v39  ;;  %v5715_v23 = vld [vmem:[#allocation13 + $0x330] sm:$0xff]  ;;  %v5732_v60 = vld [vmem:[#allocation13 + $0x3b8] sm:$0xff] }
 0xa93   :  { %9241 = vmatpush1.bf16.msra.mxu1 %v10683_v44  ;;  %9160 = vmatprep.subr.bf16.mxu0 %v10698_v46  ;;  %v5651_v44 = vld [vmem:[#allocation13 + $0x130] sm:$0xff] }
 0xa94   :  { %9242 = vmatprep.subr.bf16.mxu1 %v10700_v47  ;;  %v5659_v46 = vld [vmem:[#allocation13 + $0x170] sm:$0xff]  ;;  %v10288_v47 = vcombine.high %v5636_v41, %v5644_v42  ;;  %v5748_v41 = vld [vmem:[#allocation13 + $0x438] sm:$0xff] }
 0xa95   :  { %v10301_v59 = vcombine.low %v5651_v44, %v5659_v46  ;;  %v5731_v33 = vld [vmem:[#allocation13 + $0x3b0] sm:$0xff]  ;;  %v5756_v42 = vld [vmem:[#allocation13 + $0x478] sm:$0xff] }
 0xa96   :  { %9161 = vmatpush1.bf16.msra.mxu0 %v10697_v52  ;;  %v10302_v52 = vcombine.high %v5651_v44, %v5659_v46  ;;  %v5739_v25 = vld [vmem:[#allocation13 + $0x3f0] sm:$0xff]  ;;  %v10400_v46 = vcombine.high %v5748_v41, %v5756_v42 }
 0xa97   :  { %9243 = vmatpush1.bf16.msra.mxu1 %v10699_v53  ;;  %9162 = vmatprep.subr.bf16.mxu0 %v10714_v54  ;;  %v10304_v53 = vcombine.high %v5652_v48, %v5660_v49  ;;  %v5667_v54 = vld [vmem:[#allocation13 + $0x1b0] sm:$0xff]  ;;  %v5764_v49 = vld [vmem:[#allocation13 + $0x4b8] sm:$0xff] }
 0xa98   :  { %v12046_v2 = vpop.eup %12045  ;;  %9244 = vmatprep.subr.bf16.mxu1 %v10716_v55  ;;  %v5675_v55 = vld [vmem:[#allocation13 + $0x1f0] sm:$0xff] }
 0xa99   :  { %v12048_v8 = vpop.eup %12047  ;;  %9521 = vst [vmem:[%s13081_s27] sm:$0xff] %v12046_v2  ;;  %v5691_v2 = vld [vmem:[#allocation13 + $0x270] sm:$0xff] }
 0xa9a   :  { %v12050_v15 = vpop.eup %12049  ;;  %9523 = vst [vmem:[%s13081_s27 + $0x10] sm:$0xff] %v12048_v8  ;;  %9163 = vmatpush1.bf16.msra.mxu0 %v10713_v62  ;;  %v10318_v62 = vcombine.high %v5667_v54, %v5675_v55  ;;  %v5747_v39 = vld [vmem:[#allocation13 + $0x430] sm:$0xff] }
 0xa9b   :  { %v12052_v18 = vpop.eup %12051  ;;  %9522 = vst [vmem:[%s13081_s27 + $0x8] sm:$0xff] %v12050_v15  ;;  %9245 = vmatpush1.bf16.msra.mxu1 %v10715_v63  ;;  %9164 = vmatprep.subr.bf16.mxu0 %v10730_v0  ;;  %v10320_v63 = vcombine.high %v5668_v57, %v5676_v58  ;;  %v5683_v0 = vld [vmem:[#allocation13 + $0x230] sm:$0xff]  ;;  %v5780_v58 = vld [vmem:[#allocation13 + $0x538] sm:$0xff] }
 0xa9c   :  { %9524 = vst [vmem:[%s13081_s27 + $0x18] sm:$0xff] %v12052_v18  ;;  %9246 = vmatprep.subr.bf16.mxu1 %v10732_v3  ;;  %v5684_v3 = vld [vmem:[#allocation13 + $0x238] sm:$0xff]  ;;  %v10334_v8 = vcombine.high %v5683_v0, %v5691_v2  ;;  %v5707_v15 = vld [vmem:[#allocation13 + $0x2f0] sm:$0xff] }
 0xa9d   :  { %v10336_v12 = vcombine.high %v5684_v3, %v5692_v4  ;;  %v5708_v18 = vld [vmem:[#allocation13 + $0x2f8] sm:$0xff]  ;;  %v5771_v48 = vld [vmem:[#allocation13 + $0x4f0] sm:$0xff] }
 0xa9e   :  { %9165 = vmatpush1.bf16.msra.mxu0 %v10729_v16  ;;  %v5700_v16 = vld [vmem:[#allocation13 + $0x2b8] sm:$0xff]  ;;  %v5787_v57 = vld [vmem:[#allocation13 + $0x570] sm:$0xff] }
 0xa9f   :  { %9247 = vmatpush1.bf16.msra.mxu1 %v10731_v11  ;;  %9166 = vmatprep.subr.bf16.mxu0 %v10746_v20  ;;  %v10333_v11 = vcombine.low %v5683_v0, %v5691_v2  ;;  %v10335_v20 = vcombine.low %v5684_v3, %v5692_v4  ;;  %v10352_v21 = vcombine.high %v5700_v16, %v5708_v18  ;;  %v5795_v2 = vld [vmem:[#allocation13 + $0x5b0] sm:$0xff]  ;;  %v5796_v4 = vld [vmem:[#allocation13 + $0x5b8] sm:$0xff] }
 0xaa0   :  { %9248 = vmatprep.subr.bf16.mxu1 %v10748_v14  ;;  %v10350_v14 = vcombine.high %v5699_v13, %v5707_v15  ;;  %v5803_v3 = vld [vmem:[#allocation13 + $0x5f0] sm:$0xff] }
 0xaa2   :  { %9167 = vmatpush1.bf16.msra.mxu0 %v10745_v19  ;;  %v5724_v19 = vld [vmem:[#allocation13 + $0x378] sm:$0xff] }
 0xaa3   :  { %9249 = vmatpush1.bf16.msra.mxu1 %v10747_v29  ;;  %9168 = vmatprep.subr.bf16.mxu0 %v10762_v17  ;;  %v10349_v29 = vcombine.low %v5699_v13, %v5707_v15  ;;  %v10351_v17 = vcombine.low %v5700_v16, %v5708_v18  ;;  %v10368_v32 = vcombine.high %v5716_v28, %v5724_v19  ;;  %v5811_v15 = vld [vmem:[#allocation13 + $0x630] sm:$0xff]  ;;  %v5812_v18 = vld [vmem:[#allocation13 + $0x638] sm:$0xff] }
 0xaa4   :  { %9250 = vmatprep.subr.bf16.mxu1 %v10764_v30  ;;  %v10366_v30 = vcombine.high %v5715_v23, %v5723_v27  ;;  %v5819_v16 = vld [vmem:[#allocation13 + $0x670] sm:$0xff] }
 0xaa6   :  { %9169 = vmatpush1.bf16.msra.mxu0 %v10761_v34  ;;  %v5740_v34 = vld [vmem:[#allocation13 + $0x3f8] sm:$0xff] }
 0xaa7   :  { %9251 = vmatpush1.bf16.msra.mxu1 %v10763_v35  ;;  %9261 = vmatprep.subr.bf16.mxu0 %v10270_v36  ;;  %v10365_v35 = vcombine.low %v5715_v23, %v5723_v27  ;;  %v10367_v36 = vcombine.low %v5716_v28, %v5724_v19  ;;  %v10384_v38 = vcombine.high %v5732_v60, %v5740_v34  ;;  %v5827_v27 = vld [vmem:[#allocation13 + $0x6b0] sm:$0xff]  ;;  %v5828_v19 = vld [vmem:[#allocation13 + $0x6b8] sm:$0xff] }
 0xaa8   :  { %9343 = vmatprep.subr.bf16.mxu1 %v10272_v37  ;;  %v10382_v37 = vcombine.high %v5731_v33, %v5739_v25  ;;  %v5835_v28 = vld [vmem:[#allocation13 + $0x6f0] sm:$0xff] }
 0xaa9   :  { %9171 = vmatmul.mubr.bf16.vlgmr.msra.gmra.mrb[20].mxu0 %v12941_v45 }
 0xaaa   :  { %9253 = vmatmul.mubr.bf16.vlgmr.msra.gmra.mrb[32].mxu1 %v12941_v45  ;;  %9262 = vmatpush1.bf16.msra.mxu0 %v10269_v40  ;;  %v5755_v40 = vld [vmem:[#allocation13 + $0x470] sm:$0xff] }
 0xaab   :  { %9293 = vmatprep.mubr.bf16.mxu0 %v12926_v24  ;;  %9344 = vmatpush1.bf16.msra.mxu1 %v10271_v1  ;;  %v10381_v1 = vcombine.low %v5731_v33, %v5739_v25  ;;  %v10398_v44 = vcombine.high %v5747_v39, %v5755_v40  ;;  %v5843_v25 = vld [vmem:[#allocation13 + $0x730] sm:$0xff] }
 0xaac   :  { %9375 = vmatprep.mubr.bf16.mxu1 %v12926_v24  ;;  %9263 = vmatprep.subr.bf16.mxu0 %v10286_v43  ;;  %v10317_v24 = vcombine.low %v5667_v54, %v5675_v55  ;;  %v10383_v43 = vcombine.low %v5732_v60, %v5740_v34  ;;  %v5779_v55 = vld [vmem:[#allocation13 + $0x530] sm:$0xff]  ;;  %v5844_v34 = vld [vmem:[#allocation13 + $0x738] sm:$0xff] }
 0xaad   :  { %9345 = vmatprep.subr.bf16.mxu1 %v10288_v47  ;;  %v5763_v47 = vld [vmem:[#allocation13 + $0x4b0] sm:$0xff] }
 0xaae   :  { %9264 = vmatpush1.bf16.msra.mxu0 %v10285_v50  ;;  %v5772_v50 = vld [vmem:[#allocation13 + $0x4f8] sm:$0xff]  ;;  %v5851_v60 = vld [vmem:[#allocation13 + $0x770] sm:$0xff] }
 0xaaf   :  { %9346 = vmatpush1.bf16.msra.mxu1 %v10287_v51  ;;  %9265 = vmatprep.subr.bf16.mxu0 %v10302_v52  ;;  %v10397_v51 = vcombine.low %v5747_v39, %v5755_v40  ;;  %v10399_v52 = vcombine.low %v5748_v41, %v5756_v42  ;;  %v10416_v54 = vcombine.high %v5764_v49, %v5772_v50  ;;  %v5859_v40 = vld [vmem:[#allocation13 + $0x7b0] sm:$0xff]  ;;  %v5860_v42 = vld [vmem:[#allocation13 + $0x7b8] sm:$0xff] }
 0xab0   :  { %9347 = vmatprep.subr.bf16.mxu1 %v10304_v53  ;;  %v10414_v53 = vcombine.high %v5763_v47, %v5771_v48  ;;  %v5867_v41 = vld [vmem:[#allocation13 + $0x7f0] sm:$0xff] }
 0xab2   :  { %9266 = vmatpush1.bf16.msra.mxu0 %v10301_v59  ;;  %v5788_v59 = vld [vmem:[#allocation13 + $0x578] sm:$0xff] }
 0xab3   :  { %9348 = vmatpush1.bf16.msra.mxu1 %v10303_v61  ;;  %9267 = vmatprep.subr.bf16.mxu0 %v10318_v62  ;;  %v10413_v61 = vcombine.low %v5763_v47, %v5771_v48  ;;  %v10415_v62 = vcombine.low %v5764_v49, %v5772_v50  ;;  %v10432_v0 = vcombine.high %v5780_v58, %v5788_v59  ;;  %v5875_v48 = vld [vmem:[#allocation13 + $0x830] sm:$0xff]  ;;  %v5876_v50 = vld [vmem:[#allocation13 + $0x838] sm:$0xff] }
 0xab4   :  { %9349 = vmatprep.subr.bf16.mxu1 %v10320_v63  ;;  %v10430_v63 = vcombine.high %v5779_v55, %v5787_v57  ;;  %v5883_v49 = vld [vmem:[#allocation13 + $0x870] sm:$0xff] }
 0xab6   :  { %9268 = vmatpush1.bf16.msra.mxu0 %v10317_v24  ;;  %v5804_v24 = vld [vmem:[#allocation13 + $0x5f8] sm:$0xff] }
 0xab7   :  { %9350 = vmatpush1.bf16.msra.mxu1 %v10319_v5  ;;  %9269 = vmatprep.subr.bf16.mxu0 %v10334_v8  ;;  %v10429_v5 = vcombine.low %v5779_v55, %v5787_v57  ;;  %v10431_v8 = vcombine.low %v5780_v58, %v5788_v59  ;;  %v10448_v13 = vcombine.high %v5796_v4, %v5804_v24  ;;  %v5891_v57 = vld [vmem:[#allocation13 + $0x8b0] sm:$0xff] }
 0xab8   :  { %9351 = vmatprep.subr.bf16.mxu1 %v10336_v12  ;;  %v10446_v12 = vcombine.high %v5795_v2, %v5803_v3  ;;  %v5899_v58 = vld [vmem:[#allocation13 + $0x8f0] sm:$0xff]  ;;  %v10525_v59 = vcombine.low %v5875_v48, %v5883_v49 }
 0xaba   :  { %9270 = vmatpush1.bf16.msra.mxu0 %v10333_v11  ;;  %v5820_v11 = vld [vmem:[#allocation13 + $0x678] sm:$0xff] }
 0xabb   :  { %9352 = vmatpush1.bf16.msra.mxu1 %v10335_v20  ;;  %9271 = vmatprep.subr.bf16.mxu0 %v10350_v14  ;;  %v10445_v20 = vcombine.low %v5795_v2, %v5803_v3  ;;  %v10447_v14 = vcombine.low %v5796_v4, %v5804_v24  ;;  %v10464_v23 = vcombine.high %v5812_v18, %v5820_v11  ;;  %v5907_v2 = vld [vmem:[#allocation13 + $0x930] sm:$0xff]  ;;  %v5908_v24 = vld [vmem:[#allocation13 + $0x938] sm:$0xff] }
 0xabc   :  { %9353 = vmatprep.subr.bf16.mxu1 %v10352_v21  ;;  %v10462_v21 = vcombine.high %v5811_v15, %v5819_v16  ;;  %v5915_v3 = vld [vmem:[#allocation13 + $0x970] sm:$0xff] }
 0xabe   :  { %9272 = vmatpush1.bf16.msra.mxu0 %v10349_v29  ;;  %v5836_v29 = vld [vmem:[#allocation13 + $0x6f8] sm:$0xff] }
 0xabf   :  { %9354 = vmatpush1.bf16.msra.mxu1 %v10351_v17  ;;  %9273 = vmatprep.subr.bf16.mxu0 %v10366_v30  ;;  %v10461_v17 = vcombine.low %v5811_v15, %v5819_v16  ;;  %v10463_v30 = vcombine.low %v5812_v18, %v5820_v11  ;;  %v10480_v33 = vcombine.high %v5828_v19, %v5836_v29  ;;  %v5923_v16 = vld [vmem:[#allocation13 + $0x9b0] sm:$0xff]  ;;  %v5924_v11 = vld [vmem:[#allocation13 + $0x9b8] sm:$0xff] }
 0xac0   :  { %9355 = vmatprep.subr.bf16.mxu1 %v10368_v32  ;;  %v10478_v32 = vcombine.high %v5827_v27, %v5835_v28  ;;  %v5931_v18 = vld [vmem:[#allocation13 + $0x9f0] sm:$0xff] }
 0xac2   :  { %9274 = vmatpush1.bf16.msra.mxu0 %v10365_v35  ;;  %v5852_v35 = vld [vmem:[#allocation13 + $0x778] sm:$0xff] }
 0xac3   :  { %9356 = vmatpush1.bf16.msra.mxu1 %v10367_v36  ;;  %9275 = vmatprep.subr.bf16.mxu0 %v10382_v37  ;;  %v10477_v36 = vcombine.low %v5827_v27, %v5835_v28  ;;  %v10479_v37 = vcombine.low %v5828_v19, %v5836_v29  ;;  %v10496_v39 = vcombine.high %v5844_v34, %v5852_v35  ;;  %v5939_v27 = vld [vmem:[#allocation13 + $0xa30] sm:$0xff]  ;;  %v5940_v19 = vld [vmem:[#allocation13 + $0xa38] sm:$0xff] }
 0xac4   :  { %9357 = vmatprep.subr.bf16.mxu1 %v10384_v38  ;;  %v10494_v38 = vcombine.high %v5843_v25, %v5851_v60  ;;  %v5947_v28 = vld [vmem:[#allocation13 + $0xa70] sm:$0xff]  ;;  %v5948_v29 = vld [vmem:[#allocation13 + $0xa78] sm:$0xff] }
 0xac6   :  { %9276 = vmatpush1.bf16.msra.mxu0 %v10381_v1  ;;  %v5868_v1 = vld [vmem:[#allocation13 + $0x7f8] sm:$0xff] }
 0xac7   :  { %9358 = vmatpush1.bf16.msra.mxu1 %v10383_v43  ;;  %9277 = vmatprep.subr.bf16.mxu0 %v10398_v44  ;;  %v10493_v43 = vcombine.low %v5843_v25, %v5851_v60  ;;  %v10495_v44 = vcombine.low %v5844_v34, %v5852_v35  ;;  %v10512_v47 = vcombine.high %v5860_v42, %v5868_v1  ;;  %v5963_v25 = vld [vmem:[#allocation13 + $0xaf0] sm:$0xff]  ;;  %v6147_v60 = vsub.s32 4, %v12867_v6  ;;  %v5956_v34 = vld [vmem:[#allocation13 + $0xab8] sm:$0xff] }
 0xac8   :  { %9359 = vmatprep.subr.bf16.mxu1 %v10400_v46  ;;  %v10510_v46 = vcombine.high %v5859_v40, %v5867_v41  ;;  %v5964_v35 = vld [vmem:[#allocation13 + $0xaf8] sm:$0xff] }
 0xaca   :  { %9278 = vmatpush1.bf16.msra.mxu0 %v10397_v51  ;;  %v5884_v51 = vld [vmem:[#allocation13 + $0x878] sm:$0xff] }
 0xacb   :  { %9360 = vmatpush1.bf16.msra.mxu1 %v10399_v52  ;;  %9279 = vmatprep.subr.bf16.mxu0 %v10414_v53  ;;  %v10509_v52 = vcombine.low %v5859_v40, %v5867_v41  ;;  %v10511_v53 = vcombine.low %v5860_v42, %v5868_v1  ;;  %v10528_v55 = vcombine.high %v5876_v50, %v5884_v51  ;;  %v6159_v40 = vsub.s32 7, %v12867_v6  ;;  %v5971_v1 = vld [vmem:[#allocation13 + $0xb30] sm:$0xff] }
 0xacc   :  { %9361 = vmatprep.subr.bf16.mxu1 %v10416_v54  ;;  %v10526_v54 = vcombine.high %v5875_v48, %v5883_v49  ;;  %v10608_v42 = vcombine.high %v5956_v34, %v5964_v35 }
 0xace   :  { %9280 = vmatpush1.bf16.msra.mxu0 %v10413_v61  ;;  %v5892_v61 = vld [vmem:[#allocation13 + $0x8b8] sm:$0xff] }
 0xacf   :  { %9362 = vmatpush1.bf16.msra.mxu1 %v10415_v62  ;;  %9281 = vmatprep.subr.bf16.mxu0 %v10430_v63  ;;  %v5900_v62 = vld [vmem:[#allocation13 + $0x8f8] sm:$0xff]  ;;  %v10527_v63 = vcombine.low %v5876_v50, %v5884_v51  ;;  %v6160_v51 = vrot.slane %v12959_v22, %v6159_v40 }
 0xad0   :  { %9363 = vmatprep.subr.bf16.mxu1 %v10432_v0  ;;  %v10542_v0 = vcombine.high %v5891_v57, %v5899_v58  ;;  %v10544_v4 = vcombine.high %v5892_v61, %v5900_v62 }
 0xad2   :  { %9282 = vmatpush1.bf16.msra.mxu0 %v10429_v5  ;;  %v5916_v5 = vld [vmem:[#allocation13 + $0x978] sm:$0xff] }
 0xad3   :  { %9364 = vmatpush1.bf16.msra.mxu1 %v10431_v8  ;;  %9283 = vmatprep.subr.bf16.mxu0 %v10446_v12  ;;  %v10541_v8 = vcombine.low %v5891_v57, %v5899_v58  ;;  %v10543_v12 = vcombine.low %v5892_v61, %v5900_v62  ;;  %v10560_v15 = vcombine.high %v5908_v24, %v5916_v5  ;;  %v5987_v57 = vld [vmem:[#allocation13 + $0xbb0] sm:$0xff] }
 0xad4   :  { %9365 = vmatprep.subr.bf16.mxu1 %v10448_v13  ;;  %v10558_v13 = vcombine.high %v5907_v2, %v5915_v3  ;;  %v5995_v58 = vld [vmem:[#allocation13 + $0xbf0] sm:$0xff] }
 0xad6   :  { %9284 = vmatpush1.bf16.msra.mxu0 %v10445_v20  ;;  %v5932_v20 = vld [vmem:[#allocation13 + $0x9f8] sm:$0xff] }
 0xad7   :  { %9366 = vmatpush1.bf16.msra.mxu1 %v10447_v14  ;;  %9285 = vmatprep.subr.bf16.mxu0 %v10462_v21  ;;  %v10557_v14 = vcombine.low %v5907_v2, %v5915_v3  ;;  %v10574_v21 = vcombine.high %v5923_v16, %v5931_v18 }
 0xad8   :  { %9367 = vmatprep.subr.bf16.mxu1 %v10464_v23  ;;  %v10576_v23 = vcombine.high %v5924_v11, %v5932_v20 }
 0xada   :  { %9286 = vmatpush1.bf16.msra.mxu0 %v10461_v17  ;;  %v10575_v17 = vcombine.low %v5924_v11, %v5932_v20 }
 0xadb   :  { %9368 = vmatpush1.bf16.msra.mxu1 %v10463_v30  ;;  %9287 = vmatprep.subr.bf16.mxu0 %v10478_v32  ;;  %v10590_v30 = vcombine.high %v5939_v27, %v5947_v28  ;;  %v10592_v32 = vcombine.high %v5940_v19, %v5948_v29 }
 0xadc   :  { %9369 = vmatprep.subr.bf16.mxu1 %v10480_v33  ;;  %v5955_v33 = vld [vmem:[#allocation13 + $0xab0] sm:$0xff] }
 0xadd   :  { %v10606_v41 = vcombine.high %v5955_v33, %v5963_v25  ;;  %v10605_v50 = vcombine.low %v5955_v33, %v5963_v25  ;;  %v6020_v33 = vld [vmem:[#allocation13 + $0xcb8] sm:$0xff] }
 0xade   :  { %9288 = vmatpush1.bf16.msra.mxu0 %v10477_v36  ;;  %v10589_v36 = vcombine.low %v5939_v27, %v5947_v28  ;;  %v6004_v27 = vld [vmem:[#allocation13 + $0xc38] sm:$0xff] }
 0xadf   :  { %9370 = vmatpush1.bf16.msra.mxu1 %v10479_v37  ;;  %9289 = vmatprep.subr.bf16.mxu0 %v10494_v38  ;;  %v6155_v37 = vsub.s32 6, %v12867_v6  ;;  %v6151_v38 = vsub.s32 5, %v12867_v6  ;;  %v6012_v28 = vld [vmem:[#allocation13 + $0xc78] sm:$0xff] }
 0xae0   :  { %9371 = vmatprep.subr.bf16.mxu1 %v10496_v39  ;;  %v10591_v39 = vcombine.low %v5940_v19, %v5948_v29  ;;  %v10637_v19 = vcombine.low %v5987_v57, %v5995_v58  ;;  %v6028_v25 = vld [vmem:[#allocation13 + $0xcf8] sm:$0xff] }
 0xae1   :  { %v6156_v48 = vrot.slane %v12959_v22, %v6155_v37  ;;  %v6152_v49 = vrot.slane %v12959_v22, %v6151_v38 }
 0xae2   :  { %9290 = vmatpush1.bf16.msra.mxu0 %v10493_v43  ;;  %v5979_v43 = vld [vmem:[#allocation13 + $0xb70] sm:$0xff] }
 0xae3   :  { %9372 = vmatpush1.bf16.msra.mxu1 %v10495_v44  ;;  %9291 = vmatprep.subr.bf16.mxu0 %v10510_v46  ;;  %v6148_v44 = vrot.slane %v12959_v22, %v6147_v60  ;;  %v5972_v46 = vld [vmem:[#allocation13 + $0xb38] sm:$0xff] }
 0xae4   :  { %9373 = vmatprep.subr.bf16.mxu1 %v10512_v47  ;;  %v5980_v47 = vld [vmem:[#allocation13 + $0xb78] sm:$0xff] }
 0xae6   :  { %9292 = vmatpush1.bf16.msra.mxu0 %v10509_v52  ;;  %v10607_v52 = vcombine.low %v5956_v34, %v5964_v35  ;;  %v10655_v35 = vcombine.low %v6004_v27, %v6012_v28 }
 0xae7   :  { %9374 = vmatpush1.bf16.msra.mxu1 %v10511_v53  ;;  %9302 = vmatprep.subr.bf16.mxu0 %v10526_v54  ;;  %v10622_v53 = vcombine.high %v5971_v1, %v5979_v43 }
 0xae8   :  { %9384 = vmatprep.subr.bf16.mxu1 %v10528_v55  ;;  %v10624_v55 = vcombine.high %v5972_v46, %v5980_v47 }
 0xae9   :  { %9294 = vmatmul.mubr.bf16.vlgmr.msra.gmra.mrb[24].mxu0 %v12928_v26 }
 0xaea   :  { %9376 = vmatmul.mubr.bf16.vlgmr.msra.gmra.mrb[36].mxu1 %v12928_v26  ;;  %9303 = vmatpush1.bf16.msra.mxu0 %v10525_v59  ;;  %v10559_v26 = vcombine.low %v5908_v24, %v5916_v5  ;;  %v10621_v5 = vcombine.low %v5971_v1, %v5979_v43  ;;  %v6036_v1 = vld [vmem:[#allocation13 + $0xd38] sm:$0xff] }
 0xaeb   :  { %9334 = vmatprep.mubr.bf16.mxu0 %v12932_v31  ;;  %9385 = vmatpush1.bf16.msra.mxu1 %v10527_v63  ;;  %v5988_v63 = vld [vmem:[#allocation13 + $0xbb8] sm:$0xff] }
 0xaec   :  { %9416 = vmatprep.mubr.bf16.mxu1 %v12932_v31  ;;  %9304 = vmatprep.subr.bf16.mxu0 %v10542_v0  ;;  %v10573_v31 = vcombine.low %v5923_v16, %v5931_v18  ;;  %v5996_v0 = vld [vmem:[#allocation13 + $0xbf8] sm:$0xff]  ;;  %v10638_v16 = vcombine.high %v5987_v57, %v5995_v58  ;;  %v6003_v18 = vld [vmem:[#allocation13 + $0xc30] sm:$0xff] }
 0xaed   :  { %9386 = vmatprep.subr.bf16.mxu1 %v10544_v4  ;;  %v10639_v29 = vcombine.low %v5988_v63, %v5996_v0  ;;  %v6044_v43 = vld [vmem:[#allocation13 + $0xd78] sm:$0xff] }
 0xaee   :  { %9305 = vmatpush1.bf16.msra.mxu0 %v10541_v8  ;;  %v6052_v57 = vld [vmem:[#allocation13 + $0xdb8] sm:$0xff] }
 0xaef   :  { %9387 = vmatpush1.bf16.msra.mxu1 %v10543_v12  ;;  %9306 = vmatprep.subr.bf16.mxu0 %v10558_v13  ;;  %v6060_v58 = vld [vmem:[#allocation13 + $0xdf8] sm:$0xff] }
 0xaf0   :  { %9388 = vmatprep.subr.bf16.mxu1 %v10560_v15  ;;  %v10623_v15 = vcombine.low %v5972_v46, %v5980_v47  ;;  %v10671_v47 = vcombine.low %v6020_v33, %v6028_v25 }
 0xaf2   :  { %9307 = vmatpush1.bf16.msra.mxu0 %v10557_v14 }
 0xaf3   :  { %9389 = vmatpush1.bf16.msra.mxu1 %v10559_v26  ;;  %9308 = vmatprep.subr.bf16.mxu0 %v10574_v21  ;;  %v10640_v26 = vcombine.high %v5988_v63, %v5996_v0  ;;  %v6011_v21 = vld [vmem:[#allocation13 + $0xc70] sm:$0xff]  ;;  %v10687_v0 = vcombine.low %v6036_v1, %v6044_v43 }
 0xaf4   :  { %9390 = vmatprep.subr.bf16.mxu1 %v10576_v23  ;;  %v10653_v34 = vcombine.low %v6003_v18, %v6011_v21 }
 0xaf6   :  { %9309 = vmatpush1.bf16.msra.mxu0 %v10573_v31  ;;  %v10654_v31 = vcombine.high %v6003_v18, %v6011_v21  ;;  %v6091_v18 = vld [vmem:[#allocation13 + $0xef0] sm:$0xff] }
 0xaf7   :  { %9391 = vmatpush1.bf16.msra.mxu1 %v10575_v17  ;;  %9310 = vmatprep.subr.bf16.mxu0 %v10590_v30  ;;  %v10656_v17 = vcombine.high %v6004_v27, %v6012_v28  ;;  %v6019_v30 = vld [vmem:[#allocation13 + $0xcb0] sm:$0xff] }
 0xaf8   :  { %9392 = vmatprep.subr.bf16.mxu1 %v10592_v32  ;;  %v6027_v32 = vld [vmem:[#allocation13 + $0xcf0] sm:$0xff] }
 0xaf9   :  { %v6099_v28 = vld [vmem:[#allocation13 + $0xf30] sm:$0xff] }
 0xafa   :  { %9311 = vmatpush1.bf16.msra.mxu0 %v10589_v36  ;;  %v10670_v36 = vcombine.high %v6019_v30, %v6027_v32 }
 0xafb   :  { %9393 = vmatpush1.bf16.msra.mxu1 %v10591_v39  ;;  %9312 = vmatprep.subr.bf16.mxu0 %v10606_v41  ;;  %v10672_v39 = vcombine.high %v6020_v33, %v6028_v25  ;;  %v6035_v41 = vld [vmem:[#allocation13 + $0xd30] sm:$0xff] }
 0xafc   :  { %v9008_v54 = vpop.f32.mrb[16].mxu0  ;;  %9394 = vmatprep.subr.bf16.mxu1 %v10608_v42  ;;  %v6043_v42 = vld [vmem:[#allocation13 + $0xd70] sm:$0xff] }
 0xafd   :  { %v10875_v59 = vadd.f32 %v9008_v54, %v6148_v44  ;;  %v9090_v61 = vpop.f32.mrb[28].mxu1  ;;  %v9010_v62 = vpop.f32.mrb[17].mxu0  ;;  %v10669_v44 = vcombine.low %v6019_v30, %v6027_v32 }
 0xafe   :  { %v10877_v2 = vadd.f32 %v9090_v61, %v6156_v48  ;;  %v10876_v3 = vadd.f32 %v9010_v62, %v6152_v49  ;;  %v9092_v4 = vpop.f32.mrb[29].mxu1  ;;  %v9012_v24 = vpop.f32.mrb[18].mxu0  ;;  %9313 = vmatpush1.bf16.msra.mxu0 %v10605_v50  ;;  %v10686_v48 = vcombine.high %v6035_v41, %v6043_v42  ;;  %v10685_v62 = vcombine.low %v6035_v41, %v6043_v42  ;;  %v6116_v41 = vld [vmem:[#allocation13 + $0xfb8] sm:$0xff] }
 0xaff   :  { %v10773_v22 = vmul.f32 -1.442695, %v10875_v59  ;;  %v10878_v8 = vadd.f32 %v9092_v4, %v6160_v51  ;;  %v9094_v12 = vpop.f32.mrb[30].mxu1  ;;  %9395 = vmatpush1.bf16.msra.mxu1 %v10607_v52  ;;  %v9013_v13 = vpop.f32.mrb[19].mxu0  ;;  %9314 = vmatprep.subr.bf16.mxu0 %v10622_v53  ;;  %v10688_v51 = vcombine.high %v6036_v1, %v6044_v43  ;;  %v6051_v52 = vld [vmem:[#allocation13 + $0xdb0] sm:$0xff]  ;;  %v6124_v42 = vld [vmem:[#allocation13 + $0xff8] sm:$0xff] }
 0xb00   :  { %v10775_v11 = vmul.f32 -1.442695, %v10877_v2  ;;  %v10774_v20 = vmul.f32 -1.442695, %v10876_v3  ;;  %v9095_v14 = vpop.f32.mrb[31].mxu1  ;;  %9396 = vmatprep.subr.bf16.mxu1 %v10624_v55  ;;  %v6059_v53 = vld [vmem:[#allocation13 + $0xdf0] sm:$0xff]  ;;  %v10704_v3 = vcombine.high %v6052_v57, %v6060_v58  ;;  %v10703_v12 = vcombine.low %v6052_v57, %v6060_v58 }
 0xb01   :  { %12053 = vpow2.f32 %v10773_v22  ;;  %v10776_v23 = vmul.f32 -1.442695, %v10878_v8  ;;  %v10702_v2 = vcombine.high %v6051_v52, %v6059_v53  ;;  %v6067_v4 = vld [vmem:[#allocation13 + $0xe30] sm:$0xff]  ;;  %v6076_v22 = vld [vmem:[#allocation13 + $0xe78] sm:$0xff]  ;;  %v10701_v8 = vcombine.low %v6051_v52, %v6059_v53 }
 0xb02   :  { %12055 = vpow2.f32 %v10775_v11  ;;  %9315 = vmatpush1.bf16.msra.mxu0 %v10621_v5  ;;  %v6075_v24 = vld [vmem:[#allocation13 + $0xe70] sm:$0xff]  ;;  %v6068_v5 = vld [vmem:[#allocation13 + $0xe38] sm:$0xff] }
 0xb03   :  { %12057 = vpow2.f32 %v10774_v20  ;;  %9397 = vmatpush1.bf16.msra.mxu1 %v10623_v15  ;;  %9316 = vmatprep.subr.bf16.mxu0 %v10638_v16  ;;  %v10718_v13 = vcombine.high %v6067_v4, %v6075_v24  ;;  %v10720_v15 = vcombine.high %v6068_v5, %v6076_v22  ;;  %v6083_v16 = vld [vmem:[#allocation13 + $0xeb0] sm:$0xff]  ;;  %v6084_v11 = vld [vmem:[#allocation13 + $0xeb8] sm:$0xff]  ;;  %v10717_v14 = vcombine.low %v6067_v4, %v6075_v24 }
 0xb04   :  { %12059 = vpow2.f32 %v10776_v23  ;;  %9398 = vmatprep.subr.bf16.mxu1 %v10640_v26  ;;  %v6092_v20 = vld [vmem:[#allocation13 + $0xef8] sm:$0xff]  ;;  %v10719_v26 = vcombine.low %v6068_v5, %v6076_v22  ;;  %v10734_v21 = vcombine.high %v6083_v16, %v6091_v18  ;;  %v10733_v32 = vcombine.low %v6083_v16, %v6091_v18 }
 0xb05   :  { %v10736_v27 = vcombine.high %v6084_v11, %v6092_v20  ;;  %v10735_v25 = vcombine.low %v6084_v11, %v6092_v20 }
 0xb06   :  { %9317 = vmatpush1.bf16.msra.mxu0 %v10637_v19  ;;  %v6107_v19 = vld [vmem:[#allocation13 + $0xf70] sm:$0xff] }
 0xb07   :  { %9399 = vmatpush1.bf16.msra.mxu1 %v10639_v29  ;;  %9318 = vmatprep.subr.bf16.mxu0 %v10654_v31  ;;  %v6100_v31 = vld [vmem:[#allocation13 + $0xf38] sm:$0xff]  ;;  %v10749_v1 = vcombine.low %v6099_v28, %v6107_v19 }
 0xb08   :  { %9400 = vmatprep.subr.bf16.mxu1 %v10656_v17  ;;  %v6108_v17 = vld [vmem:[#allocation13 + $0xf78] sm:$0xff] }
 0xb09   :  { %v10751_v43 = vcombine.low %v6100_v31, %v6108_v17 }
 0xb0a   :  { %9319 = vmatpush1.bf16.msra.mxu0 %v10653_v34  ;;  %v10750_v34 = vcombine.high %v6099_v28, %v6107_v19 }
 0xb0b   :  { %v12054_v46 = vpop.eup %12053  ;;  %9401 = vmatpush1.bf16.msra.mxu1 %v10655_v35  ;;  %9320 = vmatprep.subr.bf16.mxu0 %v10670_v36  ;;  %v10752_v35 = vcombine.high %v6100_v31, %v6108_v17  ;;  %v6115_v36 = vld [vmem:[#allocation13 + $0xfb0] sm:$0xff] }
 0xb0c   :  { %v12056_v49 = vpop.eup %12055  ;;  %v9477_v50 = vadd.f32 1.0, %v12054_v46  ;;  %9402 = vmatprep.subr.bf16.mxu1 %v10672_v39  ;;  %v6123_v39 = vld [vmem:[#allocation13 + $0xff0] sm:$0xff]  ;;  %v10768_v46 = vcombine.high %v6116_v41, %v6124_v42 }
 0xb0d   :  { %v12058_v54 = vpop.eup %12057  ;;  %v9479_v55 = vadd.f32 1.0, %v12056_v49  ;;  %v6126_v49 = vld [vmem:[#allocation25 + $0x8] sm:$0xff] }
 0xb0e   :  { %v12060_v59 = vpop.eup %12059  ;;  %12061 = vrcp.f32 %v9477_v50  ;;  %v9478_v61 = vadd.f32 1.0, %v12058_v54  ;;  %9321 = vmatpush1.bf16.msra.mxu0 %v10669_v44  ;;  %v10766_v44 = vcombine.high %v6115_v36, %v6123_v39  ;;  %v6164_v50 = vrot.slane %v6126_v49, %v12870_v7 }
 0xb0f   :  { %12063 = vrcp.f32 %v9479_v55  ;;  %v9480_v63 = vadd.f32 1.0, %v12060_v59  ;;  %9403 = vmatpush1.bf16.msra.mxu1 %v10671_v47  ;;  %9322 = vmatprep.subr.bf16.mxu0 %v10686_v48  ;;  %v10765_v47 = vcombine.low %v6115_v36, %v6123_v39  ;;  %v10767_v48 = vcombine.low %v6116_v41, %v6124_v42 }
 0xb10   :  { %12065 = vrcp.f32 %v9478_v61  ;;  %9404 = vmatprep.subr.bf16.mxu1 %v10688_v51  ;;  %v6172_v51 = vrot.slane %v6126_v49, %v12889_v56  ;;  %v6168_v52 = vrot.slane %v6126_v49, %v12875_v9  ;;  %v6176_v53 = vrot.slane %v6126_v49, %v12878_v10 }
 0xb11   :  { %12067 = vrcp.f32 %v9480_v63 }
 0xb12   :  { %9323 = vmatpush1.bf16.msra.mxu0 %v10685_v62 }
 0xb13   :  { %9405 = vmatpush1.bf16.msra.mxu1 %v10687_v0  ;;  %9324 = vmatprep.subr.bf16.mxu0 %v10702_v2 }
 0xb14   :  { %9406 = vmatprep.subr.bf16.mxu1 %v10704_v3 }
 0xb16   :  { %9325 = vmatpush1.bf16.msra.mxu0 %v10701_v8 }
 0xb17   :  { %9407 = vmatpush1.bf16.msra.mxu1 %v10703_v12  ;;  %9326 = vmatprep.subr.bf16.mxu0 %v10718_v13 }
 0xb18   :  { %v12062_v23 = vpop.eup %12061  ;;  %9408 = vmatprep.subr.bf16.mxu1 %v10720_v15 }
 0xb19   :  { %v12064_v29 = vpop.eup %12063  ;;  %9525 = vst [vmem:[%s13081_s27 + $0x20] sm:$0xff] %v12062_v23  ;;  %v6192_v23 = vrot.slane %v6126_v49, %v6159_v40 }
 0xb1a   :  { %v12066_v30 = vpop.eup %12065  ;;  %9527 = vst [vmem:[%s13081_s27 + $0x30] sm:$0xff] %v12064_v29  ;;  %9327 = vmatpush1.bf16.msra.mxu0 %v10717_v14  ;;  %v6180_v14 = vrot.slane %v6126_v49, %v6147_v60 }
 0xb1b   :  { %v12068_v33 = vpop.eup %12067  ;;  %9526 = vst [vmem:[%s13081_s27 + $0x28] sm:$0xff] %v12066_v30  ;;  %9409 = vmatpush1.bf16.msra.mxu1 %v10719_v26  ;;  %9328 = vmatprep.subr.bf16.mxu0 %v10734_v21  ;;  %v6188_v26 = vrot.slane %v6126_v49, %v6155_v37  ;;  %v6184_v21 = vrot.slane %v6126_v49, %v6151_v38 }
 0xb1c   :  { %9528 = vst [vmem:[%s13081_s27 + $0x38] sm:$0xff] %v12068_v33  ;;  %9410 = vmatprep.subr.bf16.mxu1 %v10736_v27 }
 0xb1e   :  { %9329 = vmatpush1.bf16.msra.mxu0 %v10733_v32 }
 0xb1f   :  { %9411 = vmatpush1.bf16.msra.mxu1 %v10735_v25  ;;  %9330 = vmatprep.subr.bf16.mxu0 %v10750_v34 }
 0xb20   :  { %9412 = vmatprep.subr.bf16.mxu1 %v10752_v35 }
 0xb22   :  { %9331 = vmatpush1.bf16.msra.mxu0 %v10749_v1 }
 0xb23   :  { %9413 = vmatpush1.bf16.msra.mxu1 %v10751_v43  ;;  %9332 = vmatprep.subr.bf16.mxu0 %v10766_v44 }
 0xb24   :  { %9414 = vmatprep.subr.bf16.mxu1 %v10768_v46 }
 0xb26   :  { %9333 = vmatpush1.bf16.msra.mxu0 %v10765_v47 }
 0xb27   :  { %9415 = vmatpush1.bf16.msra.mxu1 %v10767_v48 }
 0xb29   :  { %9335 = vmatmul.mubr.bf16.vlgmr.msra.gmra.mrb[24].mxu0 %v12941_v45 }
 0xb2a   :  { %9417 = vmatmul.mubr.bf16.vlgmr.msra.gmra.mrb[36].mxu1 %v12941_v45 }
 0xb7c   :  { %v9172_v54 = vpop.f32.mrb[20].mxu0 }
 0xb7d   :  { %v10879_v55 = vadd.f32 %v9172_v54, %v6164_v50  ;;  %v9254_v57 = vpop.f32.mrb[32].mxu1  ;;  %v9174_v58 = vpop.f32.mrb[21].mxu0 }
 0xb7e   :  { %v10881_v59 = vadd.f32 %v9254_v57, %v6172_v51  ;;  %v10880_v61 = vadd.f32 %v9174_v58, %v6168_v52  ;;  %v9256_v62 = vpop.f32.mrb[33].mxu1  ;;  %v9176_v63 = vpop.f32.mrb[22].mxu0 }
 0xb7f   :  { %v10777_v0 = vmul.f32 -1.442695, %v10879_v55  ;;  %v10882_v2 = vadd.f32 %v9256_v62, %v6176_v53  ;;  %v9258_v45 = vpop.f32.mrb[34].mxu1  ;;  %v9177_v3 = vpop.f32.mrb[23].mxu0 }
 0xb80   :  { %v10779_v4 = vmul.f32 -1.442695, %v10881_v59  ;;  %v10778_v7 = vmul.f32 -1.442695, %v10880_v61  ;;  %v9259_v24 = vpop.f32.mrb[35].mxu1 }
 0xb81   :  { %12069 = vpow2.f32 %v10777_v0  ;;  %v10780_v56 = vmul.f32 -1.442695, %v10882_v2 }
 0xb82   :  { %12071 = vpow2.f32 %v10779_v4 }
 0xb83   :  { %12073 = vpow2.f32 %v10778_v7 }
 0xb84   :  { %12075 = vpow2.f32 %v10780_v56 }
 0xb8b   :  { %v12070_v9 = vpop.eup %12069 }
 0xb8c   :  { %v12072_v10 = vpop.eup %12071  ;;  %v9481_v5 = vadd.f32 1.0, %v12070_v9 }
 0xb8d   :  { %v12074_v22 = vpop.eup %12073  ;;  %v9483_v8 = vadd.f32 1.0, %v12072_v10 }
 0xb8e   :  { %v12076_v12 = vpop.eup %12075  ;;  %12077 = vrcp.f32 %v9481_v5  ;;  %v9482_v13 = vadd.f32 1.0, %v12074_v22 }
 0xb8f   :  { %12079 = vrcp.f32 %v9483_v8  ;;  %v9484_v15 = vadd.f32 1.0, %v12076_v12 }
 0xb90   :  { %12081 = vrcp.f32 %v9482_v13 }
 0xb91   :  { %12083 = vrcp.f32 %v9484_v15 }
 0xb98   :  { %v12078_v16 = vpop.eup %12077 }
 0xb99   :  { %v12080_v18 = vpop.eup %12079  ;;  %9529 = vst [vmem:[%s13081_s27 + $0x40] sm:$0xff] %v12078_v16 }
 0xb9a   :  { %v12082_v11 = vpop.eup %12081  ;;  %9531 = vst [vmem:[%s13081_s27 + $0x50] sm:$0xff] %v12080_v18 }
 0xb9b   :  { %v12084_v20 = vpop.eup %12083  ;;  %9530 = vst [vmem:[%s13081_s27 + $0x48] sm:$0xff] %v12082_v11 }
 0xb9c   :  { %9532 = vst [vmem:[%s13081_s27 + $0x58] sm:$0xff] %v12084_v20 }
 0xbfc   :  { %v9336_v27 = vpop.f32.mrb[24].mxu0 }
 0xbfd   :  { %v10883_v28 = vadd.f32 %v9336_v27, %v6180_v14  ;;  %v9418_v19 = vpop.f32.mrb[36].mxu1  ;;  %v9338_v29 = vpop.f32.mrb[25].mxu0 }
 0xbfe   :  { %v10885_v31 = vadd.f32 %v9418_v19, %v6188_v26  ;;  %v10884_v17 = vadd.f32 %v9338_v29, %v6184_v21  ;;  %v9420_v30 = vpop.f32.mrb[37].mxu1  ;;  %v9340_v32 = vpop.f32.mrb[26].mxu0 }
 0xbff   :  { %v10781_v33 = vmul.f32 -1.442695, %v10883_v28  ;;  %v10886_v25 = vadd.f32 %v9420_v30, %v6192_v23  ;;  %v9422_v60 = vpop.f32.mrb[38].mxu1  ;;  %v9341_v34 = vpop.f32.mrb[27].mxu0 }
 0xc00   :  { %v10783_v35 = vmul.f32 -1.442695, %v10885_v31  ;;  %v10782_v37 = vmul.f32 -1.442695, %v10884_v17  ;;  %v9423_v36 = vpop.f32.mrb[39].mxu1 }
 0xc01   :  { %12085 = vpow2.f32 %v10781_v33  ;;  %v10784_v38 = vmul.f32 -1.442695, %v10886_v25 }
 0xc02   :  { %12087 = vpow2.f32 %v10783_v35 }
 0xc03   :  { %12089 = vpow2.f32 %v10782_v37 }
 0xc04   :  { %12091 = vpow2.f32 %v10784_v38 }
 0xc0b   :  { %v12086_v6 = vpop.eup %12085 }
 0xc0c   :  { %v12088_v40 = vpop.eup %12087  ;;  %v9485_v39 = vadd.f32 1.0, %v12086_v6 }
 0xc0d   :  { %v12090_v41 = vpop.eup %12089  ;;  %v9487_v42 = vadd.f32 1.0, %v12088_v40 }
 0xc0e   :  { %v12092_v1 = vpop.eup %12091  ;;  %12093 = vrcp.f32 %v9485_v39  ;;  %v9486_v43 = vadd.f32 1.0, %v12090_v41 }
 0xc0f   :  { %12095 = vrcp.f32 %v9487_v42  ;;  %v9488_v44 = vadd.f32 1.0, %v12092_v1 }
 0xc10   :  { %12097 = vrcp.f32 %v9486_v43 }
 0xc11   :  { %12099 = vrcp.f32 %v9488_v44 }
 0xc18   :  { %v12094_v46 = vpop.eup %12093 }
 0xc19   :  { %v12096_v47 = vpop.eup %12095  ;;  %9533 = vst [vmem:[%s13081_s27 + $0x60] sm:$0xff] %v12094_v46 }
 0xc1a   :  { %v12098_v48 = vpop.eup %12097  ;;  %9535 = vst [vmem:[%s13081_s27 + $0x70] sm:$0xff] %v12096_v47 }
 0xc1b   :  { %v12100_v49 = vpop.eup %12099  ;;  %9534 = vst [vmem:[%s13081_s27 + $0x68] sm:$0xff] %v12098_v48 }
 0xc1c   :  { %9536 = vst [vmem:[%s13081_s27 + $0x78] sm:$0xff] %v12100_v49 }
 0xc1d   :  { %9541 = vsyncpa [#allocation3], 1 }
 0xc1e   :  { %9542 = vsyncpa [#allocation5], 1 }
 0xc1f   :  { %9543 = vsyncpa [#allocation8], 1 }
 0xc20   :  { %9544 = vsyncpa [#allocation11], 1 }
 0xc21   :  { %9545 = vsyncpa [#allocation14], 1 }
 0xc22   :  { %9546 = vsyncpa [#allocation17], 1 }
 0xc23   :  { %9547 = vsyncpa [#allocation20], 1 }
 0xc24   :  { %9548 = vsyncpa [#allocation23], 1 }
 0xc25   :  { %9549 = vsyncpa [#allocation26], 1 }

</bundles_post_ra>
